<compile_context>
chip_gen: v7x
topology: tpu7x:2x2x1
jax: 0.10.0
libtpu: 0.0.40
codegen_flags: <defaults>
</compile_context>

<pallas_src>
import numpy as np
import jax
import jax.numpy as jnp
from jax import lax
from jax.experimental import pallas as pl
from jax.experimental.pallas import tpu as pltpu

# ----- model hyper-params -----
N_ATOMS = 16      # atoms in the batch of molecules (power of two)
HIDDEN = 32       # args.model.hidden_dim
K_RBF = 16        # radial basis functions
N_CONF = 3        # len(data.pos)  (number of conformers)
MAX_Z = 100       # max atomic number for embedding table
CUTOFF = 10.0
_SPACING = CUTOFF / (K_RBF - 1)
GAMMA = 0.5 / (_SPACING * _SPACING)
LN2 = float(np.log(2.0))


def _ssp(x):
    # shifted softplus, numerically stable (exp / log1p hit the EUP slot)
    return jnp.maximum(x, 0.0) + jnp.log1p(jnp.exp(-jnp.abs(x))) - LN2


def _mask(cond):
    # bool -> {0,1} f32 via select (lowers cleanly on all TPU generations)
    return jnp.where(cond, 1.0, 0.0).astype(jnp.float32)


def schnet_fused_kernel(pos_ref, h0_ref, zb_ref, wf1_ref, wf2_ref, win_ref,
                        wout_ref, wread_ref, vpack_ref, out_ref):
    H, N = h0_ref.shape              # hidden dim, atoms per conformer
    P = pos_ref.shape[1]             # C*N*N edges -> lane axis of the heavy stages
    CN = P // N                      # C*N atoms across all conformers
    C = CN // N
    K = wf1_ref.shape[1]             # number of RBFs
    CM = out_ref.shape[1]            # C*M molecules across all conformers
    M = CM // C
    f32, bf16 = jnp.float32, jnp.bfloat16
    log_n = int(np.log2(N))          # N, M are powers of two (asserted in wrapper)
    log_m = int(np.log2(M))

    # ---- packed small vectors (mu + biases) ----
    vp = vpack_ref[...]                           # [H, 8]
    mu = vp[0:K, 0:1]                             # [K, 1]
    b_f1, b_f2 = vp[:, 1:2], vp[:, 2:3]           # [H, 1]
    b_out, b_read = vp[:, 3:4], vp[:, 4:5]        # [H, 1]

    # ---- pairwise distances: one packed subtraction, lane-dense [*, P] ----
    pp = pos_ref[...]                             # [6, P] rows: x_i y_i z_i x_j y_j z_j
    dif = pp[0:3, :] - pp[3:6, :]                 # [3, P]
    sq = dif * dif
    d = jnp.sqrt(sq[0:1, :] + sq[1:2, :] + sq[2:3, :])    # [1, P] (exact 0 on self-edges)

    # ---- Gaussian RBF expansion: K on sublanes, edges on lanes ----
    rbf = jnp.exp(-GAMMA * (d - mu) ** 2)         # [K, P] f32

    # ---- one-hot helper matrices generated in-register (no HBM traffic) ----
    # edge index p = (c*N + i)*N + j
    p_lane = lax.broadcasted_iota(jnp.int32, (N, P), 1)
    j_sub = lax.broadcasted_iota(jnp.int32, (N, P), 0)
    tile_jp = _mask((p_lane & (N - 1)) == j_sub)                 # [N, P] neighbour broadcast

    p_sub = lax.broadcasted_iota(jnp.int32, (P, CN), 0)
    cn_lane = lax.broadcasted_iota(jnp.int32, (P, CN), 1)
    smask = _mask(((p_sub >> log_n) == cn_lane) &
                  ((p_sub & (N - 1)) != (cn_lane & (N - 1))))    # [P, CN] segment-sum, j != i

    i_sub = lax.broadcasted_iota(jnp.int32, (N, CN), 0)
    cn_lane2 = lax.broadcasted_iota(jnp.int32, (N, CN), 1)
    tile_cn = _mask((cn_lane2 & (N - 1)) == i_sub)               # [N, CN] conformer tiling of h0

    cn_sub = lax.broadcasted_iota(jnp.int32, (CN, CM), 0)
    cm_lane = lax.broadcasted_iota(jnp.int32, (CN, CM), 1)
    pool = _mask(((cn_sub >> log_n) == (cm_lane >> log_m)) &
                 (zb_ref[...] == (cm_lane & (M - 1))))           # [CN, CM] molecule pooling

    # ---- filter-generating network (bf16 MXU operands, f32 accumulation) ----
    f1 = _ssp(jnp.dot(wf1_ref[...], rbf.astype(bf16),
                      preferred_element_type=f32) + b_f1)        # [H, P]
    f = jnp.dot(wf2_ref[...], f1.astype(bf16),
                preferred_element_type=f32) + b_f2               # [H, P]

    # ---- continuous-filter conv: m_i = sum_{j != i} W_ij * (h0 W_in)_j ----
    h0T = h0_ref[...]                                            # [H, N]
    xinT = jnp.dot(win_ref[...], h0T, preferred_element_type=f32)        # [H, N]
    xin_b = jnp.dot(xinT.astype(bf16), tile_jp.astype(bf16),
                    preferred_element_type=f32)                  # [H, P] (= xin[:, j] per edge)
    fx = (f * xin_b).astype(bf16)
    # the self-edge mask lives in smask, i.e. is applied AFTER the filter
    # network (matches the reference ordering)
    mT = jnp.dot(fx, smask.astype(bf16), preferred_element_type=f32)     # [H, CN]

    # ---- residual interaction update ----
    h0_tiled = jnp.dot(h0T, tile_cn, preferred_element_type=f32)         # [H, CN]
    hT = h0_tiled + _ssp(jnp.dot(wout_ref[...], mT,
                                 preferred_element_type=f32) + b_out)    # [H, CN]

    # ---- per-molecule sum pooling + readout (H-major output, no transpose) ----
    pooledT = jnp.dot(hT, pool, preferred_element_type=f32)              # [H, CM]
    out_ref[...] = jnp.dot(wread_ref[...], pooledT,
                           preferred_element_type=f32) + b_read          # [H, CM]


def run_model3d_kernel(pospack, h0t, zb_t, wf1t, wf2t, wint, woutt, wreadt,
                       vpack, cm):
    H = h0t.shape[0]
    vmem = pl.BlockSpec(memory_space=pltpu.MemorySpace.VMEM)
    return pl.pallas_call(
        schnet_fused_kernel,
        out_shape=jax.ShapeDtypeStruct((H, cm), jnp.float32),
        in_specs=[vmem] * 9,
        out_specs=vmem,
    )(pospack, h0t, zb_t, wf1t, wf2t, wint, woutt, wreadt, vpack)


def make_params(key):
    ks = jax.random.split(key, 10)
    s = 0.1
    p = {
        "embed": s * jax.random.normal(ks[0], (MAX_Z, HIDDEN), jnp.float32),
        "mu": (CUTOFF / (K_RBF - 1)) * jnp.arange(K_RBF, dtype=jnp.float32).reshape(1, K_RBF),
        "wf1": s * jax.random.normal(ks[1], (K_RBF, HIDDEN), jnp.float32),
        "bf1": jnp.zeros((1, HIDDEN), jnp.float32),
        "wf2": s * jax.random.normal(ks[2], (HIDDEN, HIDDEN), jnp.float32),
        "bf2": jnp.zeros((1, HIDDEN), jnp.float32),
        "win": s * jax.random.normal(ks[3], (HIDDEN, HIDDEN), jnp.float32),
        "wout": s * jax.random.normal(ks[4], (HIDDEN, HIDDEN), jnp.float32),
        "bout": jnp.zeros((1, HIDDEN), jnp.float32),
        "wread": s * jax.random.normal(ks[5], (HIDDEN, HIDDEN), jnp.float32),
        "bread": jnp.zeros((1, HIDDEN), jnp.float32),
    }
    return p


def model3d_forward(z, pos_stack, z_batch, cumsum_seq, params):
    """Reproduces Model3D.forward: run the 3D model on every conformer, stack,
    split along the molecule axis by cumsum_seq chunk lengths, reshape, concat."""
    C, N, _ = pos_stack.shape
    cs = np.asarray(cumsum_seq)
    M = int(cs[-1])
    H = params["win"].shape[0]
    K = params["wf1"].shape[0]
    P = C * N * N
    # kernel generates its index matrices with shifts / bit-masks
    assert (N & (N - 1)) == 0 and (M & (M - 1)) == 0, "N and M must be powers of two"

    # --- glue: embedding lookup (gather) stays in XLA ---
    h0 = jnp.take(params["embed"], z, axis=0)                    # [N, H]
    h0t = h0.T                                                   # [H, N]

    # --- glue: per-edge coordinate broadcasts (pure layout plumbing) ---
    pa = jnp.broadcast_to(pos_stack[:, :, None, :], (C, N, N, 3)).reshape(P, 3).T  # x_i
    pb = jnp.broadcast_to(pos_stack[:, None, :, :], (C, N, N, 3)).reshape(P, 3).T  # x_j
    pospack = jnp.concatenate([pa, pb], axis=0)                  # [6, P]

    # --- glue: z_batch tiled over conformers as a tiny int column (192 B) ---
    zb_t = jnp.tile(z_batch.astype(jnp.int32), C).reshape(C * N, 1)   # [C*N, 1]

    # --- glue: mu + biases packed into one small slab ---
    vpack = jnp.zeros((H, 8), jnp.float32)
    vpack = vpack.at[:K, 0].set(params["mu"].reshape(K))
    vpack = vpack.at[:, 1].set(params["bf1"].reshape(H))
    vpack = vpack.at[:, 2].set(params["bf2"].reshape(H))
    vpack = vpack.at[:, 3].set(params["bout"].reshape(H))
    vpack = vpack.at[:, 4].set(params["bread"].reshape(H))

    # --- hot path: ONE fused Pallas kernel over all conformers -> [H, C*M] ---
    out_hm = run_model3d_kernel(
        pospack, h0t, zb_t,
        params["wf1"].T.astype(jnp.bfloat16),    # bf16 MXU operands
        params["wf2"].T.astype(jnp.bfloat16),
        params["win"].T, params["wout"].T, params["wread"].T,
        vpack, C * M)

    # --- glue: H-major -> [C, M, H] (== torch.stack output) ---
    centroids_3d_stack = out_hm.T.reshape(C, M, H)

    # --- glue: torch.split(dim=1) -> reshape(C*L, H) per chunk -> cat(dim=0) ---
    boundaries = cs[1:-1].tolist()
    chunks = jnp.split(centroids_3d_stack, boundaries, axis=1)
    chunks = [c.reshape(c.shape[0] * c.shape[1], c.shape[2]) for c in chunks]
    return jnp.concatenate(chunks, axis=0)                       # [C*M, H]


if __name__ == "__main__":
    key = jax.random.PRNGKey(0)
    k_params, k_z, k_pos = jax.random.split(key, 3)

    params = make_params(k_params)

    # synthetic molecular batch: 16 atoms across 4 molecules, 3 conformers
    z = jax.random.randint(k_z, (N_ATOMS,), 1, 10, dtype=jnp.int32)
    pos_stack = jax.random.normal(k_pos, (N_CONF, N_ATOMS, 3), jnp.float32) * 2.0
    z_batch = jnp.array([0] * 5 + [1] * 4 + [2] * 4 + [3] * 3, dtype=jnp.int32)
    # sequence chunking over molecules: chunk lengths = [1, 2, 1]
    cumsum_seq = jnp.array([0, 1, 3, 4], dtype=jnp.int32)

    out = model3d_forward(z, pos_stack, z_batch, cumsum_seq, params)
    out = jax.block_until_ready(out)

    assert out.shape == (N_CONF * 4, HIDDEN), out.shape
    assert bool(jnp.all(jnp.isfinite(out)))
    print("KERNEL_OK")
</pallas_src>

<mosaic_0001>
module attributes {stable_mosaic.version = 11 : i64} {
  func.func @schnet_fused_kernel(%arg0: memref<6x768xf32, #tpu.memory_space<vmem>>, %arg1: memref<32x16xf32, #tpu.memory_space<vmem>>, %arg2: memref<48x1xi32, #tpu.memory_space<vmem>>, %arg3: memref<32x16xbf16, #tpu.memory_space<vmem>>, %arg4: memref<32x32xbf16, #tpu.memory_space<vmem>>, %arg5: memref<32x32xf32, #tpu.memory_space<vmem>>, %arg6: memref<32x32xf32, #tpu.memory_space<vmem>>, %arg7: memref<32x32xf32, #tpu.memory_space<vmem>>, %arg8: memref<32x8xf32, #tpu.memory_space<vmem>>, %arg9: memref<32x12xf32, #tpu.memory_space<vmem>>) attributes {dimension_semantics = [], scalar_prefetch = 0 : i64, scratch_operands = 0 : i64, tpu.core_type = #tpu.core_type<tc>} {
    %c0 = arith.constant 0 : index
    %c0_0 = arith.constant 0 : index
    %0 = vector.load %arg8[%c0, %c0_0] : memref<32x8xf32, #tpu.memory_space<vmem>>, vector<32x8xf32>
    %1 = vector.extract_strided_slice %0 {offsets = [0, 0], sizes = [16, 1], strides = [1, 1]} : vector<32x8xf32> to vector<16x1xf32>
    %2 = vector.extract_strided_slice %0 {offsets = [0, 1], sizes = [32, 1], strides = [1, 1]} : vector<32x8xf32> to vector<32x1xf32>
    %3 = vector.extract_strided_slice %0 {offsets = [0, 2], sizes = [32, 1], strides = [1, 1]} : vector<32x8xf32> to vector<32x1xf32>
    %4 = vector.extract_strided_slice %0 {offsets = [0, 3], sizes = [32, 1], strides = [1, 1]} : vector<32x8xf32> to vector<32x1xf32>
    %5 = vector.extract_strided_slice %0 {offsets = [0, 4], sizes = [32, 1], strides = [1, 1]} : vector<32x8xf32> to vector<32x1xf32>
    %c0_1 = arith.constant 0 : index
    %c0_2 = arith.constant 0 : index
    %6 = vector.load %arg0[%c0_1, %c0_2] : memref<6x768xf32, #tpu.memory_space<vmem>>, vector<6x768xf32>
    %7 = vector.extract_strided_slice %6 {offsets = [0, 0], sizes = [3, 768], strides = [1, 1]} : vector<6x768xf32> to vector<3x768xf32>
    %8 = vector.extract_strided_slice %6 {offsets = [3, 0], sizes = [3, 768], strides = [1, 1]} : vector<6x768xf32> to vector<3x768xf32>
    %9 = arith.subf %7, %8 : vector<3x768xf32>
    %10 = arith.mulf %9, %9 : vector<3x768xf32>
    %11 = vector.extract_strided_slice %10 {offsets = [0, 0], sizes = [1, 768], strides = [1, 1]} : vector<3x768xf32> to vector<1x768xf32>
    %12 = vector.extract_strided_slice %10 {offsets = [1, 0], sizes = [1, 768], strides = [1, 1]} : vector<3x768xf32> to vector<1x768xf32>
    %13 = arith.addf %11, %12 : vector<1x768xf32>
    %14 = vector.extract_strided_slice %10 {offsets = [2, 0], sizes = [1, 768], strides = [1, 1]} : vector<3x768xf32> to vector<1x768xf32>
    %15 = arith.addf %13, %14 : vector<1x768xf32>
    %16 = math.sqrt %15 : vector<1x768xf32>
    %17 = vector.broadcast %16 : vector<1x768xf32> to vector<16x768xf32>
    %18 = vector.broadcast %1 : vector<16x1xf32> to vector<16x768xf32>
    %19 = arith.subf %17, %18 : vector<16x768xf32>
    %20 = arith.mulf %19, %19 : vector<16x768xf32>
    %cst = arith.constant -1.125000e+00 : f32
    %21 = vector.broadcast %cst : f32 to vector<16x768xf32>
    %22 = arith.mulf %21, %20 : vector<16x768xf32>
    %23 = math.exp %22 : vector<16x768xf32>
    %24 = tpu.iota {dimensions = array<i32: 1>} : vector<16x768xi32>
    %25 = tpu.iota {dimensions = array<i32: 0>} : vector<16x768xi32>
    %c15_i32 = arith.constant 15 : i32
    %26 = vector.broadcast %c15_i32 : i32 to vector<16x768xi32>
    %27 = arith.andi %24, %26 : vector<16x768xi32>
    %28 = arith.cmpi eq, %27, %25 : vector<16x768xi32>
    %cst_3 = arith.constant 1.000000e+00 : f32
    %cst_4 = arith.constant 0.000000e+00 : f32
    %29 = vector.broadcast %cst_3 : f32 to vector<16x768xf32>
    %30 = vector.broadcast %cst_4 : f32 to vector<16x768xf32>
    %31 = arith.select %28, %29, %30 : vector<16x768xi1>, vector<16x768xf32>
    %32 = tpu.iota {dimensions = array<i32: 0>} : vector<768x48xi32>
    %33 = tpu.iota {dimensions = array<i32: 1>} : vector<768x48xi32>
    %c4_i32 = arith.constant 4 : i32
    %34 = vector.broadcast %c4_i32 : i32 to vector<768x48xi32>
    %35 = arith.shrsi %32, %34 : vector<768x48xi32>
    %36 = arith.cmpi eq, %35, %33 : vector<768x48xi32>
    %c15_i32_5 = arith.constant 15 : i32
    %37 = vector.broadcast %c15_i32_5 : i32 to vector<768x48xi32>
    %38 = arith.andi %32, %37 : vector<768x48xi32>
    %c15_i32_6 = arith.constant 15 : i32
    %39 = vector.broadcast %c15_i32_6 : i32 to vector<768x48xi32>
    %40 = arith.andi %33, %39 : vector<768x48xi32>
    %41 = arith.cmpi ne, %38, %40 : vector<768x48xi32>
    %42 = arith.andi %36, %41 : vector<768x48xi1>
    %cst_7 = arith.constant 1.000000e+00 : f32
    %cst_8 = arith.constant 0.000000e+00 : f32
    %43 = vector.broadcast %cst_7 : f32 to vector<768x48xf32>
    %44 = vector.broadcast %cst_8 : f32 to vector<768x48xf32>
    %45 = arith.select %42, %43, %44 : vector<768x48xi1>, vector<768x48xf32>
    %46 = tpu.iota {dimensions = array<i32: 0>} : vector<16x48xi32>
    %47 = tpu.iota {dimensions = array<i32: 1>} : vector<16x48xi32>
    %c15_i32_9 = arith.constant 15 : i32
    %48 = vector.broadcast %c15_i32_9 : i32 to vector<16x48xi32>
    %49 = arith.andi %47, %48 : vector<16x48xi32>
    %50 = arith.cmpi eq, %49, %46 : vector<16x48xi32>
    %cst_10 = arith.constant 1.000000e+00 : f32
    %cst_11 = arith.constant 0.000000e+00 : f32
    %51 = vector.broadcast %cst_10 : f32 to vector<16x48xf32>
    %52 = vector.broadcast %cst_11 : f32 to vector<16x48xf32>
    %53 = arith.select %50, %51, %52 : vector<16x48xi1>, vector<16x48xf32>
    %54 = tpu.iota {dimensions = array<i32: 0>} : vector<48x12xi32>
    %55 = tpu.iota {dimensions = array<i32: 1>} : vector<48x12xi32>
    %c4_i32_12 = arith.constant 4 : i32
    %56 = vector.broadcast %c4_i32_12 : i32 to vector<48x12xi32>
    %57 = arith.shrsi %54, %56 : vector<48x12xi32>
    %c2_i32 = arith.constant 2 : i32
    %58 = vector.broadcast %c2_i32 : i32 to vector<48x12xi32>
    %59 = arith.shrsi %55, %58 : vector<48x12xi32>
    %60 = arith.cmpi eq, %57, %59 : vector<48x12xi32>
    %c0_13 = arith.constant 0 : index
    %c0_14 = arith.constant 0 : index
    %61 = vector.load %arg2[%c0_13, %c0_14] : memref<48x1xi32, #tpu.memory_space<vmem>>, vector<48x1xi32>
    %c3_i32 = arith.constant 3 : i32
    %62 = vector.broadcast %c3_i32 : i32 to vector<48x12xi32>
    %63 = arith.andi %55, %62 : vector<48x12xi32>
    %64 = vector.broadcast %61 : vector<48x1xi32> to vector<48x12xi32>
    %65 = arith.cmpi eq, %64, %63 : vector<48x12xi32>
    %66 = arith.andi %60, %65 : vector<48x12xi1>
    %cst_15 = arith.constant 1.000000e+00 : f32
    %cst_16 = arith.constant 0.000000e+00 : f32
    %67 = vector.broadcast %cst_15 : f32 to vector<48x12xf32>
    %68 = vector.broadcast %cst_16 : f32 to vector<48x12xf32>
    %69 = arith.select %66, %67, %68 : vector<48x12xi1>, vector<48x12xf32>
    %c0_17 = arith.constant 0 : index
    %c0_18 = arith.constant 0 : index
    %70 = vector.load %arg3[%c0_17, %c0_18] : memref<32x16xbf16, #tpu.memory_space<vmem>>, vector<32x16xbf16>
    %71 = arith.truncf %23 : vector<16x768xf32> to vector<16x768xbf16>
    %cst_19 = arith.constant dense<0.000000e+00> : vector<32x768xf32>
    %72 = tpu.matmul %70, %71, %cst_19 {dimension_numbers = #tpu.dot_dimension_numbers<[1], [0], [0], [1], [0, 0, 1, 1], [], []>} : vector<32x16xbf16>, vector<16x768xbf16>, vector<32x768xf32> -> vector<32x768xf32>
    %73 = vector.broadcast %2 : vector<32x1xf32> to vector<32x768xf32>
    %74 = arith.addf %72, %73 : vector<32x768xf32>
    %cst_20 = arith.constant 0.000000e+00 : f32
    %75 = vector.broadcast %cst_20 : f32 to vector<32x768xf32>
    %76 = arith.maximumf %74, %75 : vector<32x768xf32>
    %77 = math.absf %74 : vector<32x768xf32>
    %cst_21 = arith.constant 0.000000e+00 : f32
    %78 = vector.broadcast %cst_21 : f32 to vector<32x768xf32>
    %79 = arith.subf %78, %77 : vector<32x768xf32>
    %80 = math.exp %79 : vector<32x768xf32>
    %81 = math.log1p %80 : vector<32x768xf32>
    %82 = arith.addf %76, %81 : vector<32x768xf32>
    %cst_22 = arith.constant 0.693147182 : f32
    %83 = vector.broadcast %cst_22 : f32 to vector<32x768xf32>
    %84 = arith.subf %82, %83 : vector<32x768xf32>
    %c0_23 = arith.constant 0 : index
    %c0_24 = arith.constant 0 : index
    %85 = vector.load %arg4[%c0_23, %c0_24] : memref<32x32xbf16, #tpu.memory_space<vmem>>, vector<32x32xbf16>
    %86 = arith.truncf %84 : vector<32x768xf32> to vector<32x768xbf16>
    %cst_25 = arith.constant dense<0.000000e+00> : vector<32x768xf32>
    %87 = tpu.matmul %85, %86, %cst_25 {dimension_numbers = #tpu.dot_dimension_numbers<[1], [0], [0], [1], [0, 0, 1, 1], [], []>} : vector<32x32xbf16>, vector<32x768xbf16>, vector<32x768xf32> -> vector<32x768xf32>
    %88 = vector.broadcast %3 : vector<32x1xf32> to vector<32x768xf32>
    %89 = arith.addf %87, %88 : vector<32x768xf32>
    %c0_26 = arith.constant 0 : index
    %c0_27 = arith.constant 0 : index
    %90 = vector.load %arg1[%c0_26, %c0_27] : memref<32x16xf32, #tpu.memory_space<vmem>>, vector<32x16xf32>
    %c0_28 = arith.constant 0 : index
    %c0_29 = arith.constant 0 : index
    %91 = vector.load %arg5[%c0_28, %c0_29] : memref<32x32xf32, #tpu.memory_space<vmem>>, vector<32x32xf32>
    %cst_30 = arith.constant dense<0.000000e+00> : vector<32x16xf32>
    %92 = tpu.matmul %91, %90, %cst_30 {dimension_numbers = #tpu.dot_dimension_numbers<[1], [0], [0], [1], [0, 0, 1, 1], [], []>} : vector<32x32xf32>, vector<32x16xf32>, vector<32x16xf32> -> vector<32x16xf32>
    %93 = arith.truncf %92 : vector<32x16xf32> to vector<32x16xbf16>
    %94 = arith.truncf %31 : vector<16x768xf32> to vector<16x768xbf16>
    %cst_31 = arith.constant dense<0.000000e+00> : vector<32x768xf32>
    %95 = tpu.matmul %93, %94, %cst_31 {dimension_numbers = #tpu.dot_dimension_numbers<[1], [0], [0], [1], [0, 0, 1, 1], [], []>} : vector<32x16xbf16>, vector<16x768xbf16>, vector<32x768xf32> -> vector<32x768xf32>
    %96 = arith.mulf %89, %95 : vector<32x768xf32>
    %97 = arith.truncf %96 : vector<32x768xf32> to vector<32x768xbf16>
    %98 = arith.truncf %45 : vector<768x48xf32> to vector<768x48xbf16>
    %cst_32 = arith.constant dense<0.000000e+00> : vector<32x48xf32>
    %99 = tpu.matmul %97, %98, %cst_32 {dimension_numbers = #tpu.dot_dimension_numbers<[1], [0], [0], [1], [0, 0, 1, 1], [], []>} : vector<32x768xbf16>, vector<768x48xbf16>, vector<32x48xf32> -> vector<32x48xf32>
    %cst_33 = arith.constant dense<0.000000e+00> : vector<32x48xf32>
    %100 = tpu.matmul %90, %53, %cst_33 {dimension_numbers = #tpu.dot_dimension_numbers<[1], [0], [0], [1], [0, 0, 1, 1], [], []>} : vector<32x16xf32>, vector<16x48xf32>, vector<32x48xf32> -> vector<32x48xf32>
    %c0_34 = arith.constant 0 : index
    %c0_35 = arith.constant 0 : index
    %101 = vector.load %arg6[%c0_34, %c0_35] : memref<32x32xf32, #tpu.memory_space<vmem>>, vector<32x32xf32>
    %cst_36 = arith.constant dense<0.000000e+00> : vector<32x48xf32>
    %102 = tpu.matmul %101, %99, %cst_36 {dimension_numbers = #tpu.dot_dimension_numbers<[1], [0], [0], [1], [0, 0, 1, 1], [], []>} : vector<32x32xf32>, vector<32x48xf32>, vector<32x48xf32> -> vector<32x48xf32>
    %103 = vector.broadcast %4 : vector<32x1xf32> to vector<32x48xf32>
    %104 = arith.addf %102, %103 : vector<32x48xf32>
    %cst_37 = arith.constant 0.000000e+00 : f32
    %105 = vector.broadcast %cst_37 : f32 to vector<32x48xf32>
    %106 = arith.maximumf %104, %105 : vector<32x48xf32>
    %107 = math.absf %104 : vector<32x48xf32>
    %cst_38 = arith.constant 0.000000e+00 : f32
    %108 = vector.broadcast %cst_38 : f32 to vector<32x48xf32>
    %109 = arith.subf %108, %107 : vector<32x48xf32>
    %110 = math.exp %109 : vector<32x48xf32>
    %111 = math.log1p %110 : vector<32x48xf32>
    %112 = arith.addf %106, %111 : vector<32x48xf32>
    %cst_39 = arith.constant 0.693147182 : f32
    %113 = vector.broadcast %cst_39 : f32 to vector<32x48xf32>
    %114 = arith.subf %112, %113 : vector<32x48xf32>
    %115 = arith.addf %100, %114 : vector<32x48xf32>
    %cst_40 = arith.constant dense<0.000000e+00> : vector<32x12xf32>
    %116 = tpu.matmul %115, %69, %cst_40 {dimension_numbers = #tpu.dot_dimension_numbers<[1], [0], [0], [1], [0, 0, 1, 1], [], []>} : vector<32x48xf32>, vector<48x12xf32>, vector<32x12xf32> -> vector<32x12xf32>
    %c0_41 = arith.constant 0 : index
    %c0_42 = arith.constant 0 : index
    %117 = vector.load %arg7[%c0_41, %c0_42] : memref<32x32xf32, #tpu.memory_space<vmem>>, vector<32x32xf32>
    %cst_43 = arith.constant dense<0.000000e+00> : vector<32x12xf32>
    %118 = tpu.matmul %117, %116, %cst_43 {dimension_numbers = #tpu.dot_dimension_numbers<[1], [0], [0], [1], [0, 0, 1, 1], [], []>} : vector<32x32xf32>, vector<32x12xf32>, vector<32x12xf32> -> vector<32x12xf32>
    %119 = vector.broadcast %5 : vector<32x1xf32> to vector<32x12xf32>
    %120 = arith.addf %118, %119 : vector<32x12xf32>
    %c0_44 = arith.constant 0 : index
    %c0_45 = arith.constant 0 : index
    %121 = vector.load %arg9[%c0_44, %c0_45] : memref<32x12xf32, #tpu.memory_space<vmem>>, vector<32x12xf32>
    tpu.vector_store %arg9[%c0_44, %c0_45], %120 {strides = array<i32>} : memref<32x12xf32, #tpu.memory_space<vmem>>, vector<32x12xf32>,
    return
  }
}

</mosaic_0001>

<bundles_post_ra>
// kernel: tpu_custom_call.1
= control target key start
LH: loop header
LB: loop body
LE: loop exit
PB: predicated region body
PF: predicated region fallthrough
CT: control target
= control target key end

     0   :  { %v6459_v0 = vmov 0   ;;  %v3420_v4 = vmov 1   ;;  %v6458_v55 = vlaneseq  ;;  %vm6465_vm12 = vcmask 130048   ;;  %s6448_s8 = inlined_call_operand.vmem [shape: f32[32,8], index: 8, kind: input, shape index: {}]   ;;  %s6449_s3 = inlined_call_operand.vmem [shape: bf16[32,16], index: 3, kind: input, shape index: {}]   ;;  %s6450_s0 = inlined_call_operand.vmem [shape: f32[6,768], index: 0, kind: input, shape index: {}]   ;;  %s6451_s4 = inlined_call_operand.vmem [shape: bf16[32,32], index: 4, kind: input, shape index: {}]   ;;  %s6452_s1 = inlined_call_operand.vmem [shape: f32[32,16], index: 1, kind: input, shape index: {}]   ;;  %s6453_s5 = inlined_call_operand.vmem [shape: f32[32,32], index: 5, kind: input, shape index: {}]   ;;  %s6454_s6 = inlined_call_operand.vmem [shape: f32[32,32], index: 6, kind: input, shape index: {}]   ;;  %s6455_s2 = inlined_call_operand.vmem [shape: s32[48,1], index: 2, kind: input, shape index: {}]   ;;  %s6456_s7 = inlined_call_operand.vmem [shape: f32[32,32], index: 7, kind: input, shape index: {}]   ;;  %s6457_s9 = inlined_call_operand.vmem [shape: f32[32,12], index: 9, kind: output, shape index: {}]  }
   0x1   :  { %3244 = vset.pattern.permute.xlu0 %v6459_v0  ;;  %v33_v1 = vld [vmem:[%s6448_s8] sm:$0xff]  ;;  %1088 = vmatprep.mubr.bf16.mxu0 %v6459_v0  ;;  %v34_v2 = vld [vmem:[%s6448_s8 + $0x8] sm:$0xff]  ;;  %v35_v3 = vld [vmem:[%s6448_s8 + $0x10] sm:$0xff] }
   0x2   :  { %183 = vperm.xlu0 %3244, %v33_v1   ;;  %1141 = vmatprep.mubr.bf16.mxu1 %v6459_v0  ;;  %v36_v5 = vld [vmem:[%s6448_s8 + $0x18] sm:$0xff]  ;;  %v37_v6 = vld [vmem:[%s6450_s0] sm:$0x3f]  ;;  %v38_v7 = vld [vmem:[%s6450_s0 + $0x8] sm:$0x3f]  ;;  %v3509_v60 = vshrl.u32 %v6458_v55, 7 }
   0x3   :  { %3245 = vset.pattern.permute.xlu1 %v3420_v4  ;;  %v40_v8 = vld [vmem:[%s6450_s0 + $0x18] sm:$0x3f]  ;;  %v42_v9 = vld [vmem:[%s6450_s0 + $0x28] sm:$0x3f]  ;;  %v49_v10 = vrot.slane %v37_v6, 3  ;;  %v50_v12 = vrot.slane %v38_v7, 3 }
   0x4   :  { %1022 = vperm.xlu1 %3245, %v33_v1   ;;  %v39_v11 = vld [vmem:[%s6450_s0 + $0x10] sm:$0x3f]  ;;  %v41_v13 = vld [vmem:[%s6450_s0 + $0x20] sm:$0x3f]  ;;  %v52_v14 = vrot.slane %v40_v8, 3  ;;  %v54_v15 = vrot.slane %v42_v9, 3 }
   0x5   :  { %v51_v16 = vrot.slane %v39_v11, 3  ;;  %v61_v17 = vsub.f32 %v37_v6, %v49_v10  ;;  %v53_v18 = vrot.slane %v41_v13, 3  ;;  %v62_v19 = vsub.f32 %v38_v7, %v50_v12  ;;  %6584 = vst [vmem:[#allocation2_spill] sm:$0xff] %v3509_v60 }
   0x6   :  { %188 = vperm.xlu0 %3244, %v34_v2   ;;  %v64_v20 = vsub.f32 %v40_v8, %v52_v14  ;;  %v66_v21 = vsub.f32 %v42_v9, %v54_v15  ;;  %v159_v14 = vsub.s32 0, %v3509_v60 }
   0x7   :  { %v63_v22 = vsub.f32 %v39_v11, %v51_v16  ;;  %v67_v23 = vmul.f32 %v61_v17, %v61_v17  ;;  %v65_v24 = vsub.f32 %v41_v13, %v53_v18  ;;  %v68_v25 = vmul.f32 %v62_v19, %v62_v19 }
   0x8   :  { %1026 = vperm.xlu1 %3245, %v34_v2   ;;  %v70_v26 = vmul.f32 %v64_v20, %v64_v20  ;;  %v72_v27 = vmul.f32 %v66_v21, %v66_v21 }
   0x9   :  { %v69_v28 = vmul.f32 %v63_v22, %v63_v22  ;;  %v79_v29 = vrot.slane %v67_v23, 1  ;;  %v71_v30 = vmul.f32 %v65_v24, %v65_v24  ;;  %v80_v31 = vrot.slane %v68_v25, 1 }
   0xa   :  { %3246 = vset.pattern.permute.xlu0 %v3420_v4  ;;  %v82_v32 = vrot.slane %v70_v26, 1  ;;  %v84_v33 = vrot.slane %v72_v27, 1  ;;  %v97_v36 = vrot.slane %v67_v23, 2  ;;  %v98_v39 = vrot.slane %v68_v25, 2 }
   0xb   :  { %1031 = vperm.xlu0 %3246, %v35_v3   ;;  %v81_v34 = vrot.slane %v69_v28, 1  ;;  %v91_v35 = vadd.f32 %v79_v29, %v67_v23  ;;  %v83_v37 = vrot.slane %v71_v30, 1  ;;  %v92_v38 = vadd.f32 %v80_v31, %v68_v25 }
   0xc   :  { %1036 = vperm.xlu1 %3245, %v36_v5   ;;  %v94_v40 = vadd.f32 %v82_v32, %v70_v26  ;;  %v100_v41 = vrot.slane %v70_v26, 2  ;;  %v96_v42 = vadd.f32 %v84_v33, %v72_v27  ;;  %v102_v43 = vrot.slane %v72_v27, 2 }
   0xd   :  { %v93_v44 = vadd.f32 %v81_v34, %v69_v28  ;;  %v99_v45 = vrot.slane %v69_v28, 2  ;;  %v109_v46 = vadd.f32 %v97_v36, %v91_v35  ;;  %v95_v47 = vadd.f32 %v83_v37, %v71_v30 }
   0xe   :  { %v101_v48 = vrot.slane %v71_v30, 2  ;;  %v110_v49 = vadd.f32 %v98_v39, %v92_v38  ;;  %v112_v50 = vadd.f32 %v100_v41, %v94_v40  ;;  %v114_v51 = vadd.f32 %v102_v43, %v96_v42 }
   0xf   :  { %v111_v52 = vadd.f32 %v99_v45, %v93_v44  ;;  %3259 = vrsqrt.f32 %v109_v46  ;;  %vm117_vm0 = vcmp.eq.f32.partialorder %v109_v46, inf  ;;  %vm119_vm1 = vcmp.eq.f32.partialorder %v109_v46, 0.0 }
  0x10   :  { %v113_v53 = vadd.f32 %v101_v48, %v95_v47  ;;  %3261 = vrsqrt.f32 %v110_v49  ;;  %v120_v63 = vand.u32 2147483648, %v109_v46  ;;  %vm124_vm2 = vcmp.eq.f32.partialorder %v110_v49, inf }
  0x11   :  { %3263 = vrsqrt.f32 %v112_v50  ;;  %vm126_vm3 = vcmp.eq.f32.partialorder %v110_v49, 0.0  ;;  %v127_v4 = vand.u32 2147483648, %v110_v49  ;;  %vm138_vm4 = vcmp.eq.f32.partialorder %v112_v50, inf }
  0x12   :  { %3265 = vrsqrt.f32 %v114_v51  ;;  %vm152_vm5 = vcmp.eq.f32.partialorder %v114_v51, inf  ;;  %vm131_vm6 = vcmp.eq.f32.partialorder %v111_v52, inf  ;;  %v134_v6 = vand.u32 2147483648, %v111_v52 }
  0x13   :  { %3267 = vrsqrt.f32 %v111_v52  ;;  %v141_v7 = vand.u32 2147483648, %v112_v50  ;;  %vm145_vm7 = vcmp.eq.f32.partialorder %v113_v53, inf  ;;  %v155_v11 = vand.u32 2147483648, %v114_v51 }
  0x14   :  { %3269 = vrsqrt.f32 %v113_v53  ;;  %vm140_vm8 = vcmp.eq.f32.partialorder %v112_v50, 0.0  ;;  %vm154_vm9 = vcmp.eq.f32.partialorder %v114_v51, 0.0  ;;  %vm133_vm10 = vcmp.eq.f32.partialorder %v111_v52, 0.0 }
  0x15   :  { %v148_v16 = vand.u32 2147483648, %v113_v53  ;;  %vm147_vm11 = vcmp.eq.f32.partialorder %v113_v53, 0.0 }
  0x19   :  { %v3260_v54 = vpop.eup %3259 }
  0x1a   :  { %v3262_v56 = vpop.eup %3261  ;;  %v116_v62 = vmul.f32 %v3260_v54, %v109_v46 }
  0x1b   :  { %v3264_v57 = vpop.eup %3263  ;;  %v123_v1 = vmul.f32 %v3262_v56, %v110_v49 }
  0x1c   :  { %v3266_v58 = vpop.eup %3265  ;;  %v137_v2 = vmul.f32 %v3264_v57, %v112_v50  ;;  %v118_v9 = vsel %vm117_vm0, %v109_v46, %v116_v62 }
  0x1d   :  { %v3268_v59 = vpop.eup %3267  ;;  %v151_v3 = vmul.f32 %v3266_v58, %v114_v51  ;;  %v125_v10 = vsel %vm124_vm2, %v110_v49, %v123_v1  ;;  %v121_v17 = vsel %vm119_vm1, %v120_v63, %v118_v9 }
  0x1e   :  { %v3270_v61 = vpop.eup %3269  ;;  %v130_v5 = vmul.f32 %v3268_v59, %v111_v52  ;;  %v139_v12 = vsel %vm138_vm4, %v112_v50, %v137_v2  ;;  %v128_v18 = vsel %vm126_vm3, %v127_v4, %v125_v10  ;;  %v160_v24 = vrot.slane %v121_v17, %v159_v14 }
  0x1f   :  { %v144_v8 = vmul.f32 %v3270_v61, %v113_v53  ;;  %v153_v13 = vsel %vm152_vm5, %v114_v51, %v151_v3  ;;  %v142_v20 = vsel %vm140_vm8, %v141_v7, %v139_v12  ;;  %v164_v25 = vrot.slane %v128_v18, %v159_v14 }
  0x20   :  { %v132_v15 = vsel %vm131_vm6, %v111_v52, %v130_v5  ;;  %v156_v21 = vsel %vm154_vm9, %v155_v11, %v153_v13  ;;  %v172_v26 = vrot.slane %v142_v20, %v159_v14 }
  0x21   :  { %v146_v19 = vsel %vm145_vm7, %v113_v53, %v144_v8  ;;  %v135_v22 = vsel %vm133_vm10, %v134_v6, %v132_v15  ;;  %v180_v27 = vrot.slane %v156_v21, %v159_v14 }
  0x22   :  { %v149_v23 = vsel %vm147_vm11, %v148_v16, %v146_v19  ;;  %v168_v28 = vrot.slane %v135_v22, %v159_v14 }
  0x23   :  { %v176_v30 = vrot.slane %v149_v23, %v159_v14 }
  0x81   :  { %v184_v29 = vpop.permute.xlu0 %183 }
  0x82   :  { %v191_v31 = vsub.f32 %v160_v24, %v184_v29  ;;  %v192_v32 = vsub.f32 %v164_v25, %v184_v29  ;;  %v194_v33 = vsub.f32 %v172_v26, %v184_v29  ;;  %v196_v34 = vsub.f32 %v180_v27, %v184_v29 }
  0x83   :  { %v193_v35 = vsub.f32 %v168_v28, %v184_v29  ;;  %v195_v36 = vsub.f32 %v176_v30, %v184_v29 }
  0x84   :  { %v208_v37 = vmul.f32 %v196_v34, %v196_v34  ;;  %v203_v39 = vmul.f32 %v191_v31, %v191_v31  ;;  %v204_v40 = vmul.f32 %v192_v32, %v192_v32  ;;  %v206_v43 = vmul.f32 %v194_v33, %v194_v33  ;;  %v3255_v34 = vld [vmem:[%s6449_s3] sm:$0xff]  }
  0x85   :  { %v189_v38 = vpop.permute.xlu0 %188  ;;  %v205_v47 = vmul.f32 %v193_v35, %v193_v35  ;;  %v207_v54 = vmul.f32 %v195_v36, %v195_v36 }
  0x86   :  { %v197_v41 = vsub.f32 %v160_v24, %v189_v38  ;;  %v198_v42 = vsub.f32 %v164_v25, %v189_v38  ;;  %v220_v44 = vmul.f32 -1.125, %v208_v37  ;;  %v199_v45 = vsub.f32 %v168_v28, %v189_v38 }
  0x87   :  { %v200_v46 = vsub.f32 %v172_v26, %v189_v38  ;;  %v201_v48 = vsub.f32 %v176_v30, %v189_v38  ;;  %v202_v49 = vsub.f32 %v180_v27, %v189_v38  ;;  %v216_v58 = vmul.f32 -1.125, %v204_v40  ;;  %v3256_v38 = vld [vmem:[%s6449_s3 + $0x8] sm:$0xff]  }
  0x88   :  { %v210_v50 = vmul.f32 %v198_v42, %v198_v42  ;;  %v237_v51 = vmul.f32 1.442695, %v220_v44  ;;  %v209_v52 = vmul.f32 %v197_v41, %v197_v41  ;;  %v215_v59 = vmul.f32 -1.125, %v203_v39  ;;  %v3533_v39 = vpop.permute.xlu1 %1022 }
  0x89   :  { %v212_v53 = vmul.f32 %v200_v46, %v200_v46  ;;  %v213_v56 = vmul.f32 %v201_v48, %v201_v48  ;;  %v214_v57 = vmul.f32 %v202_v49, %v202_v49  ;;  %v211_v61 = vmul.f32 %v199_v45, %v199_v45 }
  0x8a   :  { %v222_v62 = vmul.f32 -1.125, %v210_v50  ;;  %v218_v63 = vmul.f32 -1.125, %v206_v43  ;;  %v217_v1 = vmul.f32 -1.125, %v205_v47  ;;  %v229_v4 = vmul.f32 1.442695, %v216_v58 }
  0x8b   :  { %v225_v2 = vmul.f32 -1.125, %v213_v56  ;;  %v226_v3 = vmul.f32 -1.125, %v214_v57  ;;  %3271 = vpow2.f32 %v237_v51  ;;  %v221_v5 = vmul.f32 -1.125, %v209_v52 }
  0x8c   :  { %v241_v6 = vmul.f32 1.442695, %v222_v62  ;;  %v224_v7 = vmul.f32 -1.125, %v212_v53  ;;  %3273 = vpow2.f32 %v229_v4  ;;  %v233_v10 = vmul.f32 1.442695, %v218_v63  ;;  %v3535_v41 = vpop.permute.xlu1 %1026 }
  0x8d   :  { %v247_v8 = vmul.f32 1.442695, %v225_v2  ;;  %v249_v9 = vmul.f32 1.442695, %v226_v3  ;;  %v223_v11 = vmul.f32 -1.125, %v211_v61  ;;  %v219_v14 = vmul.f32 -1.125, %v207_v54 }
  0x8e   :  { %3275 = vpow2.f32 %v241_v6  ;;  %v245_v12 = vmul.f32 1.442695, %v224_v7  ;;  %v227_v13 = vmul.f32 1.442695, %v215_v59  ;;  %v239_v15 = vmul.f32 1.442695, %v221_v5 }
  0x8f   :  { %3277 = vpow2.f32 %v247_v8  ;;  %v231_v16 = vmul.f32 1.442695, %v217_v1  ;;  %v243_v17 = vmul.f32 1.442695, %v223_v11  ;;  %v235_v18 = vmul.f32 1.442695, %v219_v14  ;;  %v3564_v8 = vpop.permute.xlu0 %1031 }
  0x90   :  { %3279 = vpow2.f32 %v249_v9 }
  0x91   :  { %3281 = vpow2.f32 %v233_v10 }
  0x92   :  { %3283 = vpow2.f32 %v245_v12 }
  0x93   :  { %3285 = vpow2.f32 %v227_v13 }
  0x94   :  { %3287 = vpow2.f32 %v239_v15 }
  0x95   :  { %3289 = vpow2.f32 %v231_v16  ;;  %v3272_v19 = vpop.eup %3271 }
  0x96   :  { %3291 = vpow2.f32 %v243_v17  ;;  %v3274_v20 = vpop.eup %3273 }
  0x97   :  { %3293 = vpow2.f32 %v235_v18 }
  0x98   :  { %v3276_v21 = vpop.eup %3275 }
  0x99   :  { %v3278_v22 = vpop.eup %3277  ;;  %v1016_v23 = vpack.c.bf16 %v3276_v21, %v3274_v20 }
  0x9a   :  { %v3280_v24 = vpop.eup %3279 }
  0x9b   :  { %v3282_v25 = vpop.eup %3281  ;;  %1056 = vmatprep.subr.bf16.mxu0 %v1016_v23  ;;  %v1020_v33 = vpack.c.bf16 %v3280_v24, %v3272_v19 }
  0x9c   :  { %v3284_v26 = vpop.eup %3283 }
  0x9d   :  { %v3286_v27 = vpop.eup %3285  ;;  %v1018_v28 = vpack.c.bf16 %v3284_v26, %v3282_v25 }
  0x9e   :  { %v3288_v29 = vpop.eup %3287 }
  0x9f   :  { %v3290_v30 = vpop.eup %3289  ;;  %1109 = vmatprep.subr.bf16.mxu1 %v1018_v28  ;;  %v1015_v31 = vpack.c.bf16 %v3288_v29, %v3286_v27 }
  0xa0   :  { %v3292_v32 = vpop.eup %3291 }
  0xa1   :  { %1057 = vmatpush1.bf16.msra.mxu0 %v1015_v31  ;;  %v1017_v35 = vpack.c.bf16 %v3292_v32, %v3290_v30  ;;  %v3294_v36 = vpop.eup %3293  ;;  %v1807_v32 = vld [vmem:[%s6452_s1] sm:$0xff] }
  0xa2   :  { %1162 = vmatprep.subr.bf16.mxu0 %v1020_v33  ;;  %v1019_v37 = vpack.c.bf16 %v3278_v22, %v3294_v36  ;;  %v1808_v33 = vld [vmem:[%s6452_s1 + $0x8] sm:$0xff] }
  0xa3   :  { %1110 = vmatpush1.bf16.msra.mxu1 %v1017_v35 }
  0xa4   :  { %2820 = vmatmul.mubr.msk.bf16.vlgmr.msra.gmra.mrb[0].mxu0 %vm6465_vm12, %v3255_v34 }
  0xa5   :  { %1163 = vmatpush1.bf16.msra.mxu0 %v1019_v37  ;;  %1098 = vmatprep.mubr.bf16.mxu0 %v6459_v0 }
  0xa6   :  { %2822 = vmatmul.mubr.msk.bf16.vlgmr.msra.gmra.mrb[0].mxu1 %vm6465_vm12, %v3255_v34 }
  0xa7   :  { %1151 = vmatprep.mubr.bf16.mxu1 %v6459_v0 }
  0xac   :  { %2821 = vmatmul.mubr.msk.bf16.gmra.mrb[4].mxu0 %vm6465_vm12, %v3256_v38 }
  0xad   :  { %1194 = vmatprep.mubr.bf16.mxu0 %v6459_v0 }
  0xae   :  { %2823 = vmatmul.mubr.msk.bf16.gmra.mrb[4].mxu1 %vm6465_vm12, %v3256_v38 }
  0xaf   :  { %1680 = vmatprep.mubr.bf16.mxu1 %v6459_v0 }
  0xb4   :  { %2824 = vmatmul.mubr.msk.bf16.vlgmr.msra.gmra.mrb[8].mxu0 %vm6465_vm12, %v3255_v34 }
  0xb5   :  { %1204 = vmatprep.mubr.bf16.mxu0 %v6459_v0 }
  0xbc   :  { %2825 = vmatmul.mubr.msk.bf16.gmra.mrb[12].mxu0 %vm6465_vm12, %v3256_v38 }
  0xbd   :  { %1733 = vmatprep.mubr.bf16.mxu0 %v6459_v0 }
 0x177   :  { %v1090_v40 = vpop.f32.mrb[0].mxu0 }
 0x178   :  { %v3538_v42 = vadd.f32 %v1090_v40, %v3533_v39  ;;  %v1092_v43 = vpop.f32.mrb[1].mxu0 }
 0x179   :  { %v1143_v44 = vpop.f32.mrb[0].mxu1  ;;  %v3541_v45 = vadd.f32 %v1092_v43, %v3533_v39  ;;  %v1094_v46 = vpop.f32.mrb[2].mxu0 }
 0x17a   :  { %v1239_v47 = vand.u32 2147483647, %v3538_v42  ;;  %v3545_v48 = vadd.f32 %v1143_v44, %v3533_v39  ;;  %v1145_v49 = vpop.f32.mrb[1].mxu1  ;;  %v3548_v50 = vadd.f32 %v1094_v46, %v3535_v41  ;;  %v1096_v51 = vpop.f32.mrb[3].mxu0 }
 0x17b   :  { %v1240_v52 = vand.u32 2147483647, %v3541_v45  ;;  %v3552_v53 = vadd.f32 %v1145_v49, %v3533_v39  ;;  %v1147_v54 = vpop.f32.mrb[2].mxu1  ;;  %v3555_v56 = vadd.f32 %v1096_v51, %v3535_v41 }
 0x17c   :  { %v1263_v57 = vsub.f32 0.0, %v1239_v47  ;;  %v1241_v58 = vand.u32 2147483647, %v3545_v48  ;;  %v1149_v59 = vpop.f32.mrb[3].mxu1  ;;  %v1245_v63 = vand.u32 2147483647, %v3548_v50  ;;  %v3561_v3 = vadd.f32 %v1147_v54, %v3535_v41 }
 0x17d   :  { %v1264_v61 = vsub.f32 0.0, %v1240_v52  ;;  %v1242_v62 = vand.u32 2147483647, %v3552_v53  ;;  %v1246_v7 = vand.u32 2147483647, %v3555_v56  ;;  %v3568_v17 = vadd.f32 %v1149_v59, %v3535_v41 }
 0x17e   :  { %v1287_v1 = vmul.f32 1.442695, %v1263_v57  ;;  %v1265_v2 = vsub.f32 0.0, %v1241_v58  ;;  %v1269_v6 = vsub.f32 0.0, %v1245_v63  ;;  %v1247_v10 = vand.u32 2147483647, %v3561_v3 }
 0x17f   :  { %v1289_v4 = vmul.f32 1.442695, %v1264_v61  ;;  %v1266_v5 = vsub.f32 0.0, %v1242_v62  ;;  %v1100_v11 = vpop.f32.mrb[4].mxu0  ;;  %v1270_v14 = vsub.f32 0.0, %v1246_v7  ;;  %v3596_v47 = vpack.c.bf16 %v1808_v33, %v1807_v32 }
 0x180   :  { %3295 = vpow2.f32 %v1287_v1  ;;  %v1291_v9 = vmul.f32 1.442695, %v1265_v2  ;;  %v1299_v13 = vmul.f32 1.442695, %v1269_v6  ;;  %v1271_v16 = vsub.f32 0.0, %v1247_v10  ;;  %v1102_v19 = vpop.f32.mrb[5].mxu0  ;;  %v3620_v10 = vpop.permute.xlu1 %1036 }
 0x181   :  { %3297 = vpow2.f32 %v1289_v4  ;;  %v1293_v12 = vmul.f32 1.442695, %v1266_v5  ;;  %v1153_v15 = vpop.f32.mrb[4].mxu1  ;;  %v3571_v18 = vadd.f32 %v1100_v11, %v3564_v8  ;;  %v1301_v21 = vmul.f32 1.442695, %v1270_v14  ;;  %v1104_v23 = vpop.f32.mrb[6].mxu0 }
 0x182   :  { %3299 = vpow2.f32 %v1291_v9  ;;  %v1155_v20 = vpop.f32.mrb[5].mxu1  ;;  %v3574_v22 = vadd.f32 %v1153_v15, %v3564_v8  ;;  %v1303_v25 = vmul.f32 1.442695, %v1271_v16  ;;  %v1248_v26 = vand.u32 2147483647, %v3568_v17  ;;  %v1106_v27 = vpop.f32.mrb[7].mxu0 }
 0x183   :  { %3301 = vpow2.f32 %v1293_v12  ;;  %v1157_v24 = vpop.f32.mrb[6].mxu1  ;;  %v1251_v28 = vand.u32 2147483647, %v3571_v18  ;;  %v3590_v38 = vadd.f32 %v1102_v19, %v3564_v8  ;;  %6585 = vst [vmem:[#allocation3_spill] sm:$0xff] %v3596_v47  ;;  %v3624_v12 = vadd.f32 %v1155_v20, %v3564_v8 }
 0x184   :  { %3303 = vpow2.f32 %v1299_v13  ;;  %v3578_v29 = vpop.f32.mrb[7].mxu1  ;;  %v1272_v30 = vsub.f32 0.0, %v1248_v26  ;;  %v1253_v31 = vand.u32 2147483647, %v3574_v22  ;;  %v3631_v16 = vadd.f32 %v1104_v23, %v3620_v10 }
 0x185   :  { %3305 = vpow2.f32 %v1303_v25  ;;  %v1275_v34 = vsub.f32 0.0, %v1251_v28  ;;  %v1252_v6 = vand.u32 2147483647, %v3590_v38  ;;  %v3636_v25 = vadd.f32 %v1157_v24, %v3620_v10 }
 0x186   :  { %3307 = vpow2.f32 %v1301_v21  ;;  %v1305_v36 = vmul.f32 1.442695, %v1272_v30  ;;  %v1277_v37 = vsub.f32 0.0, %v1253_v31  ;;  %v3646_v23 = vadd.f32 %v1106_v27, %v3620_v10 }
 0x187   :  { %v3587_v35 = vpop.f32.mrb[8].mxu0  ;;  %v1311_v46 = vmul.f32 1.442695, %v1275_v34  ;;  %v3643_v30 = vsub.f32 0.0, %v1252_v6 }
 0x188   :  { %v3592_v40 = vpop.f32.mrb[9].mxu0  ;;  %3309 = vpow2.f32 %v1305_v36  ;;  %v1315_v5 = vmul.f32 1.442695, %v1277_v37 }
 0x189   :  { %v3603_v57 = vpop.f32.mrb[10].mxu0  ;;  %3311 = vpow2.f32 %v1311_v46 }
 0x18a   :  { %v3598_v49 = vpop.eup %3295  ;;  %v3611_v1 = vpop.f32.mrb[11].mxu0 }
 0x18b   :  { %v3605_v58 = vpop.eup %3297  ;;  %v1335_v59 = vadd.f32 1.0, %v3598_v49  ;;  %v1338_v19 = vmul.f32 -0.5, %v3598_v49  ;;  %v1341_v32 = vand.u32 2147483647, %v3598_v49 }
 0x18c   :  { %v3613_v2 = vpop.eup %3299  ;;  %v1344_v4 = vadd.f32 1.0, %v3605_v58  ;;  %v1347_v28 = vmul.f32 -0.5, %v3605_v58 }
 0x18d   :  { %v3617_v7 = vpop.eup %3301  ;;  %3313 = vlog2.f32 %v1335_v59  ;;  %v1353_v9 = vadd.f32 1.0, %v3613_v2  ;;  %v1356_v33 = vmul.f32 -0.5, %v3613_v2  ;;  %v1359_v46 = vand.u32 2147483647, %v3613_v2 }
 0x18e   :  { %v3626_v13 = vpop.eup %3303  ;;  %3315 = vlog2.f32 %v1344_v4  ;;  %v1362_v21 = vadd.f32 1.0, %v3617_v7  ;;  %v1350_v59 = vand.u32 2147483647, %v3605_v58  ;;  %v1365_v6 = vmul.f32 -0.5, %v3617_v7 }
 0x18f   :  { %3317 = vlog2.f32 %v1353_v9  ;;  %v3638_v20 = vpop.f32.mrb[12].mxu0  ;;  %v3640_v26 = vpop.eup %3305  ;;  %v1389_v24 = vadd.f32 1.0, %v3626_v13  ;;  %v1348_v0 = vadd.f32 1.0, %v1347_v28  ;;  %v1392_v34 = vmul.f32 -0.5, %v3626_v13 }
 0x190   :  { %3319 = vpow2.f32 %v1315_v5  ;;  %v3648_v31 = vpop.f32.mrb[13].mxu0  ;;  %v3656_v37 = vpop.eup %3307  ;;  %v1407_v27 = vadd.f32 1.0, %v3640_v26  ;;  %v1339_v5 = vadd.f32 1.0, %v1338_v19  ;;  %vm3669_vm13 = vcmp.lt.f32.partialorder %v1341_v32, 0.0004427343 }
 0x191   :  { %v3654_v36 = vpop.f32.mrb[14].mxu0  ;;  %3321 = vlog2.f32 %v1362_v21  ;;  %v1357_v14 = vadd.f32 1.0, %v1356_v33  ;;  %v1410_v19 = vmul.f32 -0.5, %v3640_v26  ;;  %v1398_v11 = vadd.f32 1.0, %v3656_v37 }
 0x192   :  { %v3661_v4 = vpop.f32.mrb[15].mxu0  ;;  %3323 = vlog2.f32 %v1389_v24  ;;  %v3665_v55 = vpop.eup %3309  ;;  %vm3677_vm14 = vcmp.lt.f32.partialorder %v1359_v46, 0.0004427343  ;;  %vm3681_vm15 = vcmp.lt.f32.partialorder %v1350_v59, 0.0004427343  ;;  %v1401_v32 = vmul.f32 -0.5, %v3656_v37 }
 0x193   :  { %6586 = vst [vmem:[#allocation4_spill] sm:$0xff] %v3661_v4  ;;  %3325 = vlog2.f32 %v1407_v27  ;;  %v3675_v24 = vpop.eup %3311  ;;  %v1416_v27 = vadd.f32 1.0, %v3665_v55  ;;  %v1340_v33 = vmul.f32 %v3598_v49, %v1339_v5  ;;  %v1366_v52 = vadd.f32 1.0, %v1365_v6 }
 0x194   :  { %v1368_v15 = vand.u32 2147483647, %v3617_v7  ;;  %v1395_v61 = vand.u32 2147483647, %v3626_v13  ;;  %v1349_v9 = vmul.f32 %v3605_v58, %v1348_v0  ;;  %v1393_v59 = vadd.f32 1.0, %v1392_v34 }
 0x195   :  { %v1413_v54 = vand.u32 2147483647, %v3640_v26  ;;  %v1358_v43 = vmul.f32 %v3613_v2, %v1357_v14  ;;  %v1411_v60 = vadd.f32 1.0, %v1410_v19  ;;  %3327 = vlog2.f32 %v1398_v11 }
 0x196   :  { %v1443_v47 = vadd.f32 1.0, %v3675_v24  ;;  %v1402_v6 = vadd.f32 1.0, %v1401_v32  ;;  %3329 = vlog2.f32 %v1416_v27  ;;  %v1419_v4 = vmul.f32 -0.5, %v3665_v55 }
 0x197   :  { %v3314_v62 = vpop.eup %3313  ;;  %v1367_v0 = vmul.f32 %v3617_v7, %v1366_v52  ;;  %vm3698_vm0 = vcmp.lt.f32.partialorder %v1368_v15, 0.0004427343  ;;  %vm3702_vm1 = vcmp.lt.f32.partialorder %v1395_v61, 0.0004427343  ;;  %v1394_v14 = vmul.f32 %v3626_v13, %v1393_v59 }
 0x198   :  { %v3316_v46 = vpop.eup %3315  ;;  %v1337_v44 = vmul.f32 0.6931472, %v3314_v62  ;;  %3331 = vlog2.f32 %v1443_v47  ;;  %vm3709_vm2 = vcmp.lt.f32.partialorder %v1413_v54, 0.0004427343  ;;  %v1404_v52 = vand.u32 2147483647, %v3656_v37 }
 0x199   :  { %v3318_v51 = vpop.eup %3317  ;;  %v1346_v62 = vmul.f32 0.6931472, %v3316_v46  ;;  %v1412_v15 = vmul.f32 %v3640_v26, %v1411_v60  ;;  %v1422_v47 = vand.u32 2147483647, %v3665_v55  ;;  %v3720_v13 = vmul.f32 %v3656_v37, %v1402_v6 }
 0x19a   :  { %v3694_v49 = vpop.eup %3319  ;;  %v1355_v5 = vmul.f32 0.6931472, %v3318_v51  ;;  %v1343_v51 = vsel %vm3669_vm13, %v1340_v33, %v1337_v44  ;;  %v1420_v54 = vadd.f32 1.0, %v1419_v4  ;;  %v1446_v32 = vmul.f32 -0.5, %v3675_v24 }
 0x19b   :  { %v3322_v11 = vpop.eup %3321  ;;  %v1461_v19 = vadd.f32 1.0, %v3694_v49  ;;  %v6599_v27 = vmax.f32 %v3538_v42, 0.0  ;;  %v6600_v60 = vmax.f32 %v3545_v48, 0.0  ;;  %v1313_v37 = vmul.f32 1.442695, %v3643_v30 }
 0x19c   :  { %v3324_v7 = vpop.eup %3323  ;;  %v1361_v61 = vsel %vm3677_vm14, %v1358_v43, %v1355_v5  ;;  %v1352_v43 = vsel %vm3681_vm15, %v1349_v9, %v1346_v62  ;;  %v1364_v46 = vmul.f32 0.6931472, %v3322_v11  ;;  %v6601_v4 = vmax.f32 %v3548_v50, 0.0 }
 0x19d   :  { %v3326_v21 = vpop.eup %3325  ;;  %v1391_v44 = vmul.f32 0.6931472, %v3324_v7  ;;  %v1551_v33 = vadd.f32 %v1343_v51, %v6599_v27  ;;  %3333 = vlog2.f32 %v1461_v19  ;;  %v1553_v26 = vadd.f32 %v1361_v61, %v6600_v60 }
 0x19e   :  { %v1409_v63 = vmul.f32 0.6931472, %v3326_v21  ;;  %vm3736_vm3 = vcmp.lt.f32.partialorder %v1404_v52, 0.0004427343  ;;  %v1449_v9 = vand.u32 2147483647, %v3675_v24  ;;  %3335 = vpow2.f32 %v1313_v37 }
 0x19f   :  { %v1397_v59 = vsel %vm3702_vm1, %v1394_v14, %v1391_v44  ;;  %v6604_v48 = vand.u32 2147483647, %v3624_v12  ;;  %v6605_v62 = vmax.f32 %v3541_v45, 0.0  ;;  %v6606_v30 = vmax.f32 %v3561_v3, 0.0  ;;  %v3328_v14 = vpop.eup %3327 }
 0x1a0   :  { %v1557_v5 = vadd.f32 %v1397_v59, %v6601_v4  ;;  %v1415_v42 = vsel %vm3709_vm2, %v1412_v15, %v1409_v63  ;;  %vm3747_vm4 = vcmp.lt.f32.partialorder %v1422_v47, 0.0004427343  ;;  %v1447_v51 = vadd.f32 1.0, %v1446_v32  ;;  %v3330_v61 = vpop.eup %3329 }
 0x1a1   :  { %v1278_v6 = vsub.f32 0.0, %v6604_v48  ;;  %v1552_v2 = vadd.f32 %v1352_v43, %v6605_v62  ;;  %v1559_v11 = vadd.f32 %v1415_v42, %v6606_v30  ;;  %v3751_v34 = vadd.f32 -0.6931472, %v1551_v33 }
 0x1a2   :  { %v3753_v52 = vadd.f32 -0.6931472, %v1557_v5  ;;  %v3755_v15 = vadd.f32 -0.6931472, %v1553_v26  ;;  %v1370_v45 = vsel %vm3698_vm0, %v1367_v0, %v1364_v46  ;;  %v6609_v47 = vand.u32 2147483647, %v3631_v16  ;;  %v3332_v21 = vpop.eup %3331 }
 0x1a3   :  { %v1317_v7 = vmul.f32 1.442695, %v1278_v6  ;;  %v3759_v3 = vadd.f32 -0.6931472, %v1559_v11  ;;  %v1421_v32 = vmul.f32 %v3665_v55, %v1420_v54  ;;  %vm3766_vm5 = vcmp.lt.f32.partialorder %v1449_v9, 0.0004427343 }
 0x1a4   :  { %v1281_v19 = vsub.f32 0.0, %v6609_v47  ;;  %v1603_v44 = vpack.c.bf16 %v3753_v52, %v3751_v34  ;;  %v1400_v0 = vmul.f32 0.6931472, %v3328_v14  ;;  %v1464_v33 = vmul.f32 -0.5, %v3694_v49  ;;  %v1809_v52 = vld [vmem:[%s6452_s1 + $0x10] sm:$0xff] }
 0x1a5   :  { %3337 = vpow2.f32 %v1317_v7  ;;  %v1605_v58 = vpack.c.bf16 %v3759_v3, %v3755_v15  ;;  %v3773_v63 = vadd.f32 -0.6931472, %v1552_v2  ;;  %v6612_v60 = vmax.f32 %v3552_v53, 0.0  ;;  %v1810_v15 = vld [vmem:[%s6452_s1 + $0x18] sm:$0xff] }
 0x1a6   :  { %v1323_v43 = vmul.f32 1.442695, %v1281_v19  ;;  %v1418_v46 = vmul.f32 0.6931472, %v3330_v61  ;;  %v1259_v55 = vand.u32 2147483647, %v3636_v25  ;;  %v1448_v59 = vmul.f32 %v3675_v24, %v1447_v51 }
 0x1a7   :  { %v1554_v26 = vadd.f32 %v1370_v45, %v6612_v60  ;;  %v1445_v54 = vmul.f32 0.6931472, %v3332_v21  ;;  %v1258_v37 = vand.u32 2147483647, %v3646_v23  ;;  %v3334_v4 = vpop.eup %3333  ;;  %v1467_v5 = vand.u32 2147483647, %v3694_v49 }
 0x1a8   :  { %3339 = vpow2.f32 %v1323_v43  ;;  %v1283_v42 = vsub.f32 0.0, %v1259_v55  ;;  %v3783_v9 = vadd.f32 %v3578_v29, %v3620_v10  ;;  %v3787_v53 = vadd.f32 %v3587_v35, %v3533_v39  ;;  %v3804_v14 = vpop.eup %3335 }
 0x1a9   :  { %v1406_v48 = vsel %vm3736_vm3, %v3720_v13, %v1400_v0  ;;  %v1465_v24 = vadd.f32 1.0, %v1464_v33  ;;  %v1282_v6 = vsub.f32 0.0, %v1258_v37  ;;  %v3794_v62 = vadd.f32 %v3592_v40, %v3533_v39 }
 0x1aa   :  { %v3796_v2 = vadd.f32 -0.6931472, %v1554_v26  ;;  %v1424_v29 = vsel %vm3747_vm4, %v1421_v32, %v1418_v46  ;;  %v1463_v30 = vmul.f32 0.6931472, %v3334_v4  ;;  %v1327_v11 = vmul.f32 1.442695, %v1283_v42 }
 0x1ab   :  { %v1451_v35 = vsel %vm3766_vm5, %v1448_v59, %v1445_v54  ;;  %v1325_v51 = vmul.f32 1.442695, %v1282_v6  ;;  %v1260_v28 = vand.u32 2147483647, %v3783_v9  ;;  %v1243_v13 = vand.u32 2147483647, %v3787_v53 }
 0x1ac   :  { %v6613_v39 = vmax.f32 %v3555_v56, 0.0  ;;  %vm3808_vm6 = vcmp.lt.f32.partialorder %v1467_v5, 0.0004427343  ;;  %3341 = vpow2.f32 %v1327_v11  ;;  %v1244_v50 = vand.u32 2147483647, %v3794_v62 }
 0x1ad   :  { %v6616_v61 = vmax.f32 %v3568_v17, 0.0  ;;  %v1466_v47 = vmul.f32 %v3694_v49, %v1465_v24  ;;  %v1452_v19 = vadd.f32 1.0, %v3804_v14  ;;  %3343 = vpow2.f32 %v1325_v51 }
 0x1ae   :  { %v1558_v40 = vadd.f32 %v1406_v48, %v6613_v39  ;;  %v6617_v56 = vmax.f32 %v3571_v18, 0.0  ;;  %v1284_v27 = vsub.f32 0.0, %v1260_v28  ;;  %v1267_v0 = vsub.f32 0.0, %v1243_v13 }
 0x1af   :  { %v1560_v45 = vadd.f32 %v1424_v29, %v6616_v61  ;;  %v3817_v21 = vpop.eup %3337  ;;  %v1268_v33 = vsub.f32 0.0, %v1244_v50  ;;  %v1469_v43 = vsel %vm3808_vm6, %v1466_v47, %v1463_v30  ;;  %3345 = vlog2.f32 %v1452_v19 }
 0x1b0   :  { %v1563_v32 = vadd.f32 %v1451_v35, %v6617_v56  ;;  %v1470_v17 = vadd.f32 1.0, %v3817_v21  ;;  %v3826_v49 = vadd.f32 %v3603_v57, %v3535_v41  ;;  %v3828_v60 = vadd.f32 -0.6931472, %v1558_v40 }
 0x1b1   :  { %v1233_v26 = vmax.f32 %v3631_v16, 0.0  ;;  %v1235_v18 = vmax.f32 %v3636_v25, 0.0  ;;  %v1329_v46 = vmul.f32 1.442695, %v1284_v27  ;;  %v3834_v54 = vadd.f32 -0.6931472, %v1560_v45 }
 0x1b2   :  { %v3832_v55 = vpop.eup %3339  ;;  %3347 = vlog2.f32 %v1470_v17  ;;  %v1234_v59 = vmax.f32 %v3646_v23, 0.0  ;;  %v1295_v37 = vmul.f32 1.442695, %v1267_v0  ;;  %v3837_v4 = vadd.f32 -0.6931472, %v1563_v32  ;;  %v6637_v23 = vld [vmem:[#allocation4_spill] sm:$0xff] }
 0x1b3   :  { %v6618_v57 = vmax.f32 %v3574_v22, 0.0  ;;  %v1497_v42 = vadd.f32 1.0, %v3832_v55  ;;  %v1297_v48 = vmul.f32 1.442695, %v1268_v33  ;;  %v1455_v24 = vmul.f32 -0.5, %v3804_v14 }
 0x1b4   :  { %3349 = vpow2.f32 %v1329_v46  ;;  %v1249_v6 = vand.u32 2147483647, %v3826_v49  ;;  %v3846_v29 = vadd.f32 %v3611_v1, %v3535_v41  ;;  %v1458_v30 = vand.u32 2147483647, %v3804_v14 }
 0x1b5   :  { %v1565_v5 = vadd.f32 %v1469_v43, %v6618_v57  ;;  %3351 = vlog2.f32 %v1497_v42  ;;  %v1236_v11 = vmax.f32 %v3783_v9, 0.0  ;;  %v1219_v22 = vmax.f32 %v3787_v53, 0.0 }
 0x1b6   :  { %v1473_v35 = vmul.f32 -0.5, %v3817_v21  ;;  %3353 = vpow2.f32 %v1295_v37  ;;  %v1220_v51 = vmax.f32 %v3794_v62, 0.0  ;;  %v1273_v28 = vsub.f32 0.0, %v1249_v6  ;;  %v3342_v13 = vpop.eup %3341 }
 0x1b7   :  { %v3853_v39 = vadd.f32 -0.6931472, %v1565_v5  ;;  %v1500_v40 = vmul.f32 -0.5, %v3832_v55  ;;  %3355 = vpow2.f32 %v1297_v48  ;;  %v1250_v41 = vand.u32 2147483647, %v3846_v29  ;;  %v3344_v1 = vpop.eup %3343 }
 0x1b8   :  { %v1456_v7 = vadd.f32 1.0, %v1455_v24  ;;  %v1515_v50 = vadd.f32 1.0, %v3342_v13  ;;  %v1307_v61 = vmul.f32 1.442695, %v1273_v28  ;;  %v3859_v45 = vadd.f32 %v3638_v20, %v3564_v8 }
 0x1b9   :  { %vm3861_vm7 = vcmp.lt.f32.partialorder %v1458_v30, 0.0004427343  ;;  %v1476_v19 = vand.u32 2147483647, %v3817_v21  ;;  %v1506_v56 = vadd.f32 1.0, %v3344_v1  ;;  %v1274_v32 = vsub.f32 0.0, %v1250_v41  ;;  %v3346_v27 = vpop.eup %3345 }
 0x1ba   :  { %v1474_v0 = vadd.f32 1.0, %v1473_v35  ;;  %3357 = vlog2.f32 %v1515_v50  ;;  %v1518_v33 = vmul.f32 -0.5, %v3342_v13  ;;  %v1454_v17 = vmul.f32 0.6931472, %v3346_v27 }
 0x1bb   :  { %v1501_v46 = vadd.f32 1.0, %v1500_v40  ;;  %v1503_v37 = vand.u32 2147483647, %v3832_v55  ;;  %3359 = vlog2.f32 %v1506_v56  ;;  %v1509_v57 = vmul.f32 -0.5, %v3344_v1 }
 0x1bc   :  { %v3348_v20 = vpop.eup %3347  ;;  %3361 = vpow2.f32 %v1307_v61  ;;  %v1309_v5 = vmul.f32 1.442695, %v1274_v32  ;;  %v1255_v42 = vand.u32 2147483647, %v3859_v45  ;;  %v1457_v48 = vmul.f32 %v3804_v14, %v1456_v7 }
 0x1bd   :  { %vm3870_vm8 = vcmp.lt.f32.partialorder %v1476_v19, 0.0004427343  ;;  %v1521_v6 = vand.u32 2147483647, %v3342_v13  ;;  %v1512_v30 = vand.u32 2147483647, %v3344_v1  ;;  %v1475_v40 = vmul.f32 %v3817_v21, %v1474_v0 }
 0x1be   :  { %v3350_v35 = vpop.eup %3349  ;;  %v1472_v28 = vmul.f32 0.6931472, %v3348_v20  ;;  %v1519_v41 = vadd.f32 1.0, %v1518_v33  ;;  %3363 = vpow2.f32 %v1309_v5  ;;  %v1460_v61 = vsel %vm3861_vm7, %v1457_v48, %v1454_v17 }
 0x1bf   :  { %v3352_v50 = vpop.eup %3351  ;;  %vm3877_vm9 = vcmp.lt.f32.partialorder %v1503_v37, 0.0004427343  ;;  %v1524_v14 = vadd.f32 1.0, %v3350_v35  ;;  %v1226_v7 = vmax.f32 %v3846_v29, 0.0  ;;  %v1502_v27 = vmul.f32 %v3832_v55, %v1501_v46 }
 0x1c0   :  { %v3354_v19 = vpop.eup %3353  ;;  %v1499_v32 = vmul.f32 0.6931472, %v3352_v50  ;;  %v1510_v20 = vadd.f32 1.0, %v1509_v57  ;;  %v1279_v43 = vsub.f32 0.0, %v1255_v42  ;;  %vm3885_vm10 = vcmp.lt.f32.partialorder %v1521_v6, 0.0004427343 }
 0x1c1   :  { %v3883_v21 = vpop.eup %3355  ;;  %vm3889_vm11 = vcmp.lt.f32.partialorder %v1512_v30, 0.0004427343  ;;  %3365 = vlog2.f32 %v1524_v14  ;;  %v1371_v33 = vadd.f32 1.0, %v3354_v19  ;;  %v6629_v17 = vmax.f32 %v3590_v38, 0.0 }
 0x1c2   :  { %v1478_v55 = vsel %vm3870_vm8, %v1475_v40, %v1472_v28  ;;  %v1505_v46 = vsel %vm3877_vm9, %v1502_v27, %v1499_v32  ;;  %v1520_v57 = vmul.f32 %v3342_v13, %v1519_v41  ;;  %v1527_v42 = vmul.f32 -0.5, %v3350_v35 }
 0x1c3   :  { %v1564_v37 = vadd.f32 %v1460_v61, %v6629_v17  ;;  %v1569_v5 = vadd.f32 %v1505_v46, %v1233_v26  ;;  %3367 = vlog2.f32 %v1371_v33  ;;  %v1380_v48 = vadd.f32 1.0, %v3883_v21 }
 0x1c4   :  { %v3358_v6 = vpop.eup %3357  ;;  %v1511_v30 = vmul.f32 %v3344_v1, %v1510_v20  ;;  %v1374_v50 = vmul.f32 -0.5, %v3354_v19  ;;  %v1319_v14 = vmul.f32 1.442695, %v1279_v43  ;;  %v3904_v38 = vadd.f32 %v3648_v31, %v3564_v8 }
 0x1c5   :  { %v3360_v24 = vpop.eup %3359  ;;  %v3906_v28 = vadd.f32 -0.6931472, %v1569_v5  ;;  %v1517_v40 = vmul.f32 0.6931472, %v3358_v6  ;;  %3369 = vlog2.f32 %v1380_v48  ;;  %v3910_v16 = vadd.f32 %v3654_v36, %v3620_v10 }
 0x1c6   :  { %v3362_v26 = vpop.eup %3361  ;;  %v3912_v13 = vadd.f32 -0.6931472, %v1564_v37  ;;  %v6630_v1 = vmax.f32 %v3624_v12, 0.0  ;;  %v1508_v43 = vmul.f32 0.6931472, %v3360_v24  ;;  %v1528_v56 = vadd.f32 1.0, %v1527_v42 }
 0x1c7   :  { %v1530_v61 = vand.u32 2147483647, %v3350_v35  ;;  %v1609_v8 = vpack.c.bf16 %v3906_v28, %v3837_v4  ;;  %v1523_v31 = vsel %vm3885_vm10, %v1520_v57, %v1517_v40  ;;  %v1425_v32 = vadd.f32 1.0, %v3362_v26  ;;  %v6641_v28 = vld [vmem:[#allocation3_spill] sm:$0xff] }
 0x1c8   :  { %v1566_v41 = vadd.f32 %v1478_v55, %v6630_v1  ;;  %v3920_v27 = vpop.eup %3363  ;;  %v1571_v36 = vadd.f32 %v1523_v31, %v1235_v18  ;;  %v1375_v20 = vadd.f32 1.0, %v1374_v50  ;;  %v1377_v33 = vand.u32 2147483647, %v3354_v19  ;;  %v3408_v1 = vld [vmem:[%s6448_s8 + $0x8] sm:$0xff] }
 0x1c9   :  { %v1383_v12 = vmul.f32 -0.5, %v3883_v21  ;;  %v1514_v17 = vsel %vm3889_vm11, %v1511_v30, %v1508_v43  ;;  %3371 = vlog2.f32 %v1425_v32  ;;  %v1428_v37 = vmul.f32 -0.5, %v3362_v26 }
 0x1ca   :  { %v1434_v55 = vadd.f32 1.0, %v3920_v27  ;;  %v3928_v0 = vadd.f32 -0.6931472, %v1571_v36  ;;  %vm3930_vm13 = vcmp.lt.f32.partialorder %v1530_v61, 0.0004427343  ;;  %3373 = vpow2.f32 %v1319_v14  ;;  %v3410_v61 = vld [vmem:[%s6448_s8 + $0x18] sm:$0xff] }
 0x1cb   :  { %v1386_v25 = vand.u32 2147483647, %v3883_v21  ;;  %v3366_v18 = vpop.eup %3365  ;;  %v1529_v57 = vmul.f32 %v3350_v35, %v1528_v56  ;;  %v1431_v5 = vand.u32 2147483647, %v3362_v26  ;;  %v1437_v47 = vmul.f32 -0.5, %v3920_v27 }
 0x1cc   :  { %3375 = vlog2.f32 %v1434_v55  ;;  %v1611_v42 = vpack.c.bf16 %v3928_v0, %v3853_v39  ;;  %v1570_v48 = vadd.f32 %v1514_v17, %v1234_v59  ;;  %v1526_v6 = vmul.f32 0.6931472, %v3366_v18 }
 0x1cd   :  { %v1384_v30 = vadd.f32 1.0, %v1383_v12  ;;  %v3368_v50 = vpop.eup %3367  ;;  %v2841_v24 = vadd.f32 -0.6931472, %v1566_v41  ;;  %v1376_v40 = vmul.f32 %v3354_v19, %v1375_v20  ;;  %vm3940_vm14 = vcmp.lt.f32.partialorder %v1377_v33, 0.0004427343 }
 0x1ce   :  { %v1429_v35 = vadd.f32 1.0, %v1428_v37  ;;  %v1532_v14 = vsel %vm3930_vm13, %v1529_v57, %v1526_v6  ;;  %v1373_v43 = vmul.f32 0.6931472, %v3368_v50  ;;  %vm3946_vm15 = vcmp.lt.f32.partialorder %v1386_v25, 0.0004427343 }
 0x1cf   :  { %v3952_v59 = vadd.f32 %v6637_v23, %v3620_v10  ;;  %v3370_v31 = vpop.eup %3369  ;;  %v1572_v19 = vadd.f32 %v1532_v14, %v1236_v11  ;;  %vm3956_vm0 = vcmp.lt.f32.partialorder %v1431_v5, 0.0004427343  ;;  %v1438_v56 = vadd.f32 1.0, %v1437_v47 }
 0x1d0   :  { %v1256_v32 = vand.u32 2147483647, %v3904_v38  ;;  %v2845_v36 = vadd.f32 -0.6931472, %v1570_v48  ;;  %v1382_v20 = vmul.f32 0.6931472, %v3370_v31  ;;  %v1385_v33 = vmul.f32 %v3883_v21, %v1384_v30 }
 0x1d1   :  { %v1261_v12 = vand.u32 2147483647, %v3910_v16  ;;  %v2847_v17 = vadd.f32 -0.6931472, %v1572_v19  ;;  %v1430_v10 = vmul.f32 %v3362_v26, %v1429_v35  ;;  %v1440_v37 = vand.u32 2147483647, %v3920_v27 }
 0x1d2   :  { %v1280_v55 = vsub.f32 0.0, %v1256_v32  ;;  %v1379_v9 = vsel %vm3940_vm14, %v1376_v40, %v1373_v43  ;;  %v1262_v46 = vand.u32 2147483647, %v3952_v59  ;;  %v1604_v25 = vpack.c.bf16 %v3828_v60, %v3773_v63  ;;  %v4034_v31 = vld [vmem:[%s6451_s4 + $0x8] sm:$0xff]   ;;  %v1811_v32 = vld [vmem:[%s6453_s5] sm:$0xff] }
 0x1d3   :  { %v1285_v11 = vsub.f32 0.0, %v1261_v12  ;;  %v3372_v18 = vpop.eup %3371  ;;  %v1388_v21 = vsel %vm3946_vm15, %v1385_v33, %v1382_v20  ;;  %v1439_v57 = vmul.f32 %v3920_v27, %v1438_v56  ;;  %v1606_v26 = vpack.c.bf16 %v3834_v54, %v3796_v2 }
 0x1d4   :  { %v1321_v5 = vmul.f32 1.442695, %v1280_v55  ;;  %v3974_v47 = vpop.eup %3373  ;;  %v1427_v48 = vmul.f32 0.6931472, %v3372_v18  ;;  %v1286_v30 = vsub.f32 0.0, %v1262_v46  ;;  %1648 = vmatprep.subr.bf16.mxu1 %v1604_v25  ;;  %v1610_v50 = vpack.c.bf16 %v2845_v36, %v3912_v13  ;;  %v1812_v25 = vld [vmem:[%s6453_s5 + $0x8] sm:$0xff] }
 0x1d5   :  { %v1331_v6 = vmul.f32 1.442695, %v1285_v11  ;;  %v1555_v63 = vadd.f32 %v1379_v9, %v1219_v22  ;;  %1701 = vmatprep.subr.bf16.mxu0 %v1606_v26  ;;  %1649 = vmatpush1.bf16.msra.mxu1 %v1603_v44  ;;  %v1612_v60 = vpack.c.bf16 %v2847_v17, %v2841_v24  ;;  %v1556_v53 = vadd.f32 %v1388_v21, %v1220_v51  ;;  %v4009_v24 = vld [vmem:[%s6451_s4] sm:$0xff]  }
 0x1d6   :  { %v3376_v40 = vpop.eup %3375  ;;  %3377 = vpow2.f32 %v1321_v5  ;;  %v1433_v2 = vsel %vm3956_vm0, %v1430_v10, %v1427_v48  ;;  %v1333_v27 = vmul.f32 1.442695, %v1286_v30  ;;  %1702 = vmatpush1.bf16.msra.mxu0 %v1605_v58  ;;  %1650 = vmatprep.subr.bf16.mxu1 %v1610_v50  ;;  %v6640_v22 = vmax.f32 %v3826_v49, 0.0  ;;  %v3407_v58 = vld [vmem:[%s6448_s8] sm:$0xff] }
 0x1d7   :  { %v1436_v54 = vmul.f32 0.6931472, %v3376_v40  ;;  %3379 = vpow2.f32 %v1331_v6  ;;  %vm1441_vm1 = vcmp.lt.f32.partialorder %v1440_v37, 0.0004427343  ;;  %v1479_v34 = vadd.f32 1.0, %v3974_v47  ;;  %1703 = vmatprep.subr.bf16.mxu0 %v1612_v60 }
 0x1d8   :  { %v1561_v13 = vadd.f32 %v1433_v2, %v6640_v22  ;;  %v3421_v3 = vmov 2   ;;  %3381 = vpow2.f32 %v1333_v27  ;;  %v2830_v62 = vadd.f32 -0.6931472, %v1555_v63 }
 0x1d9   :  { %3247 = vset.pattern.permute.xlu1 %v3421_v3  ;;  %v1442_v44 = vsel %vm1441_vm1, %v1439_v57, %v1436_v54  ;;  %3248 = vset.pattern.permute.xlu0 %v3421_v3  ;;  %vm6464_vm2 = vcmask 261120   ;;  %v3202_v29 = vpack.c.bf16 %v1810_v15, %v1809_v52  ;;  %3383 = vlog2.f32 %v1479_v34  ;;  %v1813_v57 = vld [vmem:[%s6453_s5 + $0x10] sm:$0xff]  ;;  %v1814_v54 = vld [vmem:[%s6453_s5 + $0x18] sm:$0xff] }
 0x1da   :  { %1616 = vperm.xlu1 %3247, %v3407_v58   ;;  %v2836_v49 = vadd.f32 -0.6931472, %v1561_v13  ;;  %v1562_v51 = vadd.f32 %v1442_v44, %v1226_v7  ;;  %1651 = vmatpush1.bf16.msra.mxu1 %v1609_v8  ;;  %v2831_v7 = vadd.f32 -0.6931472, %v1556_v53  ;;  %v3409_v8 = vld [vmem:[%s6448_s8 + $0x10] sm:$0xff]  ;;  %v6642_v0 = vmov 0  }
 0x1db   :  { %1620 = vperm.xlu0 %3248, %v3408_v1   ;;  %1704 = vmatpush1.bf16.msra.mxu0 %v1611_v42  ;;  %v1482_v41 = vmul.f32 -0.5, %v3974_v47  ;;  %v1485_v17 = vand.u32 2147483647, %v3974_v47  ;;  %v1231_v6 = vmax.f32 %v3859_v45, 0.0  ;;  %v1232_v63 = vmax.f32 %v3904_v38, 0.0 }
 0x1dc   :  { %v1607_v35 = vpack.c.bf16 %v2836_v49, %v2830_v62  ;;  %v2837_v4 = vadd.f32 -0.6931472, %v1562_v51  ;;  %3199 = vmatprep.subr.bf16.mxu0 %v6641_v28  ;;  %v1237_v45 = vmax.f32 %v3910_v16, 0.0  ;;  %v1238_v3 = vmax.f32 %v3952_v59, 0.0 }
 0x1dd   :  { %2852 = vmatmul.mubr.msk.bf16.vlgmr.msra.gmra.mrb[8].mxu1 %vm6464_vm2, %v4009_v24  ;;  %v1483_v33 = vadd.f32 1.0, %v1482_v41  ;;  %vm4051_vm3 = vcmp.lt.f32.partialorder %v1485_v17, 0.0004427343  ;;  %v6645_v59 = vlaneseq }
 0x1de   :  { %1624 = vperm.xlu1 %3247, %v3409_v8   ;;  %2854 = vmatmul.mubr.msk.bf16.vlgmr.msra.gmra.mrb[16].mxu0 %vm6464_vm2, %v4009_v24  ;;  %v1608_v39 = vpack.c.bf16 %v2837_v4, %v2831_v7 }
 0x1df   :  { %1690 = vmatprep.mubr.bf16.mxu1 %v6642_v0  ;;  %1743 = vmatprep.mubr.bf16.mxu0 %v6642_v0  ;;  %v1484_v9 = vmul.f32 %v3974_v47, %v1483_v33  ;;  %v4078_v7 = vand.u32 127, %v6645_v59 }
 0x1e0   :  { %3201 = vmatpush3.bf16.msra.mxu0 %v6641_v28  ;;  %v3378_v42 = vpop.eup %3377  ;;  %1754 = vmatprep.subr.bf16.mxu1 %v1608_v39 }
 0x1e1   :  { %3203 = vmatprep.subr.bf16.mxu0 %v3202_v29  ;;  %v3380_v14 = vpop.eup %3379  ;;  %v1488_v43 = vadd.f32 1.0, %v3378_v42  ;;  %1755 = vmatpush1.bf16.msra.mxu1 %v1607_v35  ;;  %v1491_v20 = vmul.f32 -0.5, %v3378_v42  ;;  %v1494_v11 = vand.u32 2147483647, %v3378_v42  ;;  %v6646_v35 = vld [vmem:[#allocation2_spill] sm:$0xff]  ;;  %v253_v28 = vadd.s32 128, %v4078_v7 }
 0x1e2   :  { %1628 = vperm.xlu1 %3247, %v3410_v61   ;;  %v1533_v23 = vadd.f32 1.0, %v3380_v14  ;;  %v3382_v19 = vpop.eup %3381  ;;  %v1536_v12 = vmul.f32 -0.5, %v3380_v14  ;;  %v1539_v21 = vand.u32 2147483647, %v3380_v14  ;;  %v4081_v4 = vadd.s32 8, %v6646_v35 }
 0x1e3   :  { %3385 = vlog2.f32 %v1488_v43  ;;  %v1542_v56 = vadd.f32 1.0, %v3382_v19  ;;  %v3384_v36 = vpop.eup %3383  ;;  %v1545_v37 = vmul.f32 -0.5, %v3382_v19  ;;  %v1492_v55 = vadd.f32 1.0, %v1491_v20 }
 0x1e4   :  { %3205 = vmatpush3.bf16.msra.mxu0 %v3202_v29  ;;  %3387 = vlog2.f32 %v1533_v23  ;;  %v1481_v10 = vmul.f32 0.6931472, %v3384_v36  ;;  %v1537_v46 = vadd.f32 1.0, %v1536_v12  ;;  %v1548_v40 = vand.u32 2147483647, %v3382_v19  ;;  %6647 = vst [vmem:[#allocation4_spill] sm:$0xff] %v4081_v4 }
 0x1e5   :  { %2853 = vmatmul.mubr.msk.bf16.gmra.mrb[12].mxu1 %vm6464_vm2, %v4034_v31  ;;  %3389 = vlog2.f32 %v1542_v56  ;;  %v1546_v47 = vadd.f32 1.0, %v1545_v37  ;;  %v1493_v50 = vmul.f32 %v3378_v42, %v1492_v55  ;;  %vm1495_vm4 = vcmp.lt.f32.partialorder %v1494_v11, 0.0004427343 }
 0x1e6   :  { %2855 = vmatmul.mubr.msk.bf16.gmra.mrb[20].mxu0 %vm6464_vm2, %v4034_v31  ;;  %1786 = vmatprep.mubr.bf16.mxu1 %v6642_v0  ;;  %v1487_v26 = vsel %vm4051_vm3, %v1484_v9, %v1481_v10  ;;  %v1538_v2 = vmul.f32 %v3380_v14, %v1537_v46  ;;  %vm1540_vm5 = vcmp.lt.f32.partialorder %v1539_v21, 0.0004427343  ;;  %vm1549_vm6 = vcmp.lt.f32.partialorder %v1548_v40, 0.0004427343 }
 0x1e7   :  { %3136 = vmatprep.mubr.msk.f32.mxu0 %vm6464_vm2, %v1811_v32  ;;  %v1567_v53 = vadd.f32 %v1487_v26, %v1231_v6  ;;  %v1547_v52 = vmul.f32 %v3382_v19, %v1546_v47  ;;  %v4085_v8 = vand.u32 15, %v4078_v7  ;;  %v262_v39 = vand.u32 15, %v253_v28 }
 0x1e8   :  { %v6648_v42 = vmov 0  ;;  %v254_v43 = vadd.s32 256, %v4078_v7  ;;  %v6485_v61 = vmov 1.0|1.0   ;;  %v305_v41 = vadd.s32 128, %v6646_v35 }
 0x1e9   :  { %v2842_v58 = vadd.f32 -0.6931472, %v1567_v53  ;;  %vm267_vm7 = vcmp.eq.s32.totalorder %v4085_v8, %v6646_v35  ;;  %vm273_vm8 = vcmp.eq.s32.totalorder %v4085_v8, %v4081_v4  ;;  %vm268_vm9 = vcmp.eq.s32.totalorder %v262_v39, %v6646_v35 }
 0x1ea   :  { %vm274_vm10 = vcmp.eq.s32.totalorder %v262_v39, %v4081_v4  ;;  %vm4094_vm11 = vmpackc.low %vm273_vm8, %vm267_vm7  ;;  %v263_v23 = vand.u32 15, %v254_v43  ;;  %v306_v56 = vadd.s32 136, %v6646_v35  ;;  %v401_v32 = vshra.s32 %v305_v41, 4 }
 0x1eb   :  { %v6649_v42 = vsel %vm4094_vm11, 4294967295, %v6648_v42  ;;  %vm2862_vm13 = vmpackc.low %vm274_vm10, %vm268_vm9  ;;  %v593_v20 = vand.u32 15, %v305_v41  ;;  %v337_v12 = vadd.s32 384, %v6646_v35  ;;  %v256_v17 = vadd.s32 512, %v4078_v7 }
 0x1ec   :  { %6650 = vst [vmem:[#allocation3_spill] sm:$0xff] %v6649_v42  ;;  %vm269_vm1 = vcmp.eq.s32.totalorder %v263_v23, %v6646_v35  ;;  %vm275_vm3 = vcmp.eq.s32.totalorder %v263_v23, %v4081_v4  ;;  %v402_v36 = vshra.s32 %v306_v56, 4  ;;  %v594_v33 = vand.u32 15, %v306_v56 }
 0x1ed   :  { %v3386_v5 = vpop.eup %3385  ;;  %vm497_vm8 = vcmp.eq.s32.totalorder %v401_v32, %v4078_v7  ;;  %vm689_vm10 = vcmp.ne.s32.totalorder %v593_v20, %v4085_v8  ;;  %v338_v10 = vadd.s32 392, %v6646_v35  ;;  %v6484_v37 = vshra.s32 %v6646_v35, 4 }
 0x1ee   :  { %v3388_v48 = vpop.eup %3387  ;;  %v1490_v30 = vmul.f32 0.6931472, %v3386_v5  ;;  %3137 = vmatmul.mubr.msk.f32.vlgmr.msra.gmra.mrb[24].mxu0 %vm6464_vm2, %v1812_v25  ;;  %vm498_vm9 = vcmp.eq.s32.totalorder %v402_v36, %v4078_v7  ;;  %v577_v55 = vand.u32 15, %v6646_v35  ;;  %v307_v9 = vadd.s32 144, %v6646_v35 }
 0x1ef   :  { %v1535_v60 = vmul.f32 0.6931472, %v3388_v48  ;;  %3139 = vmatprep.mubr.msk.f32.mxu0 %vm6464_vm2, %v1813_v57  ;;  %v3390_v27 = vpop.eup %3389  ;;  %v6477_v11 = vshra.s32 %v4081_v4, 4  ;;  %v578_v46 = vand.u32 15, %v4081_v4  ;;  %v308_v25 = vadd.s32 152, %v6646_v35 }
 0x1f0   :  { %v1496_v22 = vsel %vm1495_vm4, %v1493_v50, %v1490_v30  ;;  %v1544_v34 = vmul.f32 0.6931472, %v3390_v27  ;;  %vm2870_vm4 = vmpackc.low %vm275_vm3, %vm269_vm1  ;;  %v433_v18 = vshra.s32 %v337_v12, 4  ;;  %v625_v21 = vand.u32 15, %v337_v12 }
 0x1f1   :  { %v1541_v13 = vsel %vm1540_vm5, %v1538_v2, %v1535_v60  ;;  %v1568_v15 = vadd.f32 %v1496_v22, %v1232_v63  ;;  %v4130_v57 = vadd.s32 256, %v6646_v35  ;;  %v4133_v5 = vadd.s32 264, %v6646_v35 }
 0x1f2   :  { %v1573_v38 = vadd.f32 %v1541_v13, %v1237_v45  ;;  %3140 = vmatmul.mubr.msk.f32.gmra.mrb[26].mxu0 %vm6464_vm2, %v1814_v54  ;;  %v1550_v44 = vsel %vm1549_vm6, %v1547_v52, %v1544_v34  ;;  %v265_v26 = vand.u32 15, %v256_v17  ;;  %v434_v47 = vshra.s32 %v338_v10, 4 }
 0x1f3   :  { %2011 = vmatprep.mubr.bf16.mxu0 %v6642_v0  ;;  %v1574_v49 = vadd.f32 %v1550_v44, %v1238_v3  ;;  %v2843_v51 = vadd.f32 -0.6931472, %v1568_v15  ;;  %v626_v48 = vand.u32 15, %v338_v10  ;;  %v4136_v6 = vadd.s32 16, %v6646_v35 }
 0x1f4   :  { %v2848_v62 = vadd.f32 -0.6931472, %v1573_v38  ;;  %vm4141_vm1 = vcmp.eq.s32.totalorder %v6484_v37, %v4078_v7  ;;  %vm4146_vm3 = vcmp.ne.s32.totalorder %v577_v55, %v4085_v8  ;;  %v403_v40 = vshra.s32 %v307_v9, 4 }
 0x1f5   :  { %v2849_v16 = vadd.f32 -0.6931472, %v1574_v49  ;;  %6651 = vst [vmem:[#allocation2_spill] sm:$0xff] %v4136_v6  ;;  %v595_v63 = vand.u32 15, %v307_v9  ;;  %v4151_v60 = vadd.s32 24, %v6646_v35  ;;  %v404_v27 = vshra.s32 %v308_v25, 4 }
 0x1f6   :  { %v1613_v1 = vpack.c.bf16 %v2848_v62, %v2842_v58  ;;  %v596_v53 = vand.u32 15, %v308_v25  ;;  %v4166_v22 = vadd.s32 400, %v6646_v35  ;;  %v4169_v45 = vadd.s32 408, %v6646_v35 }
 0x1f7   :  { %v1614_v29 = vpack.c.bf16 %v2849_v16, %v2843_v51  ;;  %6656 = vst [vmem:[#allocation5_spill] sm:$0xff] %v4151_v60  ;;  %v417_v52 = vshra.s32 %v4130_v57, 4  ;;  %v418_v15 = vshra.s32 %v4133_v5, 4  ;;  %v609_v38 = vand.u32 15, %v4130_v57 }
 0x1f8   :  { %v610_v3 = vand.u32 15, %v4133_v5  ;;  %v6475_v62 = vshra.s32 %v4136_v6, 4  ;;  %v579_v49 = vand.u32 15, %v4136_v6  ;;  %v309_v51 = vadd.s32 160, %v6646_v35 }
 0x1f9   :  { %1756 = vmatprep.subr.bf16.mxu1 %v1614_v29  ;;  %v6669_v16 = vmov 0  ;;  %v6671_v29 = vmov 0  ;;  %v6470_v59 = vshra.s32 %v4151_v60, 4  ;;  %v580_v28 = vand.u32 15, %v4151_v60 }
 0x1fa   :  { %1757 = vmatpush1.bf16.msra.mxu1 %v1613_v1  ;;  %v310_v1 = vadd.s32 168, %v6646_v35  ;;  %v4212_v39 = vadd.s32 272, %v6646_v35  ;;  %v435_v43 = vshra.s32 %v4166_v22, 4  ;;  %v436_v23 = vshra.s32 %v4169_v45, 4 }
 0x1fb   :  { %2863 = vmatprep.subr.msk.bf16.mxu1 %vm2862_vm13, %v6485_v61  ;;  %vm690_vm13 = vcmp.ne.s32.totalorder %v594_v33, %v4085_v8  ;;  %v627_v41 = vand.u32 15, %v4166_v22  ;;  %v628_v56 = vand.u32 15, %v4169_v45  ;;  %v4234_v32 = vadd.s32 32, %v6646_v35 }
 0x1fc   :  { %v4237_v36 = vadd.s32 40, %v6646_v35  ;;  %v6680_v33 = vmov 0  ;;  %v6682_v12 = vmov 0  ;;  %vm4256_vm12 = vcmp.eq.s32.totalorder %v6475_v62, %v4078_v7 }
 0x1fd   :  { %2856 = vmatmul.mubr.msk.bf16.vlgmr.msra.gmra.mrb[16].mxu1 %vm6464_vm2, %v4009_v24  ;;  %v255_v24 = vadd.s32 384, %v4078_v7  ;;  %6677 = vst [vmem:[#allocation6_spill] sm:$0xff] %v4234_v32  ;;  %v6685_v10 = vmov 0  ;;  %v6687_v55 = vmov 0  ;;  %v405_v9 = vshra.s32 %v309_v51, 4 }
 0x1fe   :  { %1796 = vmatprep.mubr.bf16.mxu1 %v6642_v0  ;;  %2865 = vmatpush1.bf16.msk.msra.mxu1 %vm4094_vm11, %v6485_v61  ;;  %6678 = vst [vmem:[#allocation7_spill] sm:$0xff] %v4237_v36  ;;  %v6686_v10 = vsel %vm4256_vm12, 4294967295, %v6685_v10  ;;  %vm4261_vm11 = vcmp.ne.s32.totalorder %v579_v49, %v4085_v8  ;;  %v597_v25 = vand.u32 15, %v309_v51  ;;  %v6691_v57 = vmov 0 }
 0x1ff   :  { %v264_v14 = vand.u32 15, %v255_v24  ;;  %v6673_v24 = vmov 0  ;;  %v6688_v55 = vsel %vm4261_vm11, 4294967295, %v6687_v55  ;;  %vm4277_vm12 = vcmp.ne.s32.totalorder %v580_v28, %v4085_v8 }
 0x200   :  { %v6693_v5 = vmov 0  ;;  %v4293_v45 = vadd.s32 424, %v6646_v35  ;;  %v581_v28 = vand.u32 15, %v4234_v32  ;;  %vm4313_vm11 = vcmp.eq.s32.totalorder %v418_v15, %v4078_v7 }
 0x201   :  { %vm270_vm14 = vcmp.eq.s32.totalorder %v264_v14, %v6646_v35  ;;  %vm276_vm15 = vcmp.eq.s32.totalorder %v264_v14, %v4081_v4  ;;  %v6675_v14 = vmov 0  ;;  %v6694_v5 = vsel %vm4277_vm12, 4294967295, %v6693_v5 }
 0x202   :  { %vm2868_vm0 = vmpackc.low %vm276_vm15, %vm270_vm14  ;;  %vm4308_vm12 = vcmp.eq.s32.totalorder %v417_v52, %v4078_v7  ;;  %v6702_v62 = vmov 0  ;;  %v6706_v52 = vmov 0  ;;  %v6708_v15 = vmov 0 }
 0x203   :  { %2869 = vmatprep.subr.msk.bf16.mxu0 %vm2868_vm0, %v6485_v61  ;;  %vm785_vm14 = vmand %vm497_vm8, %vm689_vm10  ;;  %vm4186_vm8 = vcmp.eq.s32.totalorder %v434_v47, %v4078_v7  ;;  %vm4200_vm10 = vcmp.eq.s32.totalorder %v403_v40, %v4078_v7  ;;  %v598_v47 = vand.u32 15, %v310_v1  ;;  %v582_v37 = vand.u32 15, %v4237_v36 }
 0x204   :  { %2871 = vmatpush1.bf16.msk.msra.mxu0 %vm2870_vm4, %v6485_v61  ;;  %vm786_vm15 = vmand %vm498_vm9, %vm690_vm13  ;;  %vm4156_vm4 = vcmp.eq.s32.totalorder %v6477_v11, %v4078_v7  ;;  %vm4191_vm9 = vcmp.ne.s32.totalorder %v626_v48, %v4085_v8  ;;  %v6670_v16 = vsel %vm4200_vm10, 4294967295, %v6669_v16  ;;  %vm4205_vm13 = vcmp.ne.s32.totalorder %v595_v63, %v4085_v8 }
 0x205   :  { %2857 = vmatmul.mubr.msk.bf16.gmra.mrb[20].mxu1 %vm6464_vm2, %v4034_v31  ;;  %v257_v31 = vadd.s32 640, %v4078_v7  ;;  %vm2896_vm0 = vmpackc.low %vm786_vm15, %vm785_vm14  ;;  %v6672_v29 = vsel %vm4205_vm13, 4294967295, %v6671_v29  ;;  %vm4215_vm14 = vcmp.eq.s32.totalorder %v404_v27, %v4078_v7  ;;  %vm4220_vm15 = vcmp.ne.s32.totalorder %v596_v53, %v4085_v8 }
 0x206   :  { %1958 = vmatprep.mubr.bf16.mxu1 %v6642_v0  ;;  %3012 = vmatprep.subr.msk.bf16.mxu0 %vm2896_vm0, %v6485_v61  ;;  %v6674_v24 = vsel %vm4215_vm14, 4294967295, %v6673_v24  ;;  %v6676_v14 = vsel %vm4220_vm15, 4294967295, %v6675_v14  ;;  %vm4242_vm0 = vcmp.eq.s32.totalorder %v265_v26, %v6646_v35  ;;  %vm4247_vm2 = vcmp.eq.s32.totalorder %v265_v26, %v4081_v4  ;;  %vm6755_vm15 = vmand %vm4141_vm1, %vm4146_vm3 }
 0x207   :  { %v266_v19 = vand.u32 15, %v257_v31  ;;  %v4227_v31 = vadd.s32 280, %v6646_v35  ;;  %v6681_v33 = vsel %vm4242_vm0, 4294967295, %v6680_v33  ;;  %v6683_v12 = vsel %vm4247_vm2, 4294967295, %v6682_v12  ;;  %vm6766_vm3 = vmmov %vm4191_vm9 }
 0x208   :  { %vm4272_vm2 = vcmp.eq.s32.totalorder %v6470_v59, %v4078_v7  ;;  %v419_v26 = vshra.s32 %v4212_v39, 4  ;;  %v4283_v48 = vadd.s32 416, %v6646_v35  ;;  %v611_v53 = vand.u32 15, %v4212_v39 }
 0x209   :  { %vm272_vm5 = vcmp.eq.s32.totalorder %v266_v19, %v6646_v35  ;;  %vm278_vm6 = vcmp.eq.s32.totalorder %v266_v19, %v4081_v4  ;;  %v6692_v57 = vsel %vm4272_vm2, 4294967295, %v6691_v57  ;;  %v420_v27 = vshra.s32 %v4227_v31, 4 }
 0x20a   :  { %vm2874_vm7 = vmpackc.low %vm278_vm6, %vm272_vm5  ;;  %vm4161_vm5 = vcmp.ne.s32.totalorder %v578_v46, %v4085_v8  ;;  %vm4172_vm6 = vcmp.eq.s32.totalorder %v433_v18, %v4078_v7  ;;  %v406_v46 = vshra.s32 %v310_v1, 4  ;;  %v612_v22 = vand.u32 15, %v4227_v31 }
 0x20b   :  { %2875 = vmatprep.subr.msk.bf16.mxu1 %vm2874_vm7, %v6485_v61  ;;  %vm4177_vm7 = vcmp.ne.s32.totalorder %v625_v21, %v4085_v8  ;;  %v4301_v59 = vadd.s32 288, %v6646_v35  ;;  %v6698_v39 = vmov 0  ;;  %v6700_v31 = vmov 0 }
 0x20c   :  { %v6699_v39 = vsel %vm4308_vm12, 4294967295, %v6698_v39  ;;  %v6701_v31 = vsel %vm4313_vm11, 4294967295, %v6700_v31  ;;  %vm4318_vm0 = vcmp.ne.s32.totalorder %v609_v38, %v4085_v8  ;;  %vm4323_vm14 = vcmp.ne.s32.totalorder %v610_v3, %v4085_v8 }
 0x20d   :  { %v6703_v62 = vsel %vm4318_vm0, 4294967295, %v6702_v62  ;;  %v6704_v11 = vmov 0  ;;  %vm4328_vm2 = vcmp.eq.s32.totalorder %v405_v9, %v4078_v7  ;;  %vm4333_vm12 = vcmp.eq.s32.totalorder %v406_v46, %v4078_v7 }
 0x20e   :  { %v6705_v11 = vsel %vm4323_vm14, 4294967295, %v6704_v11  ;;  %v6707_v52 = vsel %vm4328_vm2, 4294967295, %v6706_v52  ;;  %v6709_v15 = vsel %vm4333_vm12, 4294967295, %v6708_v15  ;;  %vm4338_vm11 = vcmp.ne.s32.totalorder %v597_v25, %v4085_v8 }
 0x20f   :  { %v6710_v38 = vmov 0  ;;  %v326_v3 = vadd.s32 296, %v6646_v35  ;;  %vm4348_vm0 = vcmp.eq.s32.totalorder %v435_v43, %v4078_v7  ;;  %v6712_v9 = vmov 0 }
 0x210   :  { %v6711_v38 = vsel %vm4338_vm11, 4294967295, %v6710_v38  ;;  %v6713_v9 = vsel %vm4348_vm0, 4294967295, %v6712_v9  ;;  %vm4353_vm2 = vcmp.ne.s32.totalorder %v627_v41, %v4085_v8  ;;  %v6714_v46 = vmov 0 }
 0x211   :  { %v6715_v46 = vsel %vm4353_vm2, 4294967295, %v6714_v46  ;;  %vm4358_vm12 = vcmp.ne.s32.totalorder %v598_v47, %v4085_v8  ;;  %v6716_v25 = vmov 0  ;;  %v437_v61 = vshra.s32 %v4283_v48, 4 }
 0x212   :  { %v6717_v25 = vsel %vm4358_vm12, 4294967295, %v6716_v25  ;;  %v311_v1 = vadd.s32 176, %v6646_v35  ;;  %vm4370_vm0 = vcmp.eq.s32.totalorder %v436_v23, %v4078_v7  ;;  %v6718_v43 = vmov 0 }
 0x213   :  { %v6719_v43 = vsel %vm4370_vm0, 4294967295, %v6718_v43  ;;  %vm4375_vm2 = vcmp.ne.s32.totalorder %v628_v56, %v4085_v8  ;;  %v6720_v41 = vmov 0  ;;  %v438_v47 = vshra.s32 %v4293_v45, 4 }
 0x214   :  { %v6721_v41 = vsel %vm4375_vm2, 4294967295, %v6720_v41  ;;  %v629_v51 = vand.u32 15, %v4283_v48  ;;  %v630_v60 = vand.u32 15, %v4293_v45  ;;  %v312_v6 = vadd.s32 184, %v6646_v35 }
 0x215   :  { %v6723_v23 = vshra.s32 %v4234_v32, 4  ;;  %v6724_v56 = vmov 0  ;;  %v6726_v48 = vshra.s32 %v4237_v36, 4  ;;  %v6727_v45 = vmov 0 }
 0x216   :  { %vm4404_vm12 = vcmp.ne.s32.totalorder %v581_v28, %v4085_v8  ;;  %v6729_v42 = vmov 0  ;;  %v6735_v28 = vmov 0  ;;  %v6737_v36 = vmov 0 }
 0x217   :  { %vm4392_vm0 = vcmp.eq.s32.totalorder %v6723_v23, %v4078_v7  ;;  %vm4399_vm2 = vcmp.eq.s32.totalorder %v6726_v48, %v4078_v7  ;;  %v6730_v42 = vsel %vm4404_vm12, 4294967295, %v6729_v42  ;;  %v6733_v48 = vmov 0 }
 0x218   :  { %v6725_v56 = vsel %vm4392_vm0, 4294967295, %v6724_v56  ;;  %v6728_v45 = vsel %vm4399_vm2, 4294967295, %v6727_v45  ;;  %vm4418_vm0 = vcmp.eq.s32.totalorder %v419_v26, %v4078_v7  ;;  %vm4423_vm2 = vcmp.eq.s32.totalorder %v420_v27, %v4078_v7 }
 0x219   :  { %v6734_v48 = vsel %vm4418_vm0, 4294967295, %v6733_v48  ;;  %v6736_v28 = vsel %vm4423_vm2, 4294967295, %v6735_v28  ;;  %vm4428_vm12 = vcmp.ne.s32.totalorder %v611_v53, %v4085_v8  ;;  %vm4433_vm11 = vcmp.ne.s32.totalorder %v612_v22, %v4085_v8 }
 0x21a   :  { %v6738_v36 = vsel %vm4428_vm12, 4294967295, %v6737_v36  ;;  %v6739_v32 = vmov 0  ;;  %v613_v26 = vand.u32 15, %v4301_v59  ;;  %vm4448_vm0 = vcmp.ne.s32.totalorder %v582_v37, %v4085_v8 }
 0x21b   :  { %v6740_v32 = vsel %vm4433_vm11, 4294967295, %v6739_v32  ;;  %v6744_v53 = vmov 0  ;;  %vm4453_vm11 = vcmp.eq.s32.totalorder %v437_v61, %v4078_v7  ;;  %v407_v22 = vshra.s32 %v311_v1, 4 }
 0x21c   :  { %v6745_v53 = vsel %vm4448_vm0, 4294967295, %v6744_v53  ;;  %vm4463_vm12 = vcmp.eq.s32.totalorder %v438_v47, %v4078_v7  ;;  %v408_v37 = vshra.s32 %v312_v6, 4  ;;  %vm6759_vm13 = vnez %v6688_v55 }
 0x21d   :  { %vm6760_vm10 = vnez %v6686_v10  ;;  %vm4495_vm0 = vcmp.ne.s32.totalorder %v629_v51, %v4085_v8  ;;  %v6761_v30 = vmov 0  ;;  %vm4500_vm1 = vcmp.ne.s32.totalorder %v630_v60, %v4085_v8 }
 0x21e   :  { %v6762_v30 = vsel %vm4495_vm0, 4294967295, %v6761_v30  ;;  %v6763_v50 = vmov 0  ;;  %v600_v2 = vand.u32 15, %v312_v6  ;;  %v344_v54 = vadd.s32 440, %v6646_v35 }
 0x21f   :  { %v6764_v50 = vsel %vm4500_vm1, 4294967295, %v6763_v50  ;;  %v6768_v51 = vmov 0  ;;  %vm6771_vm9 = vnez %v6672_v29  ;;  %vm6773_vm2 = vnez %v6674_v24 }
 0x220   :  { %v6776_v6 = vmov 0  ;;  %v6780_v60 = vmov 0  ;;  %v6782_v13 = vmov 0  ;;  %v6784_v34 = vmov 0 }
 0x221   :  { %v6786_v44 = vmov 0  ;;  %v440_v55 = vshra.s32 %v344_v54, 4  ;;  %v6886_v10 = vmov 0 }
 0x2b0   :  { %v4229_v19 = vpop.f32.mrb[8].mxu1 }
 0x2b1   :  { %v4239_v20 = vpop.f32.mrb[16].mxu0  ;;  %v4251_v17 = vpop.f32.mrb[9].mxu1 }
 0x2b2   :  { %6679 = vst [vmem:[#allocation8_spill] sm:$0xff] %v4239_v20  ;;  %6684 = vst [vmem:[#allocation9_spill] sm:$0xff] %v4251_v17  ;;  %v4265_v18 = vpop.f32.mrb[17].mxu0  ;;  %v4267_v21 = vpop.f32.mrb[10].mxu1  ;;  %v4468_v17 = vadd.s32 432, %v6646_v35 }
 0x2b3   :  { %6689 = vst [vmem:[#allocation10_spill] sm:$0xff] %v4265_v18  ;;  %6690 = vst [vmem:[#allocation11_spill] sm:$0xff] %v4267_v21  ;;  %v4285_v40 = vpop.f32.mrb[18].mxu0  ;;  %v4287_v63 = vpop.f32.mrb[11].mxu1  ;;  %v599_v18 = vand.u32 15, %v311_v1  ;;  %v6757_v1 = vmov 0 }
 0x2b4   :  { %6695 = vst [vmem:[#allocation12_spill] sm:$0xff] %v4285_v40  ;;  %6696 = vst [vmem:[#allocation13_spill] sm:$0xff] %v4287_v63  ;;  %v4295_v49 = vpop.f32.mrb[19].mxu0  ;;  %v295_v63 = vadd.s32 48, %v6646_v35  ;;  %v6750_v40 = vmov 0  ;;  %v439_v47 = vshra.s32 %v4468_v17, 4 }
 0x2b5   :  { %6697 = vst [vmem:[#allocation14_spill] sm:$0xff] %v4295_v49  ;;  %v6751_v40 = vsel %vm4463_vm12, 4294967295, %v6750_v40  ;;  %vm6756_vm12 = vmand %vm4156_vm4, %vm4161_vm5 }
 0x2b6   :  { %vm4486_vm14 = vmpackc.low %vm6756_vm12, %vm6755_vm15  ;;  %vm6770_vm15 = vnez %v6670_v16  ;;  %v391_v58 = vshra.s32 %v295_v63, 4  ;;  %v583_v29 = vand.u32 15, %v295_v63  ;;  %v4582_v63 = vadd.s32 192, %v6646_v35 }
 0x2b7   :  { %v6758_v1 = vsel %vm4486_vm14, 4294967295, %v6757_v1  ;;  %vm6765_vm12 = vmand %vm4172_vm6, %vm4177_vm7  ;;  %vm6778_vm7 = vnez %v6694_v5  ;;  %v314_v5 = vadd.s32 200, %v6646_v35 }
 0x2b8   :  { %v4383_v4 = vpop.f32.mrb[12].mxu1  ;;  %vm6767_vm4 = vmand %vm4186_vm8, %vm6766_vm3  ;;  %vm6779_vm8 = vnez %v6692_v57  ;;  %v4616_v57 = vadd.s32 304, %v6646_v35 }
 0x2b9   :  { %6722 = vst [vmem:[#allocation15_spill] sm:$0xff] %v4383_v4  ;;  %v421_v4 = vshra.s32 %v4301_v59, 4  ;;  %v4409_v49 = vpop.f32.mrb[20].mxu0  ;;  %v4411_v23 = vpop.f32.mrb[13].mxu1  ;;  %v6746_v59 = vmov 0  ;;  %vm4515_vm5 = vmpackc.low %vm6767_vm4, %vm6765_vm12  ;;  %vm4576_vm4 = vcmp.ne.s32.totalorder %v599_v18, %v4085_v8  ;;  %v6804_v18 = vmov 0 }
 0x2ba   :  { %6731 = vst [vmem:[#allocation16_spill] sm:$0xff] %v4409_v49  ;;  %6732 = vst [vmem:[#allocation17_spill] sm:$0xff] %v4411_v23  ;;  %v422_v23 = vshra.s32 %v326_v3, 4  ;;  %v614_v49 = vand.u32 15, %v326_v3  ;;  %v4439_v27 = vpop.f32.mrb[21].mxu0  ;;  %v4441_v21 = vpop.f32.mrb[14].mxu1 }
 0x2bb   :  { %6741 = vst [vmem:[#allocation18_spill] sm:$0xff] %v4439_v27  ;;  %6742 = vst [vmem:[#allocation19_spill] sm:$0xff] %v4441_v21  ;;  %v6747_v59 = vsel %vm4453_vm11, 4294967295, %v6746_v59  ;;  %v296_v3 = vadd.s32 56, %v6646_v35  ;;  %v4458_v27 = vpop.f32.mrb[22].mxu0  ;;  %v4460_v21 = vpop.f32.mrb[15].mxu1  ;;  %vm6774_vm11 = vnez %v6676_v14  ;;  %vm4538_vm3 = vcmp.eq.s32.totalorder %v421_v4, %v4078_v7 }
 0x2bc   :  { %6748 = vst [vmem:[#allocation20_spill] sm:$0xff] %v4458_v27  ;;  %6749 = vst [vmem:[#allocation21_spill] sm:$0xff] %v4460_v21  ;;  %v4470_v61 = vpop.f32.mrb[23].mxu0  ;;  %v6769_v51 = vsel %vm4515_vm5, 4294967295, %v6768_v51  ;;  %v6781_v60 = vsel %vm4538_vm3, 4294967295, %v6780_v60  ;;  %v6790_v4 = vmov 0  ;;  %vm6806_vm3 = vnez %v6730_v42 }
 0x2bd   :  { %6752 = vst [vmem:[#allocation22_spill] sm:$0xff] %v4470_v61  ;;  %vm6772_vm14 = vmand %vm6770_vm15, %vm6771_vm9  ;;  %vm4543_vm9 = vcmp.eq.s32.totalorder %v422_v23, %v4078_v7  ;;  %vm4562_vm15 = vcmp.eq.s32.totalorder %v407_v22, %v4078_v7  ;;  %v392_v16 = vshra.s32 %v296_v3, 4  ;;  %v584_v24 = vand.u32 15, %v296_v3 }
 0x2be   :  { %vm6775_vm1 = vmand %vm6773_vm2, %vm6774_vm11  ;;  %v6783_v13 = vsel %vm4543_vm9, 4294967295, %v6782_v13  ;;  %vm4548_vm2 = vcmp.ne.s32.totalorder %v613_v26, %v4085_v8  ;;  %vm4553_vm11 = vcmp.ne.s32.totalorder %v614_v49, %v4085_v8  ;;  %v6791_v4 = vsel %vm4562_vm15, 4294967295, %v6790_v4 }
 0x2bf   :  { %vm4529_vm6 = vmpackc.low %vm6775_vm1, %vm6772_vm14  ;;  %v6785_v34 = vsel %vm4548_vm2, 4294967295, %v6784_v34  ;;  %v6787_v44 = vsel %vm4553_vm11, 4294967295, %v6786_v44  ;;  %vm6788_vm14 = vnez %v6711_v38  ;;  %vm6789_vm1 = vnez %v6707_v52 }
 0x2c0   :  { %v6777_v6 = vsel %vm4529_vm6, 4294967295, %v6776_v6  ;;  %vm6793_vm9 = vnez %v6709_v15  ;;  %vm4571_vm11 = vcmp.eq.s32.totalorder %v408_v37, %v4078_v7  ;;  %v6794_v14 = vmov 0  ;;  %vm6802_vm15 = vmand %vm6760_vm10, %vm6759_vm13 }
 0x2c1   :  { %v6795_v14 = vsel %vm4571_vm11, 4294967295, %v6794_v14  ;;  %v6796_v49 = vmov 0  ;;  %vm6807_vm2 = vnez %v6725_v56  ;;  %vm4611_vm11 = vcmp.ne.s32.totalorder %v600_v2, %v4085_v8  ;;  %v3138_v23 = vpop.f32.mrb[24].mxu0  ;;  %vm6824_vm10 = vmand %vm6789_vm1, %vm6788_vm14 }
 0x2c2   :  { %v6797_v49 = vsel %vm4576_vm4, 4294967295, %v6796_v49  ;;  %vm6803_vm4 = vmand %vm6779_vm8, %vm6778_vm7  ;;  %vm6812_vm8 = vnez %v6745_v53  ;;  %vm4628_vm6 = vcmp.eq.s32.totalorder %v391_v58, %v4078_v7  ;;  %v631_v22 = vand.u32 15, %v4468_v17  ;;  %v1893_v2 = vpop.f32.mrb[25].mxu0 }
 0x2c3   :  { %vm4602_vm12 = vmpackc.low %vm6803_vm4, %vm6802_vm15  ;;  %vm6813_vm4 = vnez %v6728_v45  ;;  %v632_v3 = vand.u32 15, %v344_v54  ;;  %v4634_v37 = vadd.s32 312, %v6646_v35  ;;  %vm4641_vm13 = vcmp.eq.s32.totalorder %v392_v16, %v4078_v7 }
 0x2c4   :  { %v6805_v18 = vsel %vm4602_vm12, 4294967295, %v6804_v18  ;;  %v6818_v61 = vmov 0  ;;  %vm4646_vm15 = vcmp.ne.s32.totalorder %v583_v29, %v4085_v8  ;;  %vm4651_vm5 = vcmp.ne.s32.totalorder %v584_v24, %v4085_v8 }
 0x2c5   :  { %v6819_v61 = vsel %vm4641_vm13, 4294967295, %v6818_v61  ;;  %v6822_v17 = vmov 0  ;;  %v297_v54 = vadd.s32 64, %v6646_v35  ;;  %v4656_v21 = vpack.c.bf16 %v3138_v23, %v1893_v2  ;;  %v3141_v45 = vpop.f32.mrb[26].mxu0 }
 0x2c6   :  { %v6823_v17 = vsel %vm4651_vm5, 4294967295, %v6822_v17  ;;  %vm6825_vm12 = vnez %v6717_v25  ;;  %v6827_v16 = vmov 0  ;;  %vm4673_vm13 = vcmp.eq.s32.totalorder %v439_v47, %v4078_v7  ;;  %v1903_v23 = vpop.f32.mrb[27].mxu0 }
 0x2c7   :  { %vm6826_vm7 = vmand %vm6793_vm9, %vm6825_vm12  ;;  %v6829_v29 = vmov 0  ;;  %v409_v24 = vshra.s32 %v4582_v63, 4  ;;  %v298_v52 = vadd.s32 72, %v6646_v35  ;;  %v6837_v15 = vmov 0 }
 0x2c8   :  { %vm4668_vm0 = vmpackc.low %vm6826_vm7, %vm6824_vm10  ;;  %v6830_v29 = vsel %vm4673_vm13, 4294967295, %v6829_v29  ;;  %vm6839_vm5 = vnez %v6797_v49  ;;  %vm6840_vm14 = vnez %v6791_v4  ;;  %vm4706_vm10 = vcmp.eq.s32.totalorder %v440_v55, %v4078_v7 }
 0x2c9   :  { %v6828_v16 = vsel %vm4668_vm0, 4294967295, %v6827_v16  ;;  %vm6835_vm7 = vmand %vm6807_vm2, %vm6806_vm3  ;;  %v6841_v38 = vmov 0  ;;  %v410_v42 = vshra.s32 %v314_v5, 4  ;;  %v601_v25 = vand.u32 15, %v4582_v63 }
 0x2ca   :  { %vm6836_vm13 = vmand %vm6813_vm4, %vm6812_vm8  ;;  %v6842_v38 = vsel %vm4706_vm10, 4294967295, %v6841_v38  ;;  %v315_v56 = vadd.s32 208, %v6646_v35  ;;  %vm6843_vm3 = vcmask 130048   ;;  %vm6849_vm12 = vnez %v6795_v14 }
 0x2cb   :  { %vm4697_vm0 = vmpackc.low %vm6836_vm13, %vm6835_vm7  ;;  %2866 = vmatmul.mubr.msk.bf16.vlgmr.msra.gmra.mrb[24].mxu1 %vm6843_vm3, %v4656_v21  ;;  %v6850_v53 = vmov 0  ;;  %v6852_v47 = vmov 0  ;;  %v602_v63 = vand.u32 15, %v314_v5  ;;  %v316_v55 = vadd.s32 216, %v6646_v35 }
 0x2cc   :  { %v6838_v15 = vsel %vm4697_vm0, 4294967295, %v6837_v15  ;;  %vm6844_vm2 = vmmov %vm6843_vm3  ;;  %vm4729_vm3 = vcmp.ne.s32.totalorder %v631_v22, %v4085_v8  ;;  %1968 = vmatprep.mubr.bf16.mxu1 %v6642_v0  ;;  %v423_v22 = vshra.s32 %v4616_v57, 4  ;;  %v393_v2 = vshra.s32 %v297_v54, 4 }
 0x2cd   :  { %2872 = vmatmul.mubr.msk.bf16.vlgmr.msra.gmra.mrb[28].mxu0 %vm6844_vm2, %v4656_v21  ;;  %v6851_v53 = vsel %vm4729_vm3, 4294967295, %v6850_v53  ;;  %vm4734_vm2 = vcmp.ne.s32.totalorder %v632_v3, %v4085_v8  ;;  %v615_v3 = vand.u32 15, %v4616_v57  ;;  %v585_v27 = vand.u32 15, %v297_v54 }
 0x2ce   :  { %v6853_v47 = vsel %vm4734_vm2, 4294967295, %v6852_v47  ;;  %2021 = vmatprep.mubr.bf16.mxu0 %v6642_v0  ;;  %v4747_v20 = vpack.c.bf16 %v3141_v45, %v1903_v23  ;;  %v6854_v5 = vmov 1.0|1.0   ;;  %vm6855_vm4 = vnez %v6683_v12 }
 0x2cf   :  { %vm6856_vm9 = vnez %v6681_v33  ;;  %vm6858_vm1 = vnez %v6758_v1  ;;  %vm6860_vm13 = vnez %v6819_v61  ;;  %vm4763_vm10 = vcmp.eq.s32.totalorder %v409_v24, %v4078_v7 }
 0x2d0   :  { %vm6857_vm7 = vmpackc.low %vm6855_vm4, %vm6856_vm9  ;;  %3013 = vmatpush3.bf16.msk.msra.mxu0 %vm6858_vm1, %v6854_v5  ;;  %v6861_v57 = vmov 0  ;;  %v394_v54 = vshra.s32 %v298_v52, 4  ;;  %v586_v12 = vand.u32 15, %v298_v52  ;;  %vm6863_vm9 = vnez %v6769_v51 }
 0x2d1   :  { %2877 = vmatpush1.bf16.msk.msra.mxu1 %vm6857_vm7, %v6854_v5  ;;  %v6862_v57 = vsel %vm4763_vm10, 4294967295, %v6861_v57  ;;  %vm6864_vm4 = vnez %v6777_v6  ;;  %vm4782_vm0 = vcmp.eq.s32.totalorder %v410_v42, %v4078_v7  ;;  %v6869_v33 = vmov 0  ;;  %vm6874_vm10 = vmand %vm6849_vm12, %vm4611_vm11 }
 0x2d2   :  { %3040 = vmatprep.subr.msk.bf16.mxu1 %vm6863_vm9, %v6854_v5  ;;  %3014 = vmatprep.subr.msk.bf16.mxu0 %vm6864_vm4, %v6854_v5  ;;  %v6870_v33 = vsel %vm4782_vm0, 4294967295, %v6869_v33  ;;  %vm4787_vm9 = vcmp.ne.s32.totalorder %v601_v25, %v4085_v8  ;;  %v6871_v1 = vmov 0  ;;  %v411_v51 = vshra.s32 %v315_v56, 4  ;;  %vm6873_vm4 = vmand %vm6840_vm14, %vm6839_vm5 }
 0x2d3   :  { %v6872_v1 = vsel %vm4787_vm9, 4294967295, %v6871_v1  ;;  %v603_v6 = vand.u32 15, %v315_v56  ;;  %vm4801_vm8 = vmpackc.low %vm6874_vm10, %vm6873_vm4  ;;  %v6875_v24 = vmov 0  ;;  %vm4806_vm2 = vcmp.ne.s32.totalorder %v602_v63, %v4085_v8 }
 0x2d4   :  { %v6876_v24 = vsel %vm4801_vm8, 4294967295, %v6875_v24  ;;  %v6877_v52 = vmov 0  ;;  %v412_v42 = vshra.s32 %v316_v55, 4  ;;  %v604_v25 = vand.u32 15, %v316_v55  ;;  %vm6879_vm5 = vmand %vm4628_vm6, %vm4646_vm15 }
 0x2d5   :  { %v6878_v52 = vsel %vm4806_vm2, 4294967295, %v6877_v52  ;;  %v299_v4 = vadd.s32 80, %v6646_v35  ;;  %vm6880_vm11 = vnez %v6823_v17  ;;  %v6882_v14 = vmov 0 }
 0x2d6   :  { %vm6881_vm14 = vmand %vm6860_vm13, %vm6880_vm11  ;;  %vm4826_vm10 = vcmp.eq.s32.totalorder %v393_v2, %v4078_v7  ;;  %v6884_v49 = vmov 0  ;;  %vm4831_vm4 = vcmp.ne.s32.totalorder %v585_v27, %v4085_v8  ;;  %v300_v26 = vadd.s32 88, %v6646_v35 }
 0x2d7   :  { %vm4821_vm12 = vmpackc.low %vm6881_vm14, %vm6879_vm5  ;;  %v6885_v49 = vsel %vm4826_vm10, 4294967295, %v6884_v49  ;;  %v6887_v10 = vsel %vm4831_vm4, 4294967295, %v6886_v10  ;;  %vm6888_vm6 = vnez %v6699_v39  ;;  %vm6889_vm15 = vnez %v6703_v62 }
 0x2d8   :  { %v6883_v14 = vsel %vm4821_vm12, 4294967295, %v6882_v14  ;;  %vm6890_vm13 = vmand %vm6888_vm6, %vm6889_vm15  ;;  %vm6891_vm5 = vnez %v6701_v31  ;;  %vm6892_vm11 = vnez %v6705_v11  ;;  %v6894_v61 = vmov 0 }
 0x2d9   :  { %vm6893_vm14 = vmand %vm6891_vm5, %vm6892_vm11  ;;  %vm6896_vm3 = vnez %v6805_v18  ;;  %vm4854_vm1 = vcmp.eq.s32.totalorder %v423_v22, %v4078_v7  ;;  %v6897_v27 = vmov 0  ;;  %vm4859_vm6 = vcmp.ne.s32.totalorder %v615_v3, %v4085_v8 }
 0x2da   :  { %vm4846_vm12 = vmpackc.low %vm6893_vm14, %vm6890_vm13  ;;  %3015 = vmatpush3.bf16.msk.msra.mxu0 %vm6896_vm3, %v6854_v5  ;;  %v6898_v27 = vsel %vm4854_vm1, 4294967295, %v6897_v27  ;;  %v6899_v62 = vmov 0  ;;  %vm4868_vm5 = vcmp.eq.s32.totalorder %v394_v54, %v4078_v7  ;;  %v6902_v11 = vmov 0 }
 0x2db   :  { %v6895_v61 = vsel %vm4846_vm12, 4294967295, %v6894_v61  ;;  %v6900_v62 = vsel %vm4859_vm6, 4294967295, %v6899_v62  ;;  %v6903_v11 = vsel %vm4868_vm5, 4294967295, %v6902_v11  ;;  %vm4873_vm3 = vcmp.ne.s32.totalorder %v586_v12, %v4085_v8 }
 0x2dc   :  { %v6904_v39 = vmov 0  ;;  %vm6906_vm11 = vnez %v6713_v9  ;;  %vm6907_vm14 = vnez %v6715_v46  ;;  %vm6909_vm7 = vnez %v6719_v43 }
 0x2dd   :  { %v6905_v39 = vsel %vm4873_vm3, 4294967295, %v6904_v39  ;;  %vm6908_vm12 = vmand %vm6906_vm11, %vm6907_vm14  ;;  %vm6910_vm8 = vnez %v6721_v41  ;;  %v6912_v31 = vmov 0  ;;  %vm6914_vm15 = vnez %v6828_v16  ;;  %v7111_v41 = vld [vmem:[#allocation12_spill] sm:$0xff] }
 0x2de   :  { %vm6911_vm13 = vmand %vm6909_vm7, %vm6910_vm8  ;;  %3016 = vmatprep.subr.msk.bf16.mxu0 %vm6914_vm15, %v6854_v5  ;;  %v424_v9 = vshra.s32 %v4634_v37, 4  ;;  %vm4908_vm7 = vcmp.eq.s32.totalorder %v411_v51, %v4078_v7  ;;  %vm6923_vm15 = vcmask 130048   ;;  %vm4926_vm1 = vcmp.eq.s32.totalorder %v412_v42, %v4078_v7 }
 0x2df   :  { %vm4887_vm9 = vmpackc.low %vm6911_vm13, %vm6908_vm12  ;;  %vm4913_vm12 = vcmp.ne.s32.totalorder %v603_v6, %v4085_v8  ;;  %2867 = vmatmul.mubr.msk.bf16.gmra.mrb[28].mxu1 %vm6923_vm15, %v4747_v20  ;;  %vm4931_vm8 = vcmp.ne.s32.totalorder %v604_v25, %v4085_v8  ;;  %v395_v58 = vshra.s32 %v299_v4, 4  ;;  %v587_v17 = vand.u32 15, %v299_v4 }
 0x2e0   :  { %v6913_v31 = vsel %vm4887_vm9, 4294967295, %v6912_v31  ;;  %vm6924_vm13 = vmmov %vm6923_vm15  ;;  %2064 = vmatprep.mubr.bf16.mxu1 %v6642_v0  ;;  %vm6931_vm6 = vnez %v6905_v39  ;;  %vm6932_vm14 = vnez %v6903_v11  ;;  %v345_v16 = vadd.s32 448, %v6646_v35 }
 0x2e1   :  { %2873 = vmatmul.mubr.msk.bf16.gmra.mrb[32].mxu0 %vm6924_vm13, %v4747_v20  ;;  %v396_v56 = vshra.s32 %v300_v26, 4  ;;  %v588_v45 = vand.u32 15, %v300_v26  ;;  %vm6933_vm3 = vnez %v6734_v48  ;;  %vm6934_vm9 = vnez %v6738_v36  ;;  %v4989_v36 = vpop.f32.mrb[16].mxu1 }
 0x2e2   :  { %vm6935_vm4 = vmand %vm6933_vm3, %vm6934_vm9  ;;  %vm6936_vm10 = vnez %v6736_v28  ;;  %vm6937_vm2 = vnez %v6740_v32  ;;  %v6939_v63 = vmov 0  ;;  %vm6941_vm5 = vnez %v6838_v15 }
 0x2e3   :  { %vm6938_vm0 = vmand %vm6936_vm10, %vm6937_vm2  ;;  %3017 = vmatpush3.bf16.msk.msra.mxu0 %vm6941_vm5, %v6854_v5  ;;  %v616_v55 = vand.u32 15, %v4634_v37  ;;  %v346_v48 = vadd.s32 456, %v6646_v35  ;;  %vm6942_vm3 = vnez %v6747_v59  ;;  %vm6945_vm10 = vnez %v6751_v40  ;;  %v5021_v37 = vpop.f32.mrb[17].mxu1 }
 0x2e4   :  { %vm4955_vm11 = vmpackc.low %vm6938_vm0, %vm6935_vm4  ;;  %vm6943_vm0 = vnez %v6762_v30  ;;  %vm6946_vm4 = vnez %v6764_v50  ;;  %v6948_v32 = vmov 0  ;;  %vm6950_vm15 = vnez %v6876_v24 }
 0x2e5   :  { %v6940_v63 = vsel %vm4955_vm11, 4294967295, %v6939_v63  ;;  %vm6944_vm2 = vmand %vm6942_vm3, %vm6943_vm0  ;;  %3018 = vmatprep.subr.msk.bf16.mxu0 %vm6950_vm15, %v6854_v5  ;;  %vm4992_vm3 = vcmp.eq.s32.totalorder %v424_v9, %v4078_v7  ;;  %v6951_v40 = vmov 0  ;;  %vm6954_vm0 = vnez %v6872_v1  ;;  %v7110_v9 = vld [vmem:[#allocation10_spill] sm:$0xff] }
 0x2e6   :  { %vm6947_vm11 = vmand %vm6945_vm10, %vm6946_vm4  ;;  %v6952_v40 = vsel %vm4992_vm3, 4294967295, %v6951_v40  ;;  %vm6956_vm10 = vnez %v6870_v33  ;;  %vm6957_vm15 = vnez %v6878_v52  ;;  %v329_v59 = vadd.s32 320, %v6646_v35 }
 0x2e7   :  { %vm4978_vm5 = vmpackc.low %vm6947_vm11, %vm6944_vm2  ;;  %vm6953_vm11 = vnez %v6862_v57  ;;  %vm5012_vm9 = vcmp.eq.s32.totalorder %v395_v58, %v4078_v7  ;;  %vm5017_vm13 = vcmp.ne.s32.totalorder %v587_v17, %v4085_v8  ;;  %v6969_v15 = vmov 0  ;;  %v5048_v57 = vpop.f32.mrb[18].mxu1 }
 0x2e8   :  { %v6949_v32 = vsel %vm4978_vm5, 4294967295, %v6948_v32  ;;  %vm6955_vm2 = vmand %vm6953_vm11, %vm6954_vm0  ;;  %vm6965_vm11 = vnez %v6885_v49  ;;  %vm6966_vm0 = vnez %v6887_v10  ;;  %v441_v23 = vshra.s32 %v345_v16, 4  ;;  %6975 = vst [vmem:[#allocation23_spill] sm:$0xff] %v5048_v57  ;;  %v5087_v33 = vpop.f32.mrb[19].mxu1 }
 0x2e9   :  { %vm6958_vm4 = vmand %vm6956_vm10, %vm6957_vm15  ;;  %v330_v22 = vadd.s32 328, %v6646_v35  ;;  %v6971_v3 = vmov 0  ;;  %vm5044_vm3 = vcmp.ne.s32.totalorder %v588_v45, %v4085_v8  ;;  %v6973_v2 = vmov 0  ;;  %6991 = vst [vmem:[#allocation24_spill] sm:$0xff] %v5087_v33 }
 0x2ea   :  { %vm5006_vm5 = vmpackc.low %vm6958_vm4, %vm6955_vm2  ;;  %vm5039_vm4 = vcmp.eq.s32.totalorder %v396_v56, %v4078_v7  ;;  %v6974_v2 = vsel %vm5044_vm3, 4294967295, %v6973_v2  ;;  %v6982_v54 = vmov 0  ;;  %vm5068_vm3 = vcmp.ne.s32.totalorder %v616_v55, %v4085_v8 }
 0x2eb   :  { %vm6967_vm2 = vmand %vm6965_vm11, %vm6966_vm0  ;;  %v6972_v3 = vsel %vm5039_vm4, 4294967295, %v6971_v3  ;;  %vm6979_vm0 = vnez %v6783_v13  ;;  %vm6984_vm4 = vnez %v6883_v14  ;;  %v634_v1 = vand.u32 15, %v346_v48 }
 0x2ec   :  { %vm6968_vm10 = vmand %vm6932_vm14, %vm6931_vm6  ;;  %vm6976_vm6 = vnez %v6781_v60  ;;  %vm6977_vm14 = vnez %v6785_v34  ;;  %3019 = vmatpush3.bf16.msk.msra.mxu0 %vm6984_vm4, %v6854_v5  ;;  %v442_v60 = vshra.s32 %v346_v48, 4  ;;  %v633_v34 = vand.u32 15, %v345_v16 }
 0x2ed   :  { %vm5033_vm15 = vmpackc.low %vm6968_vm10, %vm6967_vm2  ;;  %vm6980_vm2 = vnez %v6787_v44  ;;  %v347_v44 = vadd.s32 464, %v6646_v35  ;;  %3020 = vmatprep.subr.msk.bf16.mxu0 %vm5006_vm5, %v6854_v5  ;;  %v348_v51 = vadd.s32 472, %v6646_v35  ;;  %v425_v6 = vshra.s32 %v329_v59, 4 }
 0x2ee   :  { %v6970_v15 = vsel %vm5033_vm15, 4294967295, %v6969_v15  ;;  %vm6978_vm11 = vmand %vm6976_vm6, %vm6977_vm14  ;;  %v617_v24 = vand.u32 15, %v329_v59  ;;  %vm6995_vm5 = vnez %v6895_v61  ;;  %v426_v52 = vshra.s32 %v330_v22, 4  ;;  %v5169_v61 = vpop.f32.mrb[20].mxu1 }
 0x2ef   :  { %vm6981_vm10 = vmand %vm6979_vm0, %vm6980_vm2  ;;  %vm6996_vm0 = vnez %v6952_v40  ;;  %v618_v42 = vand.u32 15, %v330_v22  ;;  %vm7003_vm4 = vnez %v6842_v38  ;;  %vm7004_vm2 = vnez %v6853_v47  ;;  %7019 = vst [vmem:[#allocation25_spill] sm:$0xff] %v5169_v61 }
 0x2f0   :  { %vm5060_vm15 = vmpackc.low %vm6981_vm10, %vm6978_vm11  ;;  %vm5112_vm10 = vcmp.eq.s32.totalorder %v441_v23, %v4078_v7  ;;  %v443_v38 = vshra.s32 %v347_v44, 4  ;;  %v444_v49 = vshra.s32 %v348_v51, 4  ;;  %v636_v10 = vand.u32 15, %v348_v51 }
 0x2f1   :  { %v6983_v54 = vsel %vm5060_vm15, 4294967295, %v6982_v54  ;;  %vm6987_vm6 = vmand %vm4908_vm7, %vm4913_vm12  ;;  %vm6994_vm12 = vnez %v6972_v3  ;;  %v331_v26 = vadd.s32 336, %v6646_v35  ;;  %v7024_v11 = vmov 0 }
 0x2f2   :  { %vm6988_vm14 = vmand %vm4926_vm1, %vm4931_vm8  ;;  %vm6992_vm1 = vcmask 130048   ;;  %vm6993_vm8 = vnez %v6974_v2  ;;  %v318_v48 = vadd.s32 232, %v6646_v35  ;;  %v302_v40 = vadd.s32 104, %v6646_v35 }
 0x2f3   :  { %vm5082_vm11 = vmpackc.low %vm6988_vm14, %vm6987_vm6  ;;  %2878 = vmatmul.mubr.msk.bf16.vlgmr.msra.gmra.mrb[32].mxu1 %vm6992_vm1, %v4656_v21  ;;  %v6997_v21 = vmov 0  ;;  %vm6999_vm6 = vnez %v6913_v31  ;;  %vm7000_vm14 = vnez %v6830_v29  ;;  %vm7001_vm1 = vnez %v6851_v53  ;;  %v5199_v31 = vpop.f32.mrb[21].mxu1 }
 0x2f4   :  { %2074 = vmatprep.mubr.bf16.mxu1 %v6642_v0  ;;  %3041 = vmatpush3.bf16.msk.msra.mxu1 %vm6995_vm5, %v6854_v5  ;;  %v6998_v21 = vsel %vm5112_vm10, 4294967295, %v6997_v21  ;;  %vm7002_vm5 = vmand %vm7000_vm14, %vm7001_vm1  ;;  %vm7008_vm10 = vnez %v6970_v15  ;;  %vm5142_vm14 = vcmp.ne.s32.totalorder %v633_v34, %v4085_v8  ;;  %v635_v53 = vand.u32 15, %v347_v44  ;;  %7031 = vst [vmem:[#allocation26_spill] sm:$0xff] %v5199_v31  ;;  %v5218_v43 = vpop.f32.mrb[22].mxu1 }
 0x2f5   :  { %3042 = vmatprep.subr.msk.bf16.mxu1 %vm6999_vm6, %v6854_v5  ;;  %vm7005_vm7 = vmand %vm7003_vm4, %vm7004_vm2  ;;  %3021 = vmatpush3.bf16.msk.msra.mxu0 %vm7008_vm10, %v6854_v5  ;;  %vm5137_vm6 = vcmp.eq.s32.totalorder %v442_v60, %v4078_v7  ;;  %vm7021_vm1 = vnez %v6900_v62  ;;  %v332_v62 = vadd.s32 344, %v6646_v35  ;;  %7038 = vst [vmem:[#allocation27_spill] sm:$0xff] %v5218_v43  ;;  %v5237_v58 = vpop.f32.mrb[23].mxu1  ;;  %v427_v56 = vshra.s32 %v331_v26, 4 }
 0x2f6   :  { %vm5129_vm15 = vmpackc.low %vm7005_vm7, %vm7002_vm5  ;;  %vm5147_vm7 = vcmp.ne.s32.totalorder %v634_v1, %v4085_v8  ;;  %3022 = vmatprep.subr.msk.bf16.mxu0 %vm5082_vm11, %v6854_v5  ;;  %vm7020_vm11 = vnez %v6898_v27  ;;  %vm5191_vm5 = vcmp.ne.s32.totalorder %v617_v24, %v4085_v8  ;;  %v7028_v27 = vmov 0  ;;  %7043 = vst [vmem:[#allocation28_spill] sm:$0xff] %v5237_v58 }
 0x2f7   :  { %vm7015_vm4 = vmand %vm5012_vm9, %vm5017_vm13  ;;  %v7029_v27 = vsel %vm5191_vm5, 4294967295, %v7028_v27  ;;  %v619_v45 = vand.u32 15, %v331_v26  ;;  %v620_v55 = vand.u32 15, %v332_v62  ;;  %v349_v28 = vadd.s32 480, %v6646_v35 }
 0x2f8   :  { %vm7016_vm2 = vmand %vm6994_vm12, %vm6993_vm8  ;;  %vm5186_vm12 = vcmp.eq.s32.totalorder %v425_v6, %v4078_v7  ;;  %v350_v59 = vadd.s32 488, %v6646_v35  ;;  %v414_v50 = vshra.s32 %v318_v48, 4  ;;  %v606_v23 = vand.u32 15, %v318_v48 }
 0x2f9   :  { %vm5164_vm10 = vmpackc.low %vm7016_vm2, %vm7015_vm4  ;;  %vm7030_vm4 = vnez %v6940_v63  ;;  %vm5206_vm2 = vcmp.eq.s32.totalorder %v426_v52, %v4078_v7  ;;  %v428_v63 = vshra.s32 %v332_v62, 4  ;;  %v398_v3 = vshra.s32 %v302_v40, 4 }
 0x2fa   :  { %vm7022_vm13 = vmand %vm7020_vm11, %vm7021_vm1  ;;  %3043 = vmatpush3.bf16.msk.msra.mxu1 %vm7030_vm4, %v6854_v5  ;;  %vm5211_vm11 = vcmp.ne.s32.totalorder %v618_v42, %v4085_v8  ;;  %vm7037_vm1 = vnez %v6949_v32  ;;  %3023 = vmatpush3.bf16.msk.msra.mxu0 %vm5164_vm10, %v6854_v5  ;;  %vm5233_vm4 = vcmp.ne.s32.totalorder %v635_v53, %v4085_v8  ;;  %vm5249_vm10 = vcmp.ne.s32.totalorder %v636_v10, %v4085_v8  ;;  %v1617_v53 = vpop.permute.xlu1 %1616 }
 0x2fb   :  { %vm7023_vm9 = vmand %vm6996_vm0, %vm5068_vm3  ;;  %vm7032_vm3 = vnez %v6998_v21  ;;  %3044 = vmatprep.subr.msk.bf16.mxu1 %vm7037_vm1, %v6854_v5  ;;  %vm7048_vm0 = vcmask 130048   ;;  %v301_v32 = vadd.s32 96, %v6646_v35  ;;  %v445_v1 = vshra.s32 %v349_v28, 4 }
 0x2fc   :  { %vm5181_vm8 = vmpackc.low %vm7023_vm9, %vm7022_vm13  ;;  %vm5228_vm9 = vcmp.eq.s32.totalorder %v443_v38, %v4078_v7  ;;  %vm5244_vm13 = vcmp.eq.s32.totalorder %v444_v49, %v4078_v7  ;;  %2879 = vmatmul.mubr.msk.bf16.gmra.mrb[36].mxu1 %vm7048_vm0, %v4747_v20  ;;  %v317_v20 = vadd.s32 224, %v6646_v35  ;;  %v446_v51 = vshra.s32 %v350_v59, 4 }
 0x2fd   :  { %v7025_v11 = vsel %vm5181_vm8, 4294967295, %v7024_v11  ;;  %vm810_vm1 = vmand %vm5206_vm2, %vm5211_vm11  ;;  %vm7049_vm8 = vnez %v6983_v54  ;;  %v397_v22 = vshra.s32 %v301_v32, 4  ;;  %v589_v2 = vand.u32 15, %v301_v32 }
 0x2fe   :  { %3045 = vmatpush3.bf16.msk.msra.mxu1 %vm7049_vm8, %v6854_v5  ;;  %vm827_vm5 = vmand %vm5228_vm9, %vm5233_vm4  ;;  %vm523_vm9 = vcmp.eq.s32.totalorder %v427_v56, %v4078_v7  ;;  %vm7052_vm4 = vnez %v7029_v27  ;;  %v413_v30 = vshra.s32 %v317_v20, 4  ;;  %v605_v15 = vand.u32 15, %v317_v20  ;;  %v7116_v20 = vld [vmem:[#allocation16_spill] sm:$0xff] }
 0x2ff   :  { %3046 = vmatprep.subr.msk.bf16.mxu1 %vm5129_vm15, %v6854_v5  ;;  %vm828_vm0 = vmand %vm5244_vm13, %vm5249_vm10  ;;  %vm715_vm15 = vcmp.ne.s32.totalorder %v619_v45, %v4085_v8  ;;  %v590_v54 = vand.u32 15, %v302_v40  ;;  %v637_v6 = vand.u32 15, %v349_v28  ;;  %v638_v24 = vand.u32 15, %v350_v59 }
 0x300   :  { %vm7050_vm2 = vmand %vm7032_vm3, %vm5142_vm14  ;;  %vm524_vm3 = vcmp.eq.s32.totalorder %v428_v63, %v4078_v7  ;;  %vm716_vm14 = vcmp.ne.s32.totalorder %v620_v55, %v4085_v8  ;;  %v333_v21 = vadd.s32 352, %v6646_v35  ;;  %v334_v52 = vadd.s32 360, %v6646_v35  ;;  %v7115_v63 = vld [vmem:[#allocation14_spill] sm:$0xff] }
 0x301   :  { %vm7051_vm8 = vmand %vm5137_vm6, %vm5147_vm7  ;;  %vm7054_vm6 = vnez %v7025_v11  ;;  %v319_v42 = vadd.s32 240, %v6646_v35  ;;  %v320_v25 = vadd.s32 248, %v6646_v35  ;;  %v303_v17 = vadd.s32 112, %v6646_v35 }
 0x302   :  { %vm2936_vm11 = vmpackc.low %vm7051_vm8, %vm7050_vm2  ;;  %3047 = vmatpush3.bf16.msk.msra.mxu1 %vm7054_vm6, %v6854_v5  ;;  %v429_v47 = vshra.s32 %v333_v21, 4  ;;  %v430_v14 = vshra.s32 %v334_v52, 4  ;;  %v621_v49 = vand.u32 15, %v333_v21  ;;  %v622_v10 = vand.u32 15, %v334_v52 }
 0x303   :  { %vm7053_vm13 = vmand %vm5186_vm12, %vm7052_vm4  ;;  %3048 = vmatprep.subr.msk.bf16.mxu1 %vm2936_vm11, %v6854_v5  ;;  %vm5306_vm12 = vcmp.eq.s32.totalorder %v413_v30, %v4078_v7  ;;  %v415_v26 = vshra.s32 %v319_v42, 4  ;;  %v416_v11 = vshra.s32 %v320_v25, 4  ;;  %v607_v39 = vand.u32 15, %v319_v42 }
 0x304   :  { %vm2920_vm10 = vmpackc.low %vm810_vm1, %vm7053_vm13  ;;  %vm701_vm1 = vcmp.ne.s32.totalorder %v605_v15, %v4085_v8  ;;  %vm5326_vm13 = vcmp.ne.s32.totalorder %v589_v2, %v4085_v8  ;;  %v608_v27 = vand.u32 15, %v320_v25  ;;  %v304_v16 = vadd.s32 120, %v6646_v35 }
 0x305   :  { %vm2938_vm7 = vmpackc.low %vm828_vm0, %vm827_vm5  ;;  %vm510_vm5 = vcmp.eq.s32.totalorder %v414_v50, %v4078_v7  ;;  %vm702_vm0 = vcmp.ne.s32.totalorder %v606_v23, %v4085_v8  ;;  %v351_v56 = vadd.s32 496, %v6646_v35  ;;  %v352_v45 = vadd.s32 504, %v6646_v35  ;;  %v7120_v23 = vld [vmem:[#allocation19_spill] sm:$0xff] }
 0x306   :  { %vm811_vm2 = vmand %vm523_vm9, %vm715_vm15  ;;  %3049 = vmatpush3.bf16.msk.msra.mxu1 %vm2920_vm10, %v6854_v5  ;;  %vm5316_vm9 = vcmp.eq.s32.totalorder %v397_v22, %v4078_v7  ;;  %vm5321_vm15 = vcmp.eq.s32.totalorder %v398_v3, %v4078_v7  ;;  %vm5331_vm10 = vcmp.ne.s32.totalorder %v590_v54, %v4085_v8  ;;  %v335_v48 = vadd.s32 368, %v6646_v35 }
 0x307   :  { %vm812_vm8 = vmand %vm524_vm3, %vm716_vm14  ;;  %3050 = vmatprep.subr.msk.bf16.mxu1 %vm2938_vm7, %v6854_v5  ;;  %vm5345_vm7 = vcmp.eq.s32.totalorder %v445_v1, %v4078_v7  ;;  %v399_v32 = vshra.s32 %v303_v17, 4  ;;  %v400_v40 = vshra.s32 %v304_v16, 4  ;;  %v591_v28 = vand.u32 15, %v303_v17 }
 0x308   :  { %vm2922_vm4 = vmpackc.low %vm812_vm8, %vm811_vm2  ;;  %vm5350_vm2 = vcmp.eq.s32.totalorder %v446_v51, %v4078_v7  ;;  %vm5355_vm8 = vcmp.ne.s32.totalorder %v637_v6, %v4085_v8  ;;  %v592_v59 = vand.u32 15, %v304_v16  ;;  %v447_v30 = vshra.s32 %v351_v56, 4 }
 0x309   :  { %vm797_vm11 = vmand %vm5306_vm12, %vm701_vm1  ;;  %v639_v50 = vand.u32 15, %v351_v56  ;;  %v336_v15 = vadd.s32 376, %v6646_v35  ;;  %v448_v3 = vshra.s32 %v352_v45, 4  ;;  %v640_v2 = vand.u32 15, %v352_v45  ;;  %v7114_v56 = vld [vmem:[#allocation13_spill] sm:$0xff] }
 0x30a   :  { %3051 = vmatpush3.bf16.msk.msra.mxu1 %vm2922_vm4, %v6854_v5  ;;  %vm798_vm3 = vmand %vm510_vm5, %vm702_vm0  ;;  %vm5360_vm4 = vcmp.ne.s32.totalorder %v638_v24, %v4085_v8  ;;  %vm5374_vm0 = vcmp.eq.s32.totalorder %v429_v47, %v4078_v7  ;;  %v369_v60 = vadd.s32 640, %v6646_v35  ;;  %v431_v34 = vshra.s32 %v335_v48, 4  ;;  %v5518_v47 = vpop.permute.xlu1 %1624 }
 0x30b   :  { %vm2908_vm14 = vmpackc.low %vm798_vm3, %vm797_vm11  ;;  %vm5379_vm11 = vcmp.ne.s32.totalorder %v621_v49, %v4085_v8  ;;  %v623_v13 = vand.u32 15, %v335_v48  ;;  %v370_v44 = vadd.s32 648, %v6646_v35  ;;  %v432_v6 = vshra.s32 %v336_v15, 4  ;;  %7107 = vst [vmem:[#allocation29_spill] sm:$0xff] %v5518_v47 }
 0x30c   :  { %3024 = vmatprep.subr.msk.bf16.mxu0 %vm2908_vm14, %v6854_v5  ;;  %vm781_vm6 = vmand %vm5316_vm9, %vm5326_vm13  ;;  %vm5393_vm13 = vcmp.ne.s32.totalorder %v622_v10, %v4085_v8  ;;  %v624_v24 = vand.u32 15, %v336_v15  ;;  %v465_v52 = vshra.s32 %v369_v60, 4  ;;  %v657_v42 = vand.u32 15, %v369_v60  ;;  %v7108_v10 = vld [vmem:[#allocation8_spill] sm:$0xff] }
 0x30d   :  { %vm782_vm12 = vmand %vm5321_vm15, %vm5331_vm10  ;;  %vm5388_vm15 = vcmp.eq.s32.totalorder %v430_v14, %v4078_v7  ;;  %vm5398_vm10 = vcmp.eq.s32.totalorder %v415_v26, %v4078_v7  ;;  %v466_v29 = vshra.s32 %v370_v44, 4  ;;  %v658_v38 = vand.u32 15, %v370_v44  ;;  %v5520_v14 = vpop.permute.xlu0 %1620 }
 0x30e   :  { %vm2892_vm5 = vmpackc.low %vm782_vm12, %vm781_vm6  ;;  %vm5412_vm6 = vcmp.eq.s32.totalorder %v416_v11, %v4078_v7  ;;  %v5523_v49 = vadd.f32 %v4229_v19, %v1617_v53  ;;  %v5526_v26 = vadd.f32 %v7108_v10, %v1617_v53  ;;  %v7109_v11 = vld [vmem:[#allocation9_spill] sm:$0xff]  ;;  %v354_v62 = vadd.s32 520, %v6646_v35  ;;  %v5540_v17 = vpop.permute.xlu1 %1628  ;;  %v7113_v19 = vld [vmem:[#allocation11_spill] sm:$0xff] }
 0x30f   :  { %3025 = vmatpush3.bf16.msk.msra.mxu0 %vm2892_vm5, %v6854_v5  ;;  %vm829_vm1 = vmand %vm5345_vm7, %vm5355_vm8  ;;  %vm5417_vm7 = vcmp.ne.s32.totalorder %v607_v39, %v4085_v8  ;;  %vm5438_vm5 = vcmp.eq.s32.totalorder %v399_v32, %v4078_v7  ;;  %v5529_v39 = vadd.f32 %v7109_v11, %v1617_v53  ;;  %v5534_v46 = vadd.f32 %v7110_v9, %v1617_v53  ;;  %v7117_v32 = vld [vmem:[#allocation15_spill] sm:$0xff] }
 0x310   :  { %vm830_vm9 = vmand %vm5350_vm2, %vm5360_vm4  ;;  %vm5422_vm2 = vcmp.ne.s32.totalorder %v608_v27, %v4085_v8  ;;  %v353_v27 = vadd.s32 512, %v6646_v35  ;;  %v5538_v18 = vadd.f32 %v7111_v41, %v5520_v14  ;;  %7112 = vst [vmem:[#allocation8_spill] sm:$0xff] %v5540_v17  ;;  %v5544_v16 = vadd.f32 %v7113_v19, %v5520_v14 }
 0x311   :  { %vm2940_vm3 = vmpackc.low %vm830_vm9, %vm829_vm1  ;;  %vm5443_vm1 = vcmp.ne.s32.totalorder %v591_v28, %v4085_v8  ;;  %vm5457_vm9 = vcmp.ne.s32.totalorder %v592_v59, %v4085_v8  ;;  %v5548_v45 = vadd.f32 %v7114_v56, %v5520_v14  ;;  %v5552_v55 = vadd.f32 %v7115_v63, %v5520_v14  ;;  %v7118_v59 = vld [vmem:[#allocation18_spill] sm:$0xff] }
 0x312   :  { %3052 = vmatprep.subr.msk.bf16.mxu1 %vm2940_vm3, %v6854_v5  ;;  %vm813_vm14 = vmand %vm5374_vm0, %vm5379_vm11  ;;  %vm5452_vm11 = vcmp.eq.s32.totalorder %v400_v40, %v4078_v7  ;;  %vm5474_vm3 = vcmp.ne.s32.totalorder %v639_v50, %v4085_v8  ;;  %v5556_v48 = vadd.f32 %v7116_v20, %v5518_v47  ;;  %v5560_v40 = vadd.f32 %v7117_v32, %v5518_v47  ;;  %v7119_v50 = vld [vmem:[#allocation17_spill] sm:$0xff] }
 0x313   :  { %vm814_vm8 = vmand %vm5388_vm15, %vm5393_vm13  ;;  %v371_v28 = vadd.s32 656, %v6646_v35  ;;  %v5569_v15 = vadd.f32 %v7119_v50, %v5518_v47  ;;  %v5573_v22 = vadd.f32 %v7120_v23, %v5540_v17  ;;  %v449_v12 = vshra.s32 %v353_v27, 4 }
 0x314   :  { %vm2924_vm4 = vmpackc.low %vm814_vm8, %vm813_vm14  ;;  %v450_v60 = vshra.s32 %v354_v62, 4  ;;  %v641_v1 = vand.u32 15, %v353_v27  ;;  %v642_v51 = vand.u32 15, %v354_v62  ;;  %v374_v10 = vadd.s32 680, %v6646_v35 }
 0x315   :  { %3053 = vmatpush3.bf16.msk.msra.mxu1 %vm2924_vm4, %v6854_v5  ;;  %vm799_vm12 = vmand %vm5398_vm10, %vm5417_vm7  ;;  %vm5469_vm10 = vcmp.eq.s32.totalorder %v447_v30, %v4078_v7  ;;  %vm736_vm7 = vcmp.ne.s32.totalorder %v640_v2, %v4085_v8  ;;  %vm5494_vm4 = vcmp.eq.s32.totalorder %v431_v34, %v4078_v7  ;;  %v5565_v30 = vadd.f32 %v7118_v59, %v5518_v47  ;;  %v7121_v2 = vld [vmem:[#allocation20_spill] sm:$0xff] }
 0x316   :  { %vm800_vm0 = vmand %vm5412_vm6, %vm5422_vm2  ;;  %vm5483_vm6 = vcmp.eq.s32.totalorder %v448_v3, %v4078_v7  ;;  %v372_v3 = vadd.s32 664, %v6646_v35  ;;  %v5578_v54 = vadd.f32 %v7121_v2, %v5540_v17  ;;  %v355_v34 = vadd.s32 528, %v6646_v35 }
 0x317   :  { %vm2910_vm15 = vmpackc.low %vm800_vm0, %vm799_vm12  ;;  %vm5499_vm12 = vcmp.ne.s32.totalorder %v623_v13, %v4085_v8  ;;  %vm720_vm0 = vcmp.ne.s32.totalorder %v624_v24, %v4085_v8  ;;  %v7122_v13 = vld [vmem:[#allocation21_spill] sm:$0xff]  ;;  %v7123_v24 = vld [vmem:[#allocation22_spill] sm:$0xff]  ;;  %v467_v25 = vshra.s32 %v371_v28, 4  ;;  %v357_v63 = vadd.s32 544, %v6646_v35 }
 0x318   :  { %3026 = vmatprep.subr.msk.bf16.mxu0 %vm2910_vm15, %v6854_v5  ;;  %vm783_vm13 = vmand %vm5438_vm5, %vm5443_vm1  ;;  %vm528_vm1 = vcmp.eq.s32.totalorder %v432_v6, %v4078_v7  ;;  %vm561_vm15 = vcmp.eq.s32.totalorder %v465_v52, %v4078_v7  ;;  %v5583_v44 = vadd.f32 %v7122_v13, %v5540_v17  ;;  %v356_v6 = vadd.s32 536, %v6646_v35 }
 0x319   :  { %vm784_vm14 = vmand %vm5452_vm11, %vm5457_vm9  ;;  %v5588_v21 = vadd.f32 %v7123_v24, %v5540_v17  ;;  %v5591_v52 = vadd.f32 %v4989_v36, %v1617_v53  ;;  %v468_v4 = vshra.s32 %v372_v3, 4  ;;  %v660_v36 = vand.u32 15, %v372_v3 }
 0x31a   :  { %vm2894_vm2 = vmpackc.low %vm784_vm14, %vm783_vm13  ;;  %vm753_vm13 = vcmp.ne.s32.totalorder %v657_v42, %v4085_v8  ;;  %vm754_vm14 = vcmp.ne.s32.totalorder %v658_v38, %v4085_v8  ;;  %v5594_v42 = vadd.f32 %v5021_v37, %v1617_v53  ;;  %v373_v38 = vadd.s32 672, %v6646_v35 }
 0x31b   :  { %3027 = vmatpush3.bf16.msk.msra.mxu0 %vm2894_vm2, %v6854_v5  ;;  %vm831_vm8 = vmand %vm5469_vm10, %vm5474_vm3  ;;  %vm562_vm3 = vcmp.eq.s32.totalorder %v466_v29, %v4078_v7  ;;  %7124 = vst [vmem:[#allocation9_spill] sm:$0xff] %v5591_v52  ;;  %v659_v29 = vand.u32 15, %v371_v28  ;;  %v451_v37 = vshra.s32 %v355_v34, 4  ;;  %v452_v9 = vshra.s32 %v356_v6, 4 }
 0x31c   :  { %vm832_vm5 = vmand %vm5483_vm6, %vm736_vm7  ;;  %7125 = vst [vmem:[#allocation10_spill] sm:$0xff] %v5594_v42  ;;  %v643_v41 = vand.u32 15, %v355_v34  ;;  %v644_v56 = vand.u32 15, %v356_v6  ;;  %v358_v20 = vadd.s32 552, %v6646_v35  ;;  %v469_v59 = vshra.s32 %v373_v38, 4 }
 0x31d   :  { %vm2942_vm11 = vmpackc.low %vm832_vm5, %vm831_vm8  ;;  %vm5609_vm5 = vcmp.ne.s32.totalorder %v641_v1, %v4085_v8  ;;  %v470_v50 = vshra.s32 %v374_v10, 4  ;;  %v7142_v3 = vmov 0  ;;  %v661_v2 = vand.u32 15, %v373_v38 }
 0x31e   :  { %3054 = vmatprep.subr.msk.bf16.mxu1 %vm2942_vm11, %v6854_v5  ;;  %vm815_vm9 = vmand %vm5494_vm4, %vm5499_vm12  ;;  %vm5599_vm4 = vcmp.eq.s32.totalorder %v449_v12, %v4078_v7  ;;  %vm5604_vm12 = vcmp.eq.s32.totalorder %v450_v60, %v4078_v7  ;;  %vm5626_vm11 = vcmp.eq.s32.totalorder %v468_v4, %v4078_v7  ;;  %v662_v12 = vand.u32 15, %v374_v10 }
 0x31f   :  { %vm816_vm10 = vmand %vm528_vm1, %vm720_vm0  ;;  %vm5614_vm1 = vcmp.ne.s32.totalorder %v642_v51, %v4085_v8  ;;  %vm5619_vm0 = vcmp.eq.s32.totalorder %v467_v25, %v4078_v7  ;;  %v7144_v60 = vmov 0  ;;  %v7146_v34 = vmov 0 }
 0x320   :  { %vm2926_vm6 = vmpackc.low %vm816_vm10, %vm815_vm9  ;;  %vm5631_vm9 = vcmp.ne.s32.totalorder %v659_v29, %v4085_v8  ;;  %vm5646_vm10 = vcmp.eq.s32.totalorder %v452_v9, %v4078_v7  ;;  %v375_v13 = vadd.s32 688, %v6646_v35  ;;  %v376_v1 = vadd.s32 696, %v6646_v35 }
 0x321   :  { %3055 = vmatpush3.bf16.msk.msra.mxu1 %vm2926_vm6, %v6854_v5  ;;  %vm849_vm7 = vmand %vm561_vm15, %vm753_vm13  ;;  %vm5636_vm15 = vcmp.ne.s32.totalorder %v660_v36, %v4085_v8  ;;  %vm5641_vm13 = vcmp.eq.s32.totalorder %v451_v37, %v4078_v7  ;;  %v7145_v60 = vsel %vm5646_vm10, 4294967295, %v7144_v60  ;;  %v453_v6 = vshra.s32 %v357_v63, 4 }
 0x322   :  { %vm850_vm2 = vmand %vm562_vm3, %vm754_vm14  ;;  %v7143_v3 = vsel %vm5641_vm13, 4294967295, %v7142_v3  ;;  %vm5651_vm3 = vcmp.ne.s32.totalorder %v643_v41, %v4085_v8  ;;  %vm5658_vm14 = vcmp.ne.s32.totalorder %v644_v56, %v4085_v8  ;;  %v454_v24 = vshra.s32 %v358_v20, 4 }
 0x323   :  { %vm2960_vm8 = vmpackc.low %vm850_vm2, %vm849_vm7  ;;  %v7147_v34 = vsel %vm5651_vm3, 4294967295, %v7146_v34  ;;  %v359_v25 = vadd.s32 560, %v6646_v35  ;;  %vm5664_vm6 = vcmp.eq.s32.totalorder %v469_v59, %v4078_v7  ;;  %v7150_v4 = vmov 0 }
 0x324   :  { %3068 = vmatprep.subr.msk.bf16.mxu0 %vm2960_vm8, %v6854_v5  ;;  %v7151_v4 = vsel %vm5664_vm6, 4294967295, %v7150_v4  ;;  %vm5669_vm7 = vcmp.eq.s32.totalorder %v470_v50, %v4078_v7  ;;  %v7152_v29 = vmov 0  ;;  %v645_v38 = vand.u32 15, %v357_v63 }
 0x325   :  { %v7153_v29 = vsel %vm5669_vm7, 4294967295, %v7152_v29  ;;  %v360_v10 = vadd.s32 568, %v6646_v35  ;;  %vm5675_vm2 = vcmp.ne.s32.totalorder %v661_v2, %v4085_v8  ;;  %v7154_v36 = vmov 0 }
 0x326   :  { %v7155_v36 = vsel %vm5675_vm2, 4294967295, %v7154_v36  ;;  %v646_v37 = vand.u32 15, %v358_v20  ;;  %v377_v9 = vadd.s32 704, %v6646_v35  ;;  %v378_v41 = vadd.s32 712, %v6646_v35 }
 0x327   :  { %vm5682_vm8 = vcmp.ne.s32.totalorder %v662_v12, %v4085_v8  ;;  %v7156_v56 = vmov 0  ;;  %v471_v59 = vshra.s32 %v375_v13, 4  ;;  %v472_v50 = vshra.s32 %v376_v1, 4 }
 0x328   :  { %v7157_v56 = vsel %vm5682_vm8, 4294967295, %v7156_v56  ;;  %v663_v63 = vand.u32 15, %v375_v13  ;;  %vm5691_vm6 = vcmp.eq.s32.totalorder %v453_v6, %v4078_v7  ;;  %v7158_v20 = vmov 0 }
 0x329   :  { %v7159_v20 = vsel %vm5691_vm6, 4294967295, %v7158_v20  ;;  %vm5696_vm2 = vcmp.eq.s32.totalorder %v454_v24, %v4078_v7  ;;  %v7160_v2 = vmov 0  ;;  %v664_v12 = vand.u32 15, %v376_v1 }
 0x32a   :  { %v7161_v2 = vsel %vm5696_vm2, 4294967295, %v7160_v2  ;;  %v455_v0 = vshra.s32 %v359_v25, 4  ;;  %vm5705_vm10 = vcmp.ne.s32.totalorder %v645_v38, %v4085_v8  ;;  %v456_v6 = vshra.s32 %v360_v10, 4 }
 0x32b   :  { %v647_v58 = vand.u32 15, %v359_v25  ;;  %v648_v43 = vand.u32 15, %v360_v10  ;;  %vm5714_vm2 = vcmp.ne.s32.totalorder %v646_v37, %v4085_v8  ;;  %v7164_v1 = vmov 0 }
 0x32c   :  { %v7165_v1 = vsel %vm5714_vm2, 4294967295, %v7164_v1  ;;  %v473_v24 = vshra.s32 %v377_v9, 4  ;;  %v474_v17 = vshra.s32 %v378_v41, 4  ;;  %v665_v31 = vand.u32 15, %v377_v9  ;;  %vm7176_vm2 = vmand %vm5599_vm4, %vm5609_vm5 }
 0x32d   :  { %vm5723_vm6 = vcmp.eq.s32.totalorder %v471_v59, %v4078_v7  ;;  %v7166_v25 = vmov 0  ;;  %vm5728_vm7 = vcmp.eq.s32.totalorder %v472_v50, %v4078_v7  ;;  %v7168_v38 = vmov 0  ;;  %vm7187_vm5 = vmand %vm5619_vm0, %vm5631_vm9 }
 0x32e   :  { %v7167_v25 = vsel %vm5723_vm6, 4294967295, %v7166_v25  ;;  %v7169_v38 = vsel %vm5728_vm7, 4294967295, %v7168_v38  ;;  %v666_v10 = vand.u32 15, %v378_v41  ;;  %v5733_v37 = vadd.s32 576, %v6646_v35 }
 0x32f   :  { %vm5740_vm8 = vcmp.ne.s32.totalorder %v663_v63, %v4085_v8  ;;  %v7170_v9 = vmov 0  ;;  %vm5745_vm6 = vcmp.ne.s32.totalorder %v664_v12, %v4085_v8  ;;  %v7172_v59 = vmov 0 }
 0x330   :  { %v7171_v9 = vsel %vm5740_vm8, 4294967295, %v7170_v9  ;;  %v7173_v59 = vsel %vm5745_vm6, 4294967295, %v7172_v59  ;;  %vm5750_vm7 = vcmp.eq.s32.totalorder %v455_v0, %v4078_v7  ;;  %v7174_v41 = vmov 0  ;;  %vm7177_vm8 = vmand %vm5604_vm12, %vm5614_vm1 }
 0x331   :  { %v7175_v41 = vsel %vm5750_vm7, 4294967295, %v7174_v41  ;;  %v362_v50 = vadd.s32 584, %v6646_v35  ;;  %vm5765_vm3 = vmpackc.low %vm7177_vm8, %vm7176_vm2  ;;  %v7178_v63 = vmov 0  ;;  %vm7180_vm7 = vnez %v7145_v60 }
 0x332   :  { %v7179_v63 = vsel %vm5765_vm3, 4294967295, %v7178_v63  ;;  %vm5774_vm13 = vcmp.eq.s32.totalorder %v456_v6, %v4078_v7  ;;  %v7181_v0 = vmov 0  ;;  %vm5779_vm4 = vcmp.ne.s32.totalorder %v647_v58, %v4085_v8  ;;  %vm7188_vm1 = vmand %vm5626_vm11, %vm5636_vm15 }
 0x333   :  { %v7182_v0 = vsel %vm5774_vm13, 4294967295, %v7181_v0  ;;  %v7183_v11 = vmov 0  ;;  %vm5784_vm12 = vcmp.ne.s32.totalorder %v648_v43, %v4085_v8  ;;  %v7185_v27 = vmov 0  ;;  %vm5799_vm2 = vmpackc.low %vm7188_vm1, %vm7187_vm5 }
 0x334   :  { %v7184_v11 = vsel %vm5779_vm4, 4294967295, %v7183_v11  ;;  %v7186_v27 = vsel %vm5784_vm12, 4294967295, %v7185_v27  ;;  %v379_v53 = vadd.s32 720, %v6646_v35  ;;  %v7189_v58 = vmov 0 }
 0x335   :  { %v7190_v58 = vsel %vm5799_vm2, 4294967295, %v7189_v58  ;;  %vm7191_vm8 = vnez %v7155_v36  ;;  %vm7192_vm6 = vnez %v7151_v4  ;;  %vm5808_vm13 = vcmp.eq.s32.totalorder %v473_v24, %v4078_v7 }
 0x336   :  { %v7193_v43 = vmov 0  ;;  %vm5813_vm0 = vcmp.eq.s32.totalorder %v474_v17, %v4078_v7  ;;  %v7195_v19 = vmov 0  ;;  %vm5818_vm11 = vcmp.ne.s32.totalorder %v665_v31, %v4085_v8 }
 0x337   :  { %v7194_v43 = vsel %vm5808_vm13, 4294967295, %v7193_v43  ;;  %v7196_v19 = vsel %vm5813_vm0, 4294967295, %v7195_v19  ;;  %v7197_v32 = vmov 0  ;;  %v380_v28 = vadd.s32 728, %v6646_v35  ;;  %vm7207_vm13 = vmand %vm7180_vm7, %vm5658_vm14 }
 0x338   :  { %v7198_v32 = vsel %vm5818_vm11, 4294967295, %v7197_v32  ;;  %vm7199_vm9 = vnez %v7157_v56  ;;  %vm7200_vm15 = vnez %v7153_v29  ;;  %vm5830_vm1 = vcmp.ne.s32.totalorder %v666_v10, %v4085_v8  ;;  %vm7212_vm14 = vmand %vm7192_vm6, %vm7191_vm8 }
 0x339   :  { %v7201_v17 = vmov 0  ;;  %v457_v31 = vshra.s32 %v5733_v37, 4  ;;  %vm7203_vm3 = vnez %v7159_v20  ;;  %v649_v42 = vand.u32 15, %v5733_v37 }
 0x33a   :  { %v7202_v17 = vsel %vm5830_vm1, 4294967295, %v7201_v17  ;;  %vm7204_vm5 = vnez %v7143_v3  ;;  %vm7205_vm0 = vnez %v7147_v34  ;;  %vm7210_vm11 = vnez %v7165_v1 }
 0x33b   :  { %vm7206_vm1 = vmand %vm7204_vm5, %vm7205_vm0  ;;  %vm7211_vm12 = vnez %v7161_v2  ;;  %v7214_v3 = vmov 0  ;;  %vm7216_vm0 = vnez %v7171_v9  ;;  %vm7217_vm5 = vnez %v7167_v25 }
 0x33c   :  { %vm5854_vm2 = vmpackc.low %vm7207_vm13, %vm7206_vm1  ;;  %vm7218_vm6 = vnez %v7173_v59  ;;  %vm7219_vm8 = vnez %v7169_v38  ;;  %v668_v60 = vand.u32 15, %v380_v28  ;;  %v363_v34 = vadd.s32 592, %v6646_v35 }
 0x33d   :  { %vm7213_vm13 = vmand %vm7200_vm15, %vm7199_vm9  ;;  %vm7220_vm9 = vnez %v7175_v41  ;;  %v364_v29 = vadd.s32 600, %v6646_v35  ;;  %v5893_v36 = vadd.s32 736, %v6646_v35  ;;  %vm7226_vm15 = vnez %v7186_v27  ;;  %v7330_v27 = vld [vmem:[#allocation8_spill] sm:$0xff] }
 0x33e   :  { %vm5874_vm7 = vmpackc.low %vm7213_vm13, %vm7212_vm14  ;;  %vm5914_vm4 = vcmp.eq.s32.totalorder %v457_v31, %v4078_v7  ;;  %v7230_v56 = vmov 0  ;;  %v7234_v2 = vmov 0  ;;  %v7240_v37 = vmov 0 }
 0x33f   :  { %v7215_v3 = vsel %vm5874_vm7, 4294967295, %v7214_v3  ;;  %vm7221_vm14 = vmmov %vm5705_vm10  ;;  %vm7227_vm7 = vnez %v7182_v0  ;;  %v7246_v31 = vmov 0  ;;  %v477_v38 = vshra.s32 %v5893_v36, 4 }
 0x340   :  { %vm7222_vm13 = vmand %vm7203_vm3, %vm7221_vm14  ;;  %vm7237_vm14 = vnez %v7194_v43  ;;  %v7261_v41 = vmov 0 }
 0x341   :  { %vm7223_vm10 = vmand %vm7211_vm12, %vm7210_vm11  ;;  %vm7236_vm11 = vnez %v7198_v32 }
 0x342   :  { %vm5905_vm1 = vmpackc.low %vm7223_vm10, %vm7222_vm13  ;;  %vm5924_vm10 = vcmp.ne.s32.totalorder %v649_v42, %v4085_v8  ;;  %v7238_v42 = vmov 0  ;;  %vm7244_vm13 = vnez %v7202_v17  ;;  %v366_v17 = vadd.s32 616, %v6646_v35 }
 0x39e   :  { %v1960_v62 = vpop.f32.mrb[24].mxu1 }
 0x39f   :  { %v2085_v23 = vmul.f32 %v1960_v62, %v5523_v49  ;;  %v1962_v24 = vpop.f32.mrb[25].mxu1 }
 0x3a0   :  { %v2013_v12 = vpop.f32.mrb[28].mxu0  ;;  %v2086_v47 = vmul.f32 %v1962_v24, %v5529_v39  ;;  %v1964_v62 = vpop.f32.mrb[26].mxu1  ;;  %v650_v39 = vand.u32 15, %v362_v50 }
 0x3a1   :  { %v2087_v6 = vmul.f32 %v2013_v12, %v5526_v26  ;;  %v2015_v61 = vpop.f32.mrb[29].mxu0  ;;  %v458_v12 = vshra.s32 %v362_v50, 4  ;;  %v2091_v10 = vmul.f32 %v1964_v62, %v5544_v16  ;;  %v1966_v33 = vpop.f32.mrb[27].mxu1  ;;  %v7242_v50 = vmov 0 }
 0x3a2   :  { %v2088_v49 = vmul.f32 %v2015_v61, %v5534_v46  ;;  %v2017_v26 = vpop.f32.mrb[30].mxu0  ;;  %v7208_v61 = vmov 0  ;;  %v475_v46 = vshra.s32 %v379_v53, 4  ;;  %vm5929_vm12 = vcmp.ne.s32.totalorder %v650_v39, %v4085_v8 }
 0x3a3   :  { %v2093_v52 = vmul.f32 %v2017_v26, %v5538_v18  ;;  %v2019_v57 = vpop.f32.mrb[31].mxu0  ;;  %v7209_v61 = vsel %vm5854_vm2, 4294967295, %v7208_v61  ;;  %v2092_v18 = vmul.f32 %v1966_v33, %v5548_v45  ;;  %v667_v33 = vand.u32 15, %v379_v53 }
 0x3a4   :  { %v2094_v16 = vmul.f32 %v2019_v57, %v5552_v55  ;;  %v476_v57 = vshra.s32 %v380_v28, 4  ;;  %v2109_v45 = vpack.c.bf16 %v2091_v10, %v2085_v23  ;;  %vm5919_vm3 = vcmp.eq.s32.totalorder %v458_v12, %v4078_v7 }
 0x3a5   :  { %v2111_v55 = vpack.c.bf16 %v2093_v52, %v2087_v6  ;;  %v2110_v51 = vpack.c.bf16 %v2092_v18, %v2086_v47  ;;  %v7224_v47 = vmov 0  ;;  %v7228_v52 = vmov 0 }
 0x3a6   :  { %v2112_v4 = vpack.c.bf16 %v2094_v16, %v2088_v49  ;;  %v7225_v47 = vsel %vm5905_vm1, 4294967295, %v7224_v47  ;;  %v7229_v52 = vsel %vm5914_vm4, 4294967295, %v7228_v52  ;;  %v7231_v56 = vsel %vm5919_vm3, 4294967295, %v7230_v56 }
 0x3a7   :  { %v7235_v2 = vsel %vm5929_vm12, 4294967295, %v7234_v2  ;;  %2201 = vmatprep.mubr.bf16.mxu0 %v2110_v51  ;;  %vm5938_vm2 = vcmp.eq.s32.totalorder %v475_v46, %v4078_v7  ;;  %vm5943_vm1 = vcmp.eq.s32.totalorder %v476_v57, %v4078_v7  ;;  %vm5948_vm3 = vcmp.ne.s32.totalorder %v667_v33, %v4085_v8  ;;  %v7279_v33 = vld [vmem:[#allocation24_spill] sm:$0xff]  ;;  %v7284_v51 = vld [vmem:[#allocation9_spill] sm:$0xff] }
 0x3a8   :  { %2250 = vmatprep.mubr.bf16.mxu1 %v2112_v4  ;;  %v7239_v42 = vsel %vm5938_vm2, 4294967295, %v7238_v42  ;;  %v7241_v37 = vsel %vm5943_vm1, 4294967295, %v7240_v37  ;;  %v7243_v50 = vsel %vm5948_vm3, 4294967295, %v7242_v50  ;;  %v5953_v53 = vadd.s32 744, %v6646_v35  ;;  %2202 = vmatmul.mubr.bf16.vlgmr.msra.gmra.mrb[36].mxu0 %v2109_v45  ;;  %vm7249_vm2 = vmand %vm7217_vm5, %vm7216_vm0  ;;  %v7332_v46 = vld [vmem:[#allocation28_spill] sm:$0xff] }
 0x3a9   :  { %2251 = vmatmul.mubr.bf16.vlgmr.msra.gmra.mrb[40].mxu1 %v2111_v55  ;;  %vm7245_vm1 = vnez %v7196_v19  ;;  %vm5962_vm12 = vcmp.ne.s32.totalorder %v668_v60, %v4085_v8  ;;  %v459_v49 = vshra.s32 %v363_v34, 4  ;;  %vm7248_vm3 = vnez %v7179_v63 }
 0x3aa   :  { %v7247_v31 = vsel %vm5962_vm12, 4294967295, %v7246_v31  ;;  %3069 = vmatpush3.bf16.msk.msra.mxu0 %vm7248_vm3, %v6854_v5  ;;  %vm7250_vm12 = vmand %vm7219_vm8, %vm7218_vm6  ;;  %v651_v12 = vand.u32 15, %v363_v34  ;;  %vm7253_vm0 = vnez %v7190_v58  ;;  %vm7254_vm5 = vnez %v7184_v11 }
 0x3ab   :  { %vm5981_vm4 = vmpackc.low %vm7250_vm12, %vm7249_vm2  ;;  %3070 = vmatprep.subr.msk.bf16.mxu0 %vm7253_vm0, %v6854_v5  ;;  %v478_v0 = vshra.s32 %v5953_v53, 4  ;;  %vm7263_vm3 = vnez %v7229_v52  ;;  %v365_v58 = vadd.s32 608, %v6646_v35  ;;  %v670_v18 = vand.u32 15, %v5953_v53 }
 0x3ac   :  { %vm7255_vm2 = vmand %vm7220_vm9, %vm7254_vm5  ;;  %vm6041_vm5 = vcmp.ne.s32.totalorder %v651_v12, %v4085_v8  ;;  %v383_v16 = vadd.s32 752, %v6646_v35  ;;  %v1795_v45 = vadd.f32 %v7279_v33, %v5520_v14  ;;  %v7282_v60 = vmov 0 }
 0x3ad   :  { %vm7256_vm6 = vmand %vm7227_vm7, %vm7226_vm15  ;;  %v384_v34 = vadd.s32 760, %v6646_v35  ;;  %vm6087_vm12 = vcmp.eq.s32.totalorder %v478_v0, %v4078_v7 }
 0x3ae   :  { %vm6000_vm8 = vmpackc.low %vm7256_vm6, %vm7255_vm2  ;;  %vm7271_vm2 = vnez %v7215_v3  ;;  %vm7272_vm6 = vnez %v7243_v50  ;;  %v7278_v3 = vld [vmem:[#allocation23_spill] sm:$0xff] }
 0x3af   :  { %vm7259_vm9 = vmand %vm7237_vm14, %vm7236_vm11  ;;  %vm6028_vm11 = vcmp.eq.s32.totalorder %v459_v49, %v4078_v7  ;;  %vm7267_vm14 = vnez %v7235_v2  ;;  %v1793_v57 = vadd.f32 %v7278_v3, %v5520_v14  ;;  %v7285_v14 = vmov 0 }
 0x3b0   :  { %vm7260_vm7 = vmand %vm7245_vm1, %vm7244_vm13  ;;  %vm7266_vm1 = vnez %v7209_v61  ;;  %vm7268_vm13 = vnez %v7231_v56  ;;  %v7286_v14 = vsel %vm6087_vm12, 4294967295, %v7285_v14  ;;  %v480_v20 = vshra.s32 %v384_v34, 4 }
 0x3b1   :  { %vm6017_vm15 = vmpackc.low %vm7260_vm7, %vm7259_vm9  ;;  %3071 = vmatpush3.bf16.msk.msra.mxu0 %vm7266_vm1, %v6854_v5  ;;  %vm7273_vm9 = vnez %v7239_v42  ;;  %vm7281_vm7 = vnez %v7241_v37  ;;  %v672_v2 = vand.u32 15, %v384_v34  ;;  %v7304_v42 = vmov 0 }
 0x3b2   :  { %v1970_v13 = vpop.f32.mrb[28].mxu1  ;;  %v7262_v41 = vsel %vm6017_vm15, 4294967295, %v7261_v41  ;;  %3072 = vmatprep.subr.msk.bf16.mxu0 %vm7271_vm2, %v6854_v5  ;;  %vm6074_vm15 = vcmp.eq.s32.totalorder %v477_v38, %v4078_v7  ;;  %vm7292_vm2 = vmand %vm7268_vm13, %vm7267_vm14 }
 0x3b3   :  { %v2097_v28 = vmul.f32 %v1970_v13, %v5560_v40  ;;  %v1972_v6 = vpop.f32.mrb[29].mxu1  ;;  %v7283_v60 = vsel %vm6074_vm15, 4294967295, %v7282_v60  ;;  %v653_v13 = vand.u32 15, %v365_v58  ;;  %vm7288_vm15 = vnez %v7225_v47  ;;  %vm7302_vm13 = vmand %vm6028_vm11, %vm6041_vm5 }
 0x3b4   :  { %v2023_v1 = vpop.f32.mrb[32].mxu0  ;;  %v2098_v62 = vmul.f32 %v1972_v6, %v5569_v15  ;;  %v462_v6 = vshra.s32 %v366_v17, 4  ;;  %v367_v15 = vadd.s32 624, %v6646_v35  ;;  %vm7312_vm5 = vnez %v7283_v60 }
 0x3b5   :  { %v2099_v23 = vmul.f32 %v2023_v1, %v5556_v48  ;;  %v2025_v24 = vpop.f32.mrb[33].mxu0  ;;  %v1974_v48 = vpop.f32.mrb[30].mxu1  ;;  %v7287_v1 = vld [vmem:[#allocation10_spill] sm:$0xff]  ;;  %3073 = vmatpush3.bf16.msk.msra.mxu0 %vm7288_vm15, %v6854_v5  ;;  %vm7291_vm15 = vmand %vm7263_vm3, %vm5924_vm10  ;;  %vm7298_vm10 = vnez %v7247_v31  ;;  %v368_v31 = vadd.s32 632, %v6646_v35 }
 0x3b6   :  { %v2100_v40 = vmul.f32 %v2025_v24, %v5565_v30  ;;  %v2027_v26 = vpop.f32.mrb[34].mxu0  ;;  %v460_v30 = vshra.s32 %v364_v29, 4  ;;  %v2103_v63 = vmul.f32 %v1974_v48, %v5573_v22  ;;  %v1976_v39 = vpop.f32.mrb[31].mxu1  ;;  %v7257_v22 = vmov 0  ;;  %3074 = vmatprep.subr.msk.bf16.mxu0 %vm5981_vm4, %v6854_v5  ;;  %vm6119_vm12 = vmpackc.low %vm7292_vm2, %vm7291_vm15 }
 0x3b7   :  { %v2105_v10 = vmul.f32 %v2027_v26, %v5578_v54  ;;  %v2029_v25 = vpop.f32.mrb[35].mxu0  ;;  %v7258_v22 = vsel %vm6000_vm8, 4294967295, %v7257_v22  ;;  %v652_v54 = vand.u32 15, %v364_v29  ;;  %v2104_v9 = vmul.f32 %v1976_v39, %v5583_v44  ;;  %vm7297_vm4 = vmand %vm7273_vm9, %vm7272_vm6  ;;  %v7317_v39 = vld [vmem:[#allocation29_spill] sm:$0xff] }
 0x3b8   :  { %v2106_v59 = vmul.f32 %v2029_v25, %v5588_v21  ;;  %v669_v44 = vand.u32 15, %v5893_v36  ;;  %v2115_v11 = vpack.c.bf16 %v2103_v63, %v2097_v28  ;;  %vm6054_vm1 = vcmp.eq.s32.totalorder %v460_v30, %v4078_v7  ;;  %vm7299_vm3 = vmand %vm7281_vm7, %vm7298_vm10  ;;  %v7318_v25 = vld [vmem:[#allocation25_spill] sm:$0xff] }
 0x3b9   :  { %v2117_v21 = vpack.c.bf16 %v2105_v10, %v2099_v23  ;;  %v2116_v43 = vpack.c.bf16 %v2104_v9, %v2098_v62  ;;  %vm6059_vm0 = vcmp.ne.s32.totalorder %v652_v54, %v4085_v8  ;;  %v461_v36 = vshra.s32 %v365_v58, 4  ;;  %vm6138_vm14 = vmpackc.low %vm7299_vm3, %vm7297_vm4  ;;  %v7331_v58 = vld [vmem:[#allocation27_spill] sm:$0xff] }
 0x3ba   :  { %v2118_v19 = vpack.c.bf16 %v2106_v59, %v2100_v40  ;;  %vm6100_vm8 = vcmp.ne.s32.totalorder %v669_v44, %v4085_v8  ;;  %v7289_v23 = vmov 0  ;;  %v654_v24 = vand.u32 15, %v366_v17  ;;  %vm7303_vm6 = vmand %vm6054_vm1, %vm6059_vm0 }
 0x3bb   :  { %2209 = vmatprep.mubr.bf16.mxu0 %v2116_v43  ;;  %v7290_v23 = vsel %vm6100_vm8, 4294967295, %v7289_v23  ;;  %vm6124_vm8 = vcmp.ne.s32.totalorder %v670_v18, %v4085_v8  ;;  %v479_v48 = vshra.s32 %v383_v16, 4  ;;  %v671_v26 = vand.u32 15, %v383_v16  ;;  %vm6155_vm9 = vmpackc.low %vm7303_vm6, %vm7302_vm13 }
 0x3bc   :  { %2258 = vmatprep.mubr.bf16.mxu1 %v2118_v19  ;;  %2210 = vmatmul.mubr.bf16.gmra.mrb[40].mxu0 %v2115_v11  ;;  %v7305_v42 = vsel %vm6155_vm9, 4294967295, %v7304_v42  ;;  %vm6160_vm7 = vcmp.eq.s32.totalorder %v461_v36, %v4078_v7  ;;  %vm6165_vm2 = vcmp.ne.s32.totalorder %v653_v13, %v4085_v8  ;;  %vm7310_vm11 = vnez %v7258_v22  ;;  %v7319_v22 = vld [vmem:[#allocation26_spill] sm:$0xff]  ;;  %v6311_v36 = vld [vmem:[%s6448_s8 + $0x10] sm:$0xff] }
 0x3bd   :  { %2259 = vmatmul.mubr.bf16.gmra.mrb[44].mxu1 %v2117_v21  ;;  %3075 = vmatpush3.bf16.msk.msra.mxu0 %vm7310_vm11, %v6854_v5  ;;  %vm7311_vm0 = vnez %v7290_v23  ;;  %vm6178_vm15 = vcmp.eq.s32.totalorder %v462_v6, %v4078_v7  ;;  %vm6183_vm4 = vcmp.ne.s32.totalorder %v654_v24, %v4085_v8  ;;  %v1799_v54 = vadd.f32 %v7318_v25, %v7317_v39  ;;  %v968_v13 = vld [vmem:[%s6455_s2] sm:$0xff]  ;;  %v971_v6 = vld [vmem:[%s6455_s2 + $0x18] sm:$0xff]  ;;  %v973_v24 = vld [vmem:[%s6455_s2 + $0x28] sm:$0xff] }
 0x3be   :  { %v1801_v38 = vadd.f32 %v7319_v22, %v7317_v39  ;;  %vm7320_vm10 = vnez %v7262_v41  ;;  %vm7321_vm3 = vnez %v7286_v14  ;;  %vm6199_vm6 = vcmp.eq.s32.totalorder %v479_v48, %v4078_v7  ;;  %v6305_v14 = vld [vmem:[%s6448_s8 + $0x18] sm:$0xff]  ;;  %v972_v23 = vld [vmem:[%s6455_s2 + $0x20] sm:$0xff] }
 0x3bf   :  { %3076 = vmatprep.subr.msk.bf16.mxu0 %vm7320_vm10, %v6854_v5  ;;  %v7322_v9 = vmov 0  ;;  %vm6204_vm11 = vcmp.ne.s32.totalorder %v671_v26, %v4085_v8  ;;  %v7324_v59 = vmov 0  ;;  %vm6213_vm1 = vcmp.eq.s32.totalorder %v480_v20, %v4078_v7  ;;  %vm7334_vm9 = vmand %vm7321_vm3, %vm6124_vm8 }
 0x3c0   :  { %v7323_v9 = vsel %vm6199_vm6, 4294967295, %v7322_v9  ;;  %v7325_v59 = vsel %vm6204_vm11, 4294967295, %v7324_v59  ;;  %vm6218_vm13 = vcmp.ne.s32.totalorder %v672_v2, %v4085_v8  ;;  %v463_v11 = vshra.s32 %v367_v15, 4 }
 0x3c1   :  { %v655_v21 = vand.u32 15, %v367_v15  ;;  %v1803_v43 = vadd.f32 %v7331_v58, %v7330_v27  ;;  %v464_v17 = vshra.s32 %v368_v31, 4  ;;  %v656_v61 = vand.u32 15, %v368_v31  ;;  %3077 = vmatpush3.bf16.msk.msra.mxu0 %vm6119_vm12, %v6854_v5  ;;  %vm864_vm10 = vmand %vm6213_vm1, %vm6218_vm13 }
 0x3c2   :  { %v1805_v18 = vadd.f32 %v7332_v46, %v7330_v27  ;;  %3078 = vmatprep.subr.msk.bf16.mxu0 %vm6138_vm14, %v6854_v5  ;;  %vm7333_vm12 = vmand %vm7312_vm5, %vm7311_vm0  ;;  %vm6255_vm6 = vcmp.eq.s32.totalorder %v463_v11, %v4078_v7  ;;  %vm7339_vm3 = vnez %v7305_v42  ;;  %vm7340_vm13 = vnez %v7323_v9 }
 0x3c3   :  { %vm2972_vm11 = vmpackc.low %vm7334_vm9, %vm7333_vm12  ;;  %vm751_vm14 = vcmp.ne.s32.totalorder %v655_v21, %v4085_v8  ;;  %vm560_vm9 = vcmp.eq.s32.totalorder %v464_v17, %v4078_v7  ;;  %vm752_vm5 = vcmp.ne.s32.totalorder %v656_v61, %v4085_v8  ;;  %vm7341_vm12 = vnez %v7325_v59  ;;  %v2316_v8 = vld [vmem:[%s6454_s6] sm:$0xff] }
 0x3c4   :  { %vm7337_vm1 = vmand %vm6160_vm7, %vm6165_vm2 }
 0x3c5   :  { %vm7338_vm0 = vmand %vm6178_vm15, %vm6183_vm4  ;;  %3079 = vmatpush3.bf16.msk.msra.mxu0 %vm7339_vm3, %v6854_v5 }
 0x3c6   :  { %v2066_v55 = vpop.f32.mrb[32].mxu1  ;;  %vm2956_vm8 = vmpackc.low %vm7338_vm0, %vm7337_vm1  ;;  %3080 = vmatprep.subr.msk.bf16.mxu0 %vm2972_vm11, %v6854_v5 }
 0x3c7   :  { %v6080_v4 = vmul.f32 %v2066_v55, %v7284_v51  ;;  %v2068_v29 = vpop.f32.mrb[33].mxu1  ;;  %vm7342_vm7 = vmand %vm7340_vm13, %vm7341_vm12  ;;  %v3423_v51 = vmov 3  }
 0x3c8   :  { %v2090_v53 = vmul.f32 %v2068_v29, %v7287_v1  ;;  %v2070_v28 = vpop.f32.mrb[34].mxu1  ;;  %vm2974_vm2 = vmpackc.low %vm864_vm10, %vm7342_vm7  ;;  %vm7343_vm10 = vcmask 261120   ;;  %3249 = vset.pattern.permute.xlu0 %v3423_v51  ;;  %3250 = vset.pattern.permute.xlu1 %v3423_v51  ;;  %v6299_v29 = vld [vmem:[%s6448_s8 + $0x8] sm:$0xff]  ;;  %v2319_v51 = vld [vmem:[%s6454_s6 + $0x18] sm:$0xff] }
 0x3c9   :  { %v6104_v49 = vmul.f32 %v2070_v28, %v1793_v57  ;;  %v2072_v62 = vpop.f32.mrb[35].mxu1  ;;  %vm847_vm15 = vmand %vm6255_vm6, %vm751_vm14  ;;  %3081 = vmatpush3.bf16.msk.msra.mxu0 %vm2956_vm8, %v6854_v5  ;;  %3150 = vmatprep.mubr.msk.f32.mxu1 %vm7343_vm10, %v2316_v8  ;;  %v969_v1 = vld [vmem:[%s6455_s2 + $0x8] sm:$0xff]  ;;  %v970_v28 = vld [vmem:[%s6455_s2 + $0x10] sm:$0xff]  ;;  %vm7350_vm8 = vcmask 130048  }
 0x3ca   :  { %v2096_v52 = vmul.f32 %v2072_v62, %v1795_v45  ;;  %vm848_vm4 = vmand %vm560_vm9, %vm752_vm5  ;;  %3082 = vmatprep.subr.msk.bf16.mxu0 %vm2974_vm2, %v6854_v5  ;;  %2325 = vperm.xlu1 %3250, %v6299_v29   ;;  %v7345_v8 = vld [vmem:[#allocation3_spill] sm:$0xff] }
 0x3cb   :  { %v2113_v30 = vpack.c.bf16 %v6104_v49, %v6080_v4  ;;  %vm2958_vm1 = vmpackc.low %vm848_vm4, %vm847_vm15  ;;  %v6293_v4 = vld [vmem:[%s6448_s8] sm:$0xff]  ;;  %vm7346_vm6 = vnez %v7345_v8 }
 0x3cc   :  { %v2114_v12 = vpack.c.bf16 %v2096_v52, %v2090_v53  ;;  %2321 = vperm.xlu0 %3249, %v6293_v4   ;;  %v7344_v53 = vmov 0   ;;  %vm7347_vm11 = vmmov %vm7343_vm10 }
 0x3cd   :  { %3083 = vmatpush3.bf16.msk.msra.mxu0 %vm2958_vm1, %v6854_v5  ;;  %vm7348_vm14 = vmmov %vm7343_vm10 }
 0x3ce   :  { %2299 = vmatprep.mubr.bf16.mxu0 %v2114_v12  ;;  %2329 = vperm.xlu1 %3250, %v6311_v36   ;;  %vm7349_vm0 = vmmov %vm7343_vm10 }
 0x3cf   :  { %v2076_v0 = vpop.f32.mrb[36].mxu1  ;;  %vm7351_vm9 = vmmov %vm7350_vm8 }
 0x3d0   :  { %v2101_v19 = vmul.f32 %v2076_v0, %v1799_v54  ;;  %v2078_v32 = vpop.f32.mrb[37].mxu1  ;;  %2300 = vmatmul.mubr.bf16.vlgmr.msra.gmra.mrb[44].mxu0 %v2113_v30  ;;  %2333 = vperm.xlu0 %3249, %v6305_v14   ;;  %vm7352_vm5 = vmmov %vm7350_vm8 }
 0x3d1   :  { %v2102_v16 = vmul.f32 %v2078_v32, %v1801_v38  ;;  %v2080_v3 = vpop.f32.mrb[38].mxu1  ;;  %vm7353_vm3 = vmmov %vm7352_vm5 }
 0x3d2   :  { %v2107_v57 = vmul.f32 %v2080_v3, %v1803_v43  ;;  %v2082_v33 = vpop.f32.mrb[39].mxu1  ;;  %3251 = vset.pattern.permute.xlu1 %v7344_v53 }
 0x3d3   :  { %v2108_v45 = vmul.f32 %v2082_v33, %v1805_v18  ;;  %976 = vperm.xlu1 %3251, %v968_v13   ;;  %v3415_v13 = vld [vmem:[%s6452_s1] sm:$0xff] }
 0x3d4   :  { %v2119_v34 = vpack.c.bf16 %v2107_v57, %v2101_v19  ;;  %3252 = vset.pattern.permute.xlu0 %v7344_v53  ;;  %v3417_v53 = vld [vmem:[%s6452_s1 + $0x10] sm:$0xff] }
 0x3d5   :  { %v2120_v60 = vpack.c.bf16 %v2108_v45, %v2102_v16  ;;  %979 = vperm.xlu0 %3252, %v969_v1   ;;  %v3416_v1 = vld [vmem:[%s6452_s1 + $0x8] sm:$0xff] }
 0x3d7   :  { %2307 = vmatprep.mubr.bf16.mxu0 %v2120_v60  ;;  %982 = vperm.xlu1 %3251, %v970_v28   ;;  %v2318_v60 = vld [vmem:[%s6454_s6 + $0x10] sm:$0xff]  ;;  %v3418_v28 = vld [vmem:[%s6452_s1 + $0x18] sm:$0xff] }
 0x3d8   :  { %2308 = vmatmul.mubr.bf16.gmra.mrb[48].mxu0 %v2119_v34  ;;  %v2317_v34 = vld [vmem:[%s6454_s6 + $0x8] sm:$0xff] }
 0x3d9   :  { %988 = vperm.xlu0 %3252, %v972_v23  }
 0x3db   :  { %985 = vperm.xlu1 %3251, %v971_v6  }
 0x3df   :  { %991 = vperm.xlu1 %3251, %v973_v24  }
 0x449   :  { %v2326_v6 = vpop.permute.xlu1 %2325 }
 0x44b   :  { %v2322_v23 = vpop.permute.xlu0 %2321 }
 0x44f   :  { %v2334_v24 = vpop.permute.xlu0 %2333 }
 0x47b   :  { %v3028_v49 = vpop.f32.mrb[36].mxu0 }
 0x47c   :  { %v3056_v62 = vpop.f32.mrb[40].mxu1  ;;  %v3029_v47 = vpop.f32.mrb[37].mxu0 }
 0x47d   :  { %v3057_v40 = vpop.f32.mrb[41].mxu1  ;;  %v3030_v48 = vadd.f32 %v3029_v47, %v3028_v49  ;;  %v3031_v52 = vpop.f32.mrb[38].mxu0  ;;  %v974_v47 = vand.u32 3, %v4078_v7 }
 0x47e   :  { %v3058_v26 = vadd.f32 %v3057_v40, %v3056_v62  ;;  %v3059_v56 = vpop.f32.mrb[42].mxu1  ;;  %v3032_v20 = vpop.f32.mrb[39].mxu0  ;;  %v961_v62 = vshra.s32 %v4078_v7, 2 }
 0x47f   :  { %v3060_v2 = vpop.f32.mrb[43].mxu1  ;;  %v3033_v30 = vadd.f32 %v3032_v20, %v3031_v52  ;;  %v2330_v49 = vpop.permute.xlu1 %2329  ;;  %v7355_v52 = vld [vmem:[#allocation4_spill] sm:$0xff] }
 0x480   :  { %v2253_v15 = vadd.f32 %v3058_v26, %v3030_v48  ;;  %v3061_v42 = vadd.f32 %v3060_v2, %v3059_v56  ;;  %v980_v48 = vpop.permute.xlu0 %979  ;;  %v7354_v26 = vshra.s32 %v6646_v35, 4  ;;  %v7356_v56 = vshra.s32 %v7355_v52, 4  ;;  %v7357_v2 = vld [vmem:[#allocation2_spill] sm:$0xff] }
 0x481   :  { %vm994_vm2 = vcmp.eq.s32.totalorder %v980_v48, %v974_v47 }
 0x482   :  { %v2256_v37 = vadd.f32 %v3061_v42, %v3033_v30  ;;  %vm962_vm13 = vcmp.eq.s32.totalorder %v7354_v26, %v961_v62  ;;  %vm963_vm7 = vcmp.eq.s32.totalorder %v7356_v56, %v961_v62  ;;  %v7359_v30 = vld [vmem:[#allocation5_spill] sm:$0xff] }
 0x483   :  { %v977_v40 = vpop.permute.xlu1 %976  ;;  %vm1000_vm4 = vmand %vm963_vm7, %vm994_vm2  ;;  %v7360_v42 = vshra.s32 %v7359_v30, 4 }
 0x484   :  { %vm993_vm12 = vcmp.eq.s32.totalorder %v977_v40, %v974_v47  ;;  %v989_v7 = vpop.permute.xlu0 %988 }
 0x485   :  { %vm999_vm15 = vmand %vm962_vm13, %vm993_vm12 }
 0x486   :  { %vm3218_vm1 = vmpackc.low %vm1000_vm4, %vm999_vm15 }
 0x487   :  { %v983_v20 = vpop.permute.xlu1 %982 }
 0x48b   :  { %v986_v35 = vpop.permute.xlu1 %985 }
 0x48f   :  { %v3034_v50 = vpop.f32.mrb[40].mxu0 }
 0x490   :  { %v3062_v31 = vpop.f32.mrb[44].mxu1  ;;  %v3035_v12 = vpop.f32.mrb[41].mxu0 }
 0x491   :  { %v3063_v63 = vpop.f32.mrb[45].mxu1  ;;  %v3036_v10 = vadd.f32 %v3035_v12, %v3034_v50  ;;  %v3037_v25 = vpop.f32.mrb[42].mxu0 }
 0x492   :  { %v3064_v39 = vadd.f32 %v3063_v63, %v3062_v31  ;;  %v3065_v54 = vpop.f32.mrb[46].mxu1  ;;  %v3038_v22 = vpop.f32.mrb[43].mxu0  ;;  %v7363_v31 = vld [vmem:[#allocation7_spill] sm:$0xff] }
 0x493   :  { %v3066_v38 = vpop.f32.mrb[47].mxu1  ;;  %v3039_v59 = vadd.f32 %v3038_v22, %v3037_v25  ;;  %v7364_v12 = vshra.s32 %v7363_v31, 4  ;;  %v992_v63 = vpop.permute.xlu1 %991 }
 0x494   :  { %v2261_v9 = vadd.f32 %v3064_v39, %v3036_v10  ;;  %v3067_v0 = vadd.f32 %v3066_v38, %v3065_v54  ;;  %vm998_vm7 = vcmp.eq.s32.totalorder %v992_v63, %v974_v47 }
 0x495   :  { %vm967_vm13 = vcmp.eq.s32.totalorder %v7364_v12, %v961_v62 }
 0x496   :  { %v2264_v41 = vadd.f32 %v3067_v0, %v3039_v59  ;;  %vm1004_vm2 = vmand %vm967_vm13, %vm998_vm7 }
 0x4a3   :  { %v3084_v44 = vpop.f32.mrb[44].mxu0 }
 0x4a4   :  { %v3085_v11 = vpop.f32.mrb[45].mxu0 }
 0x4a5   :  { %v3086_v21 = vadd.f32 %v3085_v11, %v3084_v44  ;;  %v3087_v27 = vpop.f32.mrb[46].mxu0 }
 0x4a6   :  { %v3088_v58 = vpop.f32.mrb[47].mxu0 }
 0x4a7   :  { %v2302_v43 = vadd.f32 %v3086_v21, %v2253_v15  ;;  %v3089_v19 = vadd.f32 %v3088_v58, %v3087_v27  ;;  %v7358_v15 = vshra.s32 %v7357_v2, 4 }
 0x4a9   :  { %v2305_v32 = vadd.f32 %v3089_v19, %v2256_v37  ;;  %vm964_vm10 = vcmp.eq.s32.totalorder %v7358_v15, %v961_v62  ;;  %v7361_v37 = vld [vmem:[#allocation6_spill] sm:$0xff] }
 0x4aa   :  { %v7362_v50 = vshra.s32 %v7361_v37, 4 }
 0x4ab   :  { %v3090_v17 = vpop.f32.mrb[48].mxu0  ;;  %v3206_v61 = vpack.c.bf16 %v2305_v32, %v2302_v43 }
 0x4ac   :  { %v3091_v46 = vpop.f32.mrb[49].mxu0 }
 0x4ad   :  { %v3092_v18 = vadd.f32 %v3091_v46, %v3090_v17  ;;  %v3093_v16 = vpop.f32.mrb[50].mxu0  ;;  %3207 = vmatprep.subr.bf16.mxu1 %v3206_v61 }
 0x4ae   :  { %v3094_v3 = vpop.f32.mrb[51].mxu0  ;;  %3209 = vmatpush3.bf16.msra.mxu1 %v3206_v61 }
 0x4af   :  { %v2310_v57 = vadd.f32 %v3092_v18, %v2261_v9  ;;  %v3095_v33 = vadd.f32 %v3094_v3, %v3093_v16 }
 0x4b1   :  { %v2313_v45 = vadd.f32 %v3095_v33, %v2264_v41 }
 0x4b3   :  { %v3210_v55 = vpack.c.bf16 %v2313_v45, %v2310_v57 }
 0x4b5   :  { %3211 = vmatprep.subr.bf16.mxu1 %v3210_v55 }
 0x4b6   :  { %3213 = vmatpush3.bf16.msra.mxu1 %v3210_v55 }
 0x4b7   :  { %3215 = vmatprep.subr.msk.bf16.mxu1 %vm7346_vm6, %v6854_v5 }
 0x4b9   :  { %3151 = vmatmul.mubr.msk.f32.vlgmr.msra.gmra.mrb[48].mxu1 %vm7347_vm11, %v2317_v34  ;;  %vm965_vm11 = vcmp.eq.s32.totalorder %v7360_v42, %v961_v62 }
 0x4ba   :  { %3153 = vmatprep.mubr.msk.f32.mxu1 %vm7348_vm14, %v2318_v60  ;;  %3217 = vmatpush3.bf16.msk.msra.mxu1 %vm7346_vm6, %v6854_v5  ;;  %vm995_vm6 = vcmp.eq.s32.totalorder %v983_v20, %v974_v47 }
 0x4bb   :  { %3219 = vmatprep.subr.msk.bf16.mxu1 %vm3218_vm1, %v6854_v5  ;;  %vm1001_vm14 = vmand %vm964_vm10, %vm995_vm6 }
 0x4bd   :  { %3154 = vmatmul.mubr.msk.f32.gmra.mrb[50].mxu1 %vm7349_vm0, %v2319_v51  ;;  %vm996_vm0 = vcmp.eq.s32.totalorder %v986_v35, %v974_v47 }
 0x4be   :  { %3160 = vmatprep.mubr.msk.f32.mxu1 %vm7350_vm8, %v3415_v13  ;;  %vm966_vm8 = vcmp.eq.s32.totalorder %v7362_v50, %v961_v62 }
 0x4c1   :  { %3161 = vmatmul.mubr.msk.f32.vlgmr.msra.gmra.mrb[52].mxu1 %vm7351_vm9, %v3416_v1  ;;  %vm997_vm9 = vcmp.eq.s32.totalorder %v989_v7, %v974_v47 }
 0x4c2   :  { %3163 = vmatprep.mubr.msk.f32.mxu1 %vm7352_vm5, %v3417_v53  ;;  %3221 = vmatpush3.bf16.msk.msra.mxu1 %vm3218_vm1, %v6854_v5  ;;  %vm1002_vm5 = vmand %vm965_vm11, %vm996_vm0  ;;  %vm2594_vm11 = vcmask 392192  }
 0x4c3   :  { %vm1003_vm12 = vmand %vm966_vm8, %vm997_vm9 }
 0x4c4   :  { %vm3226_vm15 = vmpackc.low %vm1004_vm2, %vm1003_vm12 }
 0x4c5   :  { %3164 = vmatmul.mubr.msk.f32.gmra.mrb[54].mxu1 %vm7353_vm3, %v3418_v28  ;;  %vm3222_vm3 = vmpackc.low %vm1002_vm5, %vm1001_vm14  ;;  %vm7365_vm14 = vcmask 261120   ;;  %vm2809_vm5 = vcmask 97280  }
 0x4c6   :  { %3223 = vmatprep.subr.msk.bf16.mxu1 %vm3222_vm3, %v6854_v5  ;;  %vm7366_vm0 = vmmov %vm7365_vm14 }
 0x4c7   :  { %3225 = vmatpush3.bf16.msk.msra.mxu1 %vm3222_vm3, %v6854_v5  ;;  %vm7367_vm8 = vmmov %vm7366_vm0 }
 0x4c8   :  { %3227 = vmatprep.subr.msk.bf16.mxu1 %vm3226_vm15, %v6854_v5  ;;  %vm7368_vm9 = vmmov %vm7366_vm0 }
 0x4cb   :  { %3229 = vmatpush3.bf16.msk.msra.mxu1 %vm3226_vm15, %v6854_v5 }
 0x58c   :  { %v3152_v10 = vpop.f32.mrb[48].mxu1 }
 0x58d   :  { %v6388_v39 = vadd.f32 %v3152_v10, %v2326_v6  ;;  %v2414_v25 = vpop.f32.mrb[49].mxu1 }
 0x58e   :  { %v6390_v54 = vadd.f32 %v2414_v25, %v2322_v23 }
 0x58f   :  { %v2438_v22 = vand.u32 2147483647, %v6388_v39  ;;  %v2434_v62 = vmax.f32 %v6388_v39, 0.0 }
 0x590   :  { %v2437_v38 = vand.u32 2147483647, %v6390_v54  ;;  %v3155_v9 = vpop.f32.mrb[50].mxu1  ;;  %v2433_v15 = vmax.f32 %v6390_v54, 0.0 }
 0x591   :  { %v2442_v59 = vsub.f32 0.0, %v2438_v22  ;;  %v6394_v0 = vadd.f32 %v3155_v9, %v2334_v24  ;;  %v2424_v41 = vpop.f32.mrb[51].mxu1 }
 0x592   :  { %v2441_v44 = vsub.f32 0.0, %v2437_v38  ;;  %v6396_v11 = vadd.f32 %v2424_v41, %v2330_v49 }
 0x593   :  { %v2447_v21 = vmul.f32 1.442695, %v2442_v59  ;;  %v2440_v5 = vand.u32 2147483647, %v6394_v0  ;;  %v2436_v31 = vmax.f32 %v6394_v0, 0.0 }
 0x594   :  { %v2445_v27 = vmul.f32 1.442695, %v2441_v44  ;;  %v2439_v58 = vand.u32 2147483647, %v6396_v11  ;;  %v6400_v43 = vpop.f32.mrb[52].mxu1  ;;  %v2435_v38 = vmax.f32 %v6396_v11, 0.0 }
 0x595   :  { %3391 = vpow2.f32 %v2447_v21  ;;  %v2444_v19 = vsub.f32 0.0, %v2440_v5  ;;  %v6402_v32 = vpop.f32.mrb[53].mxu1  ;;  %v2692_v11 = vld [vmem:[%s6456_s7] sm:$0xff] }
 0x596   :  { %3393 = vpow2.f32 %v2445_v27  ;;  %v2443_v17 = vsub.f32 0.0, %v2439_v58  ;;  %3192 = vmatprep.mubr.msk.f32.mxu0 %vm7365_vm14, %v2692_v11 }
 0x597   :  { %v2451_v61 = vmul.f32 1.442695, %v2444_v19 }
 0x598   :  { %v2449_v46 = vmul.f32 1.442695, %v2443_v17  ;;  %v6404_v18 = vpop.f32.mrb[54].mxu1 }
 0x599   :  { %3395 = vpow2.f32 %v2451_v61  ;;  %v6406_v16 = vpop.f32.mrb[55].mxu1 }
 0x59a   :  { %3397 = vpow2.f32 %v2449_v46 }
 0x59f   :  { %v3392_v3 = vpop.eup %3391 }
 0x5a0   :  { %v3394_v57 = vpop.eup %3393  ;;  %v2462_v33 = vadd.f32 1.0, %v3392_v3  ;;  %v2465_v8 = vmul.f32 -0.5, %v3392_v3  ;;  %v2468_v53 = vand.u32 2147483647, %v3392_v3 }
 0x5a1   :  { %v2453_v45 = vadd.f32 1.0, %v3394_v57  ;;  %v2456_v13 = vmul.f32 -0.5, %v3394_v57  ;;  %v2459_v24 = vand.u32 2147483647, %v3394_v57 }
 0x5a2   :  { %3399 = vlog2.f32 %v2462_v33  ;;  %v2466_v1 = vadd.f32 1.0, %v2465_v8  ;;  %vm2469_vm4 = vcmp.lt.f32.partialorder %v2468_v53, 0.0004427343 }
 0x5a3   :  { %v3396_v55 = vpop.eup %3395  ;;  %3401 = vlog2.f32 %v2453_v45  ;;  %v2457_v23 = vadd.f32 1.0, %v2456_v13  ;;  %vm2460_vm1 = vcmp.lt.f32.partialorder %v2459_v24, 0.0004427343 }
 0x5a4   :  { %v3398_v34 = vpop.eup %3397  ;;  %v2480_v60 = vadd.f32 1.0, %v3396_v55  ;;  %v2483_v28 = vmul.f32 -0.5, %v3396_v55  ;;  %v2467_v48 = vmul.f32 %v3392_v3, %v2466_v1  ;;  %v2486_v20 = vand.u32 2147483647, %v3396_v55 }
 0x5a5   :  { %v2471_v51 = vadd.f32 1.0, %v3398_v34  ;;  %v2474_v6 = vmul.f32 -0.5, %v3398_v34  ;;  %v2458_v56 = vmul.f32 %v3394_v57, %v2457_v23  ;;  %v2477_v30 = vand.u32 2147483647, %v3398_v34 }
 0x5a6   :  { %3403 = vlog2.f32 %v2480_v60  ;;  %v2484_v26 = vadd.f32 1.0, %v2483_v28  ;;  %vm2487_vm10 = vcmp.lt.f32.partialorder %v2486_v20, 0.0004427343 }
 0x5a7   :  { %3405 = vlog2.f32 %v2471_v51  ;;  %v2475_v2 = vadd.f32 1.0, %v2474_v6  ;;  %vm2478_vm6 = vcmp.lt.f32.partialorder %v2477_v30, 0.0004427343 }
 0x5a8   :  { %v2485_v10 = vmul.f32 %v3396_v55, %v2484_v26 }
 0x5a9   :  { %v2476_v22 = vmul.f32 %v3398_v34, %v2475_v2 }
 0x5ac   :  { %v3400_v49 = vpop.eup %3399 }
 0x5ad   :  { %v3402_v47 = vpop.eup %3401  ;;  %v2464_v40 = vmul.f32 0.6931472, %v3400_v49 }
 0x5ae   :  { %v2455_v52 = vmul.f32 0.6931472, %v3402_v47 }
 0x5af   :  { %v2470_v7 = vsel %vm2469_vm4, %v2467_v48, %v2464_v40 }
 0x5b0   :  { %v3404_v42 = vpop.eup %3403  ;;  %v2490_v35 = vadd.f32 %v2470_v7, %v2434_v62  ;;  %v2461_v37 = vsel %vm2460_vm1, %v2458_v56, %v2455_v52 }
 0x5b1   :  { %v3406_v50 = vpop.eup %3405  ;;  %v2489_v12 = vadd.f32 %v2461_v37, %v2433_v15  ;;  %v2482_v63 = vmul.f32 0.6931472, %v3404_v42 }
 0x5b2   :  { %v2981_v39 = vadd.f32 -0.6931472, %v2490_v35  ;;  %v2473_v25 = vmul.f32 0.6931472, %v3406_v50 }
 0x5b3   :  { %v2980_v9 = vadd.f32 -0.6931472, %v2489_v12  ;;  %v2488_v54 = vsel %vm2487_vm10, %v2485_v10, %v2482_v63 }
 0x5b4   :  { %v2581_v59 = vadd.f32 %v6400_v43, %v2981_v39  ;;  %v2492_v41 = vadd.f32 %v2488_v54, %v2436_v31  ;;  %v2479_v44 = vsel %vm2478_vm6, %v2476_v22, %v2473_v25  ;;  %v3424_v43 = vmov 4  }
 0x5b5   :  { %v2576_v21 = vadd.f32 %v2980_v9, %v6402_v32  ;;  %v2491_v0 = vadd.f32 %v2479_v44, %v2435_v38  ;;  %3253 = vset.pattern.permute.xlu0 %v3424_v43  ;;  %3254 = vset.pattern.permute.xlu1 %v3424_v43 }
 0x5b6   :  { %v2983_v5 = vadd.f32 -0.6931472, %v2492_v41  ;;  %2697 = vperm.xlu0 %3253, %v6293_v4   ;;  %2701 = vperm.xlu1 %3254, %v6299_v29   ;;  %v2693_v4 = vld [vmem:[%s6456_s7 + $0x8] sm:$0xff]  ;;  %v2694_v29 = vld [vmem:[%s6456_s7 + $0x10] sm:$0xff] }
 0x5b7   :  { %3178 = vmatprep.mubr.msk.f32.mxu1 %vm2594_vm11, %v2576_v21  ;;  %v2982_v27 = vadd.f32 -0.6931472, %v2491_v0 }
 0x5b8   :  { %v2591_v58 = vadd.f32 %v6404_v18, %v2983_v5  ;;  %3179 = vmatmul.mubr.msk.f32.vlgmr.msra.gmra.mrb[56].mxu1 %vm2594_vm11, %v2581_v59 }
 0x5b9   :  { %v2586_v19 = vadd.f32 %v2982_v27, %v6406_v16 }
 0x5ba   :  { %2709 = vperm.xlu0 %3253, %v6305_v14   ;;  %2705 = vperm.xlu1 %3254, %v6311_v36   ;;  %v2695_v14 = vld [vmem:[%s6456_s7 + $0x18] sm:$0xff] }
 0x5bb   :  { %3181 = vmatprep.mubr.msk.f32.mxu1 %vm2594_vm11, %v2586_v19 }
 0x5bc   :  { %3182 = vmatmul.mubr.msk.f32.gmra.mrb[58].mxu1 %vm2594_vm11, %v2591_v58 }
 0x635   :  { %v2698_v36 = vpop.permute.xlu0 %2697  ;;  %v2702_v3 = vpop.permute.xlu1 %2701 }
 0x639   :  { %v2710_v60 = vpop.permute.xlu0 %2709  ;;  %v2706_v51 = vpop.permute.xlu1 %2705 }
 0x68b   :  { %v3180_v32 = vpop.f32.mrb[56].mxu1 }
 0x68c   :  { %v2673_v17 = vpop.f32.mrb[57].mxu1 }
 0x68d   :  { %v3230_v61 = vpack.c.bf16 %v3180_v32, %v2673_v17 }
 0x68f   :  { %v3183_v46 = vpop.f32.mrb[58].mxu1  ;;  %3231 = vmatprep.subr.bf16.mxu0 %v3230_v61 }
 0x690   :  { %v2683_v18 = vpop.f32.mrb[59].mxu1  ;;  %3233 = vmatpush3.bf16.msra.mxu0 %v3230_v61 }
 0x691   :  { %v3234_v16 = vpack.c.bf16 %v3183_v46, %v2683_v18 }
 0x693   :  { %3235 = vmatprep.subr.bf16.mxu0 %v3234_v16 }
 0x694   :  { %3237 = vmatpush3.bf16.msra.mxu0 %v3234_v16 }
 0x697   :  { %3193 = vmatmul.mubr.msk.f32.vlgmr.msra.gmra.mrb[52].mxu0 %vm7366_vm0, %v2693_v4 }
 0x698   :  { %3195 = vmatprep.mubr.msk.f32.mxu0 %vm7367_vm8, %v2694_v29 }
 0x69b   :  { %3196 = vmatmul.mubr.msk.f32.gmra.mrb[54].mxu0 %vm7368_vm9, %v2695_v14 }
 0x76a   :  { %v3194_v57 = vpop.f32.mrb[52].mxu0 }
 0x76b   :  { %v2796_v33 = vadd.f32 %v3194_v57, %v2702_v3  ;;  %v2790_v45 = vpop.f32.mrb[53].mxu0 }
 0x76c   :  { %v2791_v55 = vadd.f32 %v2790_v45, %v2698_v36 }
 0x76d   :  { %2811 = vst.msk [vmem:[%s6457_s9 + $0x8] sm:$0xff] %vm2809_vm5, %v2796_v33 }
 0x76e   :  { %2810 = vst.msk [vmem:[%s6457_s9] sm:$0xff] %vm2809_vm5, %v2791_v55  ;;  %v3197_v34 = vpop.f32.mrb[54].mxu0 }
 0x76f   :  { %v2806_v8 = vadd.f32 %v3197_v34, %v2710_v60  ;;  %v2800_v13 = vpop.f32.mrb[55].mxu0 }
 0x770   :  { %v2801_v1 = vadd.f32 %v2800_v13, %v2706_v51 }
 0x771   :  { %2813 = vst.msk [vmem:[%s6457_s9 + $0x18] sm:$0xff] %vm2809_vm5, %v2806_v8 }
 0x772   :  { %2812 = vst.msk [vmem:[%s6457_s9 + $0x10] sm:$0xff] %vm2809_vm5, %v2801_v1 }

</bundles_post_ra>
